<compile_context>
chip_gen: v5e
topology: v5e:2x2
jax: 0.10.0
libtpu: 0.0.40
codegen_flags: <defaults>
</compile_context>

<pallas_src>
import functools
import math

import jax
import jax.numpy as jnp
from jax.experimental import pallas as pl
from jax.experimental.pallas import tpu as pltpu


def _pick_chunk(T, max_chunk=16):
    """Largest divisor of T that is <= max_chunk (timesteps per grid step)."""
    for c in range(min(T, max_chunk), 0, -1):
        if T % c == 0:
            return c
    return 1


# ---------------------------------------------------------------------------
# 1) Input projection: gates_x = sum_i x_i @ W_ih_i + bias, for BOTH directions.
#    One big MXU GEMM over the flattened (T*B, Din) input instead of T tiny
#    per-timestep GEMMs inside the recurrence.
# ---------------------------------------------------------------------------
def _make_proj_kernel(n_terms):
    def kernel(*refs):
        xs = refs[:n_terms]
        wfs = refs[n_terms:2 * n_terms]
        wbs = refs[2 * n_terms:3 * n_terms]
        bf_ref = refs[3 * n_terms]
        bb_ref = refs[3 * n_terms + 1]
        gf_ref = refs[3 * n_terms + 2]
        gb_ref = refs[3 * n_terms + 3]

        gf = bf_ref[...]                       # (1, 4H), broadcasts over rows
        gb = bb_ref[...]
        for x_ref, wf_ref, wb_ref in zip(xs, wfs, wbs):
            x = x_ref[...]
            gf = gf + jnp.dot(x, wf_ref[...], preferred_element_type=jnp.float32)
            gb = gb + jnp.dot(x, wb_ref[...], preferred_element_type=jnp.float32)
        gf_ref[...] = gf
        gb_ref[...] = gb
    return kernel


def project_inputs(xs, wf_list, wb_list, bias_f, bias_b, four_h):
    """xs: list of (M, Din_i) slabs. Returns (gates_fwd, gates_bwd), each (M, 4H)."""
    M = xs[0].shape[0]
    TM = M if M <= 512 else 512
    grid = (pl.cdiv(M, TM),)

    in_specs = [pl.BlockSpec((TM, x.shape[1]), lambda m: (m, 0)) for x in xs]
    in_specs += [pl.BlockSpec(w.shape, lambda m: (0, 0)) for w in (wf_list + wb_list)]
    in_specs += [pl.BlockSpec(bias_f.shape, lambda m: (0, 0)),
                 pl.BlockSpec(bias_b.shape, lambda m: (0, 0))]
    out_specs = [pl.BlockSpec((TM, four_h), lambda m: (m, 0)),
                 pl.BlockSpec((TM, four_h), lambda m: (m, 0))]

    return pl.pallas_call(
        _make_proj_kernel(len(xs)),
        out_shape=(jax.ShapeDtypeStruct((M, four_h), jnp.float32),
                   jax.ShapeDtypeStruct((M, four_h), jnp.float32)),
        grid_spec=pltpu.PrefetchScalarGridSpec(
            num_scalar_prefetch=0, grid=grid,
            in_specs=in_specs, out_specs=out_specs),
        compiler_params=pltpu.CompilerParams(
            dimension_semantics=("parallel",)),
    )(*xs, *wf_list, *wb_list, bias_f, bias_b)


# ---------------------------------------------------------------------------
# 2) Fused bidirectional recurrence. One grid step = one time chunk.
#    Forward direction walks chunks left->right; backward direction gets the
#    mirrored chunk via a reversed index_map (no jnp.flip anywhere).
#    Hidden/cell states live in VMEM scratch and carry across grid steps.
#    Gate order matches PyTorch: i, f, g, o.
# ---------------------------------------------------------------------------
def _bilstm_kernel(gxf_ref, gxb_ref, whhf_ref, whhb_ref,
                   of_ref, ob_ref, hf, cf, hb, cb):
    nt = pl.program_id(0)

    @pl.when(nt == 0)
    def _():
        hf[...] = jnp.zeros_like(hf)
        cf[...] = jnp.zeros_like(cf)
        hb[...] = jnp.zeros_like(hb)
        cb[...] = jnp.zeros_like(cb)

    H = hf.shape[-1]
    TC = gxf_ref.shape[0]

    def cell(gx, h, c, whh_ref):
        gates = gx + jnp.dot(h, whh_ref[...], preferred_element_type=jnp.float32)
        i = jax.nn.sigmoid(gates[:, 0:H])
        f = jax.nn.sigmoid(gates[:, H:2 * H])
        g = jnp.tanh(gates[:, 2 * H:3 * H])
        o = jax.nn.sigmoid(gates[:, 3 * H:4 * H])
        c_new = f * c + i * g
        h_new = o * jnp.tanh(c_new)
        return h_new, c_new

    # Fully unrolled chunk: one long basic block so MXU/VPU/EUP ops co-issue.
    for j in range(TC):
        # forward direction: local time j
        h_new, c_new = cell(gxf_ref[j], hf[...], cf[...], whhf_ref)
        hf[...] = h_new
        cf[...] = c_new
        of_ref[j] = h_new.astype(of_ref.dtype)

        # backward direction: local time TC-1-j of the mirrored chunk
        jb = TC - 1 - j
        hb_new, cb_new = cell(gxb_ref[jb], hb[...], cb[...], whhb_ref)
        hb[...] = hb_new
        cb[...] = cb_new
        ob_ref[jb] = hb_new.astype(ob_ref.dtype)


def bilstm_layer(gxf, gxb, whh_f, whh_b, hidden_size, chunk):
    """gxf/gxb: (T, B, 4H) precomputed input gates. Returns fwd/bwd hidden seqs (T, B, H)."""
    T, B, G = gxf.shape
    H = hidden_size
    NC = T // chunk
    return pl.pallas_call(
        _bilstm_kernel,
        out_shape=(jax.ShapeDtypeStruct((T, B, H), jnp.float32),
                   jax.ShapeDtypeStruct((T, B, H), jnp.float32)),
        grid_spec=pltpu.PrefetchScalarGridSpec(
            num_scalar_prefetch=0,
            grid=(NC,),
            in_specs=[
                pl.BlockSpec((chunk, B, G), lambda nt: (nt, 0, 0)),
                pl.BlockSpec((chunk, B, G), lambda nt: (NC - 1 - nt, 0, 0)),
                pl.BlockSpec((H, G), lambda nt: (0, 0)),
                pl.BlockSpec((H, G), lambda nt: (0, 0)),
            ],
            out_specs=[
                pl.BlockSpec((chunk, B, H), lambda nt: (nt, 0, 0)),
                pl.BlockSpec((chunk, B, H), lambda nt: (NC - 1 - nt, 0, 0)),
            ],
            scratch_shapes=[pltpu.VMEM((B, H), jnp.float32)] * 4,
        ),
        compiler_params=pltpu.CompilerParams(
            dimension_semantics=("arbitrary",)),  # sequential carry across chunks
    )(gxf, gxb, whh_f, whh_b)


# ---------------------------------------------------------------------------
# 3) Head: BatchNorm1d (eval mode, split into fwd/bwd halves) + Linear.
#    Takes the two halves of out[:, -1, :] directly -> no concat tensor needed.
# ---------------------------------------------------------------------------
def _head_kernel(lf_ref, lb_ref,
                 gamma_f, beta_f, mean_f, var_f,
                 gamma_b, beta_b, mean_b, var_b,
                 wf_ref, wb_ref, fcb_ref, o_ref):
    yf = ((lf_ref[...] - mean_f[...]) * jax.lax.rsqrt(var_f[...] + 1e-5)
          * gamma_f[...] + beta_f[...])
    yb = ((lb_ref[...] - mean_b[...]) * jax.lax.rsqrt(var_b[...] + 1e-5)
          * gamma_b[...] + beta_b[...])
    o_ref[...] = (jnp.dot(yf, wf_ref[...], preferred_element_type=jnp.float32)
                  + jnp.dot(yb, wb_ref[...], preferred_element_type=jnp.float32)
                  + fcb_ref[...])


def head(last_f, last_b, bn, fc_w, fc_b, hidden_size):
    H = hidden_size
    gamma, beta, mean, var = bn
    B = last_f.shape[0]
    C = fc_w.shape[1]
    return pl.pallas_call(
        _head_kernel,
        out_shape=jax.ShapeDtypeStruct((B, C), jnp.float32),
    )(last_f, last_b,
      gamma[:, :H], beta[:, :H], mean[:, :H], var[:, :H],
      gamma[:, H:], beta[:, H:], mean[:, H:], var[:, H:],
      fc_w[:H], fc_w[H:], fc_b)


# ---------------------------------------------------------------------------
# Parameter init (deterministic, PyTorch-style uniform(-1/sqrt(H), 1/sqrt(H)))
# ---------------------------------------------------------------------------
def init_lstm_dir(key, input_size, hidden_size):
    H = hidden_size
    k = 1.0 / math.sqrt(H)
    k0, k1, k2, k3 = jax.random.split(key, 4)
    w_ih = jax.random.uniform(k0, (4 * H, input_size), jnp.float32, -k, k)
    w_hh = jax.random.uniform(k1, (4 * H, H), jnp.float32, -k, k)
    b_ih = jax.random.uniform(k2, (4 * H,), jnp.float32, -k, k)
    b_hh = jax.random.uniform(k3, (4 * H,), jnp.float32, -k, k)
    # Stored pre-transposed for the kernels' (x @ W) layout; biases combined.
    return (w_ih.T, w_hh.T, (b_ih + b_hh).reshape(1, 4 * H))


def init_params(key, n_vocab, embed, hidden, num_layers, num_classes):
    keys = jax.random.split(key, 2 + 2 * num_layers + 1)
    emb = jax.random.normal(keys[0], (n_vocab, embed), jnp.float32) * 0.1
    emb = emb.at[n_vocab - 1].set(0.0)  # padding_idx = n_vocab - 1

    lstm_layers = []
    for layer in range(num_layers):
        in_size = embed if layer == 0 else 2 * hidden
        fwd = init_lstm_dir(keys[1 + 2 * layer], in_size, hidden)
        bwd = init_lstm_dir(keys[2 + 2 * layer], in_size, hidden)
        lstm_layers.append({"fwd": fwd, "bwd": bwd})

    F = 2 * hidden
    bn_gamma = jnp.ones((1, F), jnp.float32)
    bn_beta = jnp.zeros((1, F), jnp.float32)
    bn_mean = jnp.zeros((1, F), jnp.float32)
    bn_var = jnp.ones((1, F), jnp.float32)

    kf = keys[-1]
    kb = 1.0 / math.sqrt(F)
    fc_w = jax.random.uniform(kf, (F, num_classes), jnp.float32, -kb, kb)
    fc_b = jnp.zeros((1, num_classes), jnp.float32)

    return {
        "embedding": emb,
        "lstm": lstm_layers,
        "bn": (bn_gamma, bn_beta, bn_mean, bn_var),
        "fc": (fc_w, fc_b),
    }


# ---------------------------------------------------------------------------
# Full forward
# ---------------------------------------------------------------------------
@functools.partial(jax.jit, static_argnames=("hidden_size",))
def textrnn_forward(tokens, params, *, hidden_size):
    """tokens: (B, T) int32 -> logits (B, num_classes) f32."""
    H = hidden_size
    B, T = tokens.shape
    emb = jnp.take(params["embedding"], tokens.T, axis=0)   # (T, B, E) — glue gather
    E = emb.shape[-1]
    chunk = _pick_chunk(T)

    # Layer input kept as a list of 2-D slabs: [x] for layer 0, [fwd, bwd] after.
    xs = [emb.reshape(T * B, E)]
    last_f = last_b = None
    for layer in params["lstm"]:
        wih_f, whh_f, b_f = layer["fwd"]
        wih_b, whh_b, b_b = layer["bwd"]

        # Split W_ih rows to match the split layer input (concat(x)@W == xf@Wtop + xb@Wbot).
        wf_list, wb_list, off = [], [], 0
        for x in xs:
            d = x.shape[1]
            wf_list.append(wih_f[off:off + d])
            wb_list.append(wih_b[off:off + d])
            off += d

        gf2d, gb2d = project_inputs(xs, wf_list, wb_list, b_f, b_b, 4 * H)
        out_f, out_b = bilstm_layer(gf2d.reshape(T, B, 4 * H),
                                    gb2d.reshape(T, B, 4 * H),
                                    whh_f, whh_b, H, chunk)

        xs = [out_f.reshape(T * B, H), out_b.reshape(T * B, H)]
        last_f, last_b = out_f[T - 1], out_b[T - 1]   # out[:, -1, :] halves

    fc_w, fc_b = params["fc"]
    return head(last_f, last_b, params["bn"], fc_w, fc_b, H)


if __name__ == "__main__":
    B, T = 4, 8
    n_vocab, embed = 32, 16
    hidden, num_layers, num_classes = 32, 2, 5

    key = jax.random.PRNGKey(0)
    k_params, k_tokens = jax.random.split(key)

    params = init_params(k_params, n_vocab, embed, hidden, num_layers,
                         num_classes)
    tokens = jax.random.randint(k_tokens, (B, T), 0, n_vocab, dtype=jnp.int32)

    logits = textrnn_forward(tokens, params, hidden_size=hidden)
    jax.block_until_ready(logits)
    assert logits.shape == (B, num_classes)
    print("KERNEL_OK")
</pallas_src>

<mosaic_0001>
module attributes {stable_mosaic.version = 11 : i64} {
  func.func @kernel(%arg0: i32, %arg1: memref<32x16xf32, #tpu.memory_space<vmem>>, %arg2: memref<16x128xf32, #tpu.memory_space<vmem>>, %arg3: memref<16x128xf32, #tpu.memory_space<vmem>>, %arg4: memref<1x128xf32, #tpu.memory_space<vmem>>, %arg5: memref<1x128xf32, #tpu.memory_space<vmem>>, %arg6: memref<32x128xf32, #tpu.memory_space<vmem>>, %arg7: memref<32x128xf32, #tpu.memory_space<vmem>>) attributes {dimension_semantics = [#tpu.dimension_semantics<parallel>], iteration_bounds = array<i64: 1>, scalar_prefetch = 0 : i64, scratch_operands = 0 : i64, tpu.core_type = #tpu.core_type<tc>, window_params = [{transform_indices = @transform_0, window_bounds = array<i64: 32, 16>}, {pipeline_mode = #tpu.pipeline_mode<synchronous>, transform_indices = @transform_1, window_bounds = array<i64: 16, 128>}, {pipeline_mode = #tpu.pipeline_mode<synchronous>, transform_indices = @transform_2, window_bounds = array<i64: 16, 128>}, {pipeline_mode = #tpu.pipeline_mode<synchronous>, transform_indices = @transform_3, window_bounds = array<i64: 1, 128>}, {pipeline_mode = #tpu.pipeline_mode<synchronous>, transform_indices = @transform_4, window_bounds = array<i64: 1, 128>}, {transform_indices = @transform_5, window_bounds = array<i64: 32, 128>}, {transform_indices = @transform_6, window_bounds = array<i64: 32, 128>}]} {
    %c0 = arith.constant 0 : index
    %c0_0 = arith.constant 0 : index
    %0 = vector.load %arg4[%c0, %c0_0] : memref<1x128xf32, #tpu.memory_space<vmem>>, vector<1x128xf32>
    %c0_1 = arith.constant 0 : index
    %c0_2 = arith.constant 0 : index
    %1 = vector.load %arg5[%c0_1, %c0_2] : memref<1x128xf32, #tpu.memory_space<vmem>>, vector<1x128xf32>
    %c0_3 = arith.constant 0 : index
    %c0_4 = arith.constant 0 : index
    %2 = vector.load %arg1[%c0_3, %c0_4] : memref<32x16xf32, #tpu.memory_space<vmem>>, vector<32x16xf32>
    %c0_5 = arith.constant 0 : index
    %c0_6 = arith.constant 0 : index
    %3 = vector.load %arg2[%c0_5, %c0_6] : memref<16x128xf32, #tpu.memory_space<vmem>>, vector<16x128xf32>
    %cst = arith.constant dense<0.000000e+00> : vector<32x128xf32>
    %4 = tpu.matmul %2, %3, %cst {dimension_numbers = #tpu.dot_dimension_numbers<[1], [0], [0], [1], [0, 0, 1, 1], [], []>} : vector<32x16xf32>, vector<16x128xf32>, vector<32x128xf32> -> vector<32x128xf32>
    %5 = vector.broadcast %0 : vector<1x128xf32> to vector<32x128xf32>
    %6 = arith.addf %5, %4 : vector<32x128xf32>
    %c0_7 = arith.constant 0 : index
    %c0_8 = arith.constant 0 : index
    %7 = vector.load %arg3[%c0_7, %c0_8] : memref<16x128xf32, #tpu.memory_space<vmem>>, vector<16x128xf32>
    %cst_9 = arith.constant dense<0.000000e+00> : vector<32x128xf32>
    %8 = tpu.matmul %2, %7, %cst_9 {dimension_numbers = #tpu.dot_dimension_numbers<[1], [0], [0], [1], [0, 0, 1, 1], [], []>} : vector<32x16xf32>, vector<16x128xf32>, vector<32x128xf32> -> vector<32x128xf32>
    %9 = vector.broadcast %1 : vector<1x128xf32> to vector<32x128xf32>
    %10 = arith.addf %9, %8 : vector<32x128xf32>
    %c0_10 = arith.constant 0 : index
    %c0_11 = arith.constant 0 : index
    %11 = vector.load %arg6[%c0_10, %c0_11] : memref<32x128xf32, #tpu.memory_space<vmem>>, vector<32x128xf32>
    tpu.vector_store %arg6[%c0_10, %c0_11], %6 {strides = array<i32>} : memref<32x128xf32, #tpu.memory_space<vmem>>, vector<32x128xf32>,
    %c0_12 = arith.constant 0 : index
    %c0_13 = arith.constant 0 : index
    %12 = vector.load %arg7[%c0_12, %c0_13] : memref<32x128xf32, #tpu.memory_space<vmem>>, vector<32x128xf32>
    tpu.vector_store %arg7[%c0_12, %c0_13], %10 {strides = array<i32>} : memref<32x128xf32, #tpu.memory_space<vmem>>, vector<32x128xf32>,
    return
  }
  func.func @transform_0(%arg0: i32) -> (i32, i32) {
    %c0_i32 = arith.constant 0 : i32
    %c0_i32_0 = arith.constant 0 : i32
    return %arg0, %c0_i32 : i32, i32
  }
  func.func @transform_1(%arg0: i32) -> (i32, i32) {
    %c0_i32 = arith.constant 0 : i32
    %c0_i32_0 = arith.constant 0 : i32
    %c0_i32_1 = arith.constant 0 : i32
    return %c0_i32, %c0_i32_0 : i32, i32
  }
  func.func @transform_2(%arg0: i32) -> (i32, i32) {
    %c0_i32 = arith.constant 0 : i32
    %c0_i32_0 = arith.constant 0 : i32
    %c0_i32_1 = arith.constant 0 : i32
    return %c0_i32, %c0_i32_0 : i32, i32
  }
  func.func @transform_3(%arg0: i32) -> (i32, i32) {
    %c0_i32 = arith.constant 0 : i32
    %c0_i32_0 = arith.constant 0 : i32
    %c0_i32_1 = arith.constant 0 : i32
    return %c0_i32, %c0_i32_0 : i32, i32
  }
  func.func @transform_4(%arg0: i32) -> (i32, i32) {
    %c0_i32 = arith.constant 0 : i32
    %c0_i32_0 = arith.constant 0 : i32
    %c0_i32_1 = arith.constant 0 : i32
    return %c0_i32, %c0_i32_0 : i32, i32
  }
  func.func @transform_5(%arg0: i32) -> (i32, i32) {
    %c0_i32 = arith.constant 0 : i32
    %c0_i32_0 = arith.constant 0 : i32
    return %arg0, %c0_i32 : i32, i32
  }
  func.func @transform_6(%arg0: i32) -> (i32, i32) {
    %c0_i32 = arith.constant 0 : i32
    %c0_i32_0 = arith.constant 0 : i32
    return %arg0, %c0_i32 : i32, i32
  }
}

module attributes {stable_mosaic.version = 11 : i64} {
  func.func @kernel(%arg0: i32, %arg1: memref<32x32xf32, #tpu.memory_space<vmem>>, %arg2: memref<32x32xf32, #tpu.memory_space<vmem>>, %arg3: memref<32x128xf32, #tpu.memory_space<vmem>>, %arg4: memref<32x128xf32, #tpu.memory_space<vmem>>, %arg5: memref<32x128xf32, #tpu.memory_space<vmem>>, %arg6: memref<32x128xf32, #tpu.memory_space<vmem>>, %arg7: memref<1x128xf32, #tpu.memory_space<vmem>>, %arg8: memref<1x128xf32, #tpu.memory_space<vmem>>, %arg9: memref<32x128xf32, #tpu.memory_space<vmem>>, %arg10: memref<32x128xf32, #tpu.memory_space<vmem>>) attributes {dimension_semantics = [#tpu.dimension_semantics<parallel>], iteration_bounds = array<i64: 1>, scalar_prefetch = 0 : i64, scratch_operands = 0 : i64, tpu.core_type = #tpu.core_type<tc>, window_params = [{transform_indices = @transform_0, window_bounds = array<i64: 32, 32>}, {transform_indices = @transform_1, window_bounds = array<i64: 32, 32>}, {pipeline_mode = #tpu.pipeline_mode<synchronous>, transform_indices = @transform_2, window_bounds = array<i64: 32, 128>}, {pipeline_mode = #tpu.pipeline_mode<synchronous>, transform_indices = @transform_3, window_bounds = array<i64: 32, 128>}, {pipeline_mode = #tpu.pipeline_mode<synchronous>, transform_indices = @transform_4, window_bounds = array<i64: 32, 128>}, {pipeline_mode = #tpu.pipeline_mode<synchronous>, transform_indices = @transform_5, window_bounds = array<i64: 32, 128>}, {pipeline_mode = #tpu.pipeline_mode<synchronous>, transform_indices = @transform_6, window_bounds = array<i64: 1, 128>}, {pipeline_mode = #tpu.pipeline_mode<synchronous>, transform_indices = @transform_7, window_bounds = array<i64: 1, 128>}, {transform_indices = @transform_8, window_bounds = array<i64: 32, 128>}, {transform_indices = @transform_9, window_bounds = array<i64: 32, 128>}]} {
    %c0 = arith.constant 0 : index
    %c0_0 = arith.constant 0 : index
    %0 = vector.load %arg7[%c0, %c0_0] : memref<1x128xf32, #tpu.memory_space<vmem>>, vector<1x128xf32>
    %c0_1 = arith.constant 0 : index
    %c0_2 = arith.constant 0 : index
    %1 = vector.load %arg8[%c0_1, %c0_2] : memref<1x128xf32, #tpu.memory_space<vmem>>, vector<1x128xf32>
    %c0_3 = arith.constant 0 : index
    %c0_4 = arith.constant 0 : index
    %2 = vector.load %arg1[%c0_3, %c0_4] : memref<32x32xf32, #tpu.memory_space<vmem>>, vector<32x32xf32>
    %c0_5 = arith.constant 0 : index
    %c0_6 = arith.constant 0 : index
    %3 = vector.load %arg3[%c0_5, %c0_6] : memref<32x128xf32, #tpu.memory_space<vmem>>, vector<32x128xf32>
    %cst = arith.constant dense<0.000000e+00> : vector<32x128xf32>
    %4 = tpu.matmul %2, %3, %cst {dimension_numbers = #tpu.dot_dimension_numbers<[1], [0], [0], [1], [0, 0, 1, 1], [], []>} : vector<32x32xf32>, vector<32x128xf32>, vector<32x128xf32> -> vector<32x128xf32>
    %5 = vector.broadcast %0 : vector<1x128xf32> to vector<32x128xf32>
    %6 = arith.addf %5, %4 : vector<32x128xf32>
    %c0_7 = arith.constant 0 : index
    %c0_8 = arith.constant 0 : index
    %7 = vector.load %arg5[%c0_7, %c0_8] : memref<32x128xf32, #tpu.memory_space<vmem>>, vector<32x128xf32>
    %cst_9 = arith.constant dense<0.000000e+00> : vector<32x128xf32>
    %8 = tpu.matmul %2, %7, %cst_9 {dimension_numbers = #tpu.dot_dimension_numbers<[1], [0], [0], [1], [0, 0, 1, 1], [], []>} : vector<32x32xf32>, vector<32x128xf32>, vector<32x128xf32> -> vector<32x128xf32>
    %9 = vector.broadcast %1 : vector<1x128xf32> to vector<32x128xf32>
    %10 = arith.addf %9, %8 : vector<32x128xf32>
    %c0_10 = arith.constant 0 : index
    %c0_11 = arith.constant 0 : index
    %11 = vector.load %arg2[%c0_10, %c0_11] : memref<32x32xf32, #tpu.memory_space<vmem>>, vector<32x32xf32>
    %c0_12 = arith.constant 0 : index
    %c0_13 = arith.constant 0 : index
    %12 = vector.load %arg4[%c0_12, %c0_13] : memref<32x128xf32, #tpu.memory_space<vmem>>, vector<32x128xf32>
    %cst_14 = arith.constant dense<0.000000e+00> : vector<32x128xf32>
    %13 = tpu.matmul %11, %12, %cst_14 {dimension_numbers = #tpu.dot_dimension_numbers<[1], [0], [0], [1], [0, 0, 1, 1], [], []>} : vector<32x32xf32>, vector<32x128xf32>, vector<32x128xf32> -> vector<32x128xf32>
    %14 = arith.addf %6, %13 : vector<32x128xf32>
    %c0_15 = arith.constant 0 : index
    %c0_16 = arith.constant 0 : index
    %15 = vector.load %arg6[%c0_15, %c0_16] : memref<32x128xf32, #tpu.memory_space<vmem>>, vector<32x128xf32>
    %cst_17 = arith.constant dense<0.000000e+00> : vector<32x128xf32>
    %16 = tpu.matmul %11, %15, %cst_17 {dimension_numbers = #tpu.dot_dimension_numbers<[1], [0], [0], [1], [0, 0, 1, 1], [], []>} : vector<32x32xf32>, vector<32x128xf32>, vector<32x128xf32> -> vector<32x128xf32>
    %17 = arith.addf %10, %16 : vector<32x128xf32>
    %c0_18 = arith.constant 0 : index
    %c0_19 = arith.constant 0 : index
    %18 = vector.load %arg9[%c0_18, %c0_19] : memref<32x128xf32, #tpu.memory_space<vmem>>, vector<32x128xf32>
    tpu.vector_store %arg9[%c0_18, %c0_19], %14 {strides = array<i32>} : memref<32x128xf32, #tpu.memory_space<vmem>>, vector<32x128xf32>,
    %c0_20 = arith.constant 0 : index
    %c0_21 = arith.constant 0 : index
    %19 = vector.load %arg10[%c0_20, %c0_21] : memref<32x128xf32, #tpu.memory_space<vmem>>, vector<32x128xf32>
    tpu.vector_store %arg10[%c0_20, %c0_21], %17 {strides = array<i32>} : memref<32x128xf32, #tpu.memory_space<vmem>>, vector<32x128xf32>,
    return
  }
  func.func @transform_0(%arg0: i32) -> (i32, i32) {
    %c0_i32 = arith.constant 0 : i32
    %c0_i32_0 = arith.constant 0 : i32
    return %arg0, %c0_i32 : i32, i32
  }
  func.func @transform_1(%arg0: i32) -> (i32, i32) {
    %c0_i32 = arith.constant 0 : i32
    %c0_i32_0 = arith.constant 0 : i32
    return %arg0, %c0_i32 : i32, i32
  }
  func.func @transform_2(%arg0: i32) -> (i32, i32) {
    %c0_i32 = arith.constant 0 : i32
    %c0_i32_0 = arith.constant 0 : i32
    %c0_i32_1 = arith.constant 0 : i32
    return %c0_i32, %c0_i32_0 : i32, i32
  }
  func.func @transform_3(%arg0: i32) -> (i32, i32) {
    %c0_i32 = arith.constant 0 : i32
    %c0_i32_0 = arith.constant 0 : i32
    %c0_i32_1 = arith.constant 0 : i32
    return %c0_i32, %c0_i32_0 : i32, i32
  }
  func.func @transform_4(%arg0: i32) -> (i32, i32) {
    %c0_i32 = arith.constant 0 : i32
    %c0_i32_0 = arith.constant 0 : i32
    %c0_i32_1 = arith.constant 0 : i32
    return %c0_i32, %c0_i32_0 : i32, i32
  }
  func.func @transform_5(%arg0: i32) -> (i32, i32) {
    %c0_i32 = arith.constant 0 : i32
    %c0_i32_0 = arith.constant 0 : i32
    %c0_i32_1 = arith.constant 0 : i32
    return %c0_i32, %c0_i32_0 : i32, i32
  }
  func.func @transform_6(%arg0: i32) -> (i32, i32) {
    %c0_i32 = arith.constant 0 : i32
    %c0_i32_0 = arith.constant 0 : i32
    %c0_i32_1 = arith.constant 0 : i32
    return %c0_i32, %c0_i32_0 : i32, i32
  }
  func.func @transform_7(%arg0: i32) -> (i32, i32) {
    %c0_i32 = arith.constant 0 : i32
    %c0_i32_0 = arith.constant 0 : i32
    %c0_i32_1 = arith.constant 0 : i32
    return %c0_i32, %c0_i32_0 : i32, i32
  }
  func.func @transform_8(%arg0: i32) -> (i32, i32) {
    %c0_i32 = arith.constant 0 : i32
    %c0_i32_0 = arith.constant 0 : i32
    return %arg0, %c0_i32 : i32, i32
  }
  func.func @transform_9(%arg0: i32) -> (i32, i32) {
    %c0_i32 = arith.constant 0 : i32
    %c0_i32_0 = arith.constant 0 : i32
    return %arg0, %c0_i32 : i32, i32
  }
}

module attributes {stable_mosaic.version = 11 : i64} {
  func.func @_bilstm_kernel(%arg0: i32, %arg1: memref<8x4x128xf32, #tpu.memory_space<vmem>>, %arg2: memref<8x4x128xf32, #tpu.memory_space<vmem>>, %arg3: memref<32x128xf32, #tpu.memory_space<vmem>>, %arg4: memref<32x128xf32, #tpu.memory_space<vmem>>, %arg5: memref<8x4x32xf32, #tpu.memory_space<vmem>>, %arg6: memref<8x4x32xf32, #tpu.memory_space<vmem>>, %arg7: memref<4x32xf32, #tpu.memory_space<vmem>>, %arg8: memref<4x32xf32, #tpu.memory_space<vmem>>, %arg9: memref<4x32xf32, #tpu.memory_space<vmem>>, %arg10: memref<4x32xf32, #tpu.memory_space<vmem>>) attributes {dimension_semantics = [#tpu.dimension_semantics<arbitrary>], iteration_bounds = array<i64: 1>, scalar_prefetch = 0 : i64, scratch_operands = 4 : i64, tpu.core_type = #tpu.core_type<tc>, window_params = [{transform_indices = @transform_0, window_bounds = array<i64: 8, 4, 128>}, {transform_indices = @transform_1, window_bounds = array<i64: 8, 4, 128>}, {pipeline_mode = #tpu.pipeline_mode<synchronous>, transform_indices = @transform_2, window_bounds = array<i64: 32, 128>}, {pipeline_mode = #tpu.pipeline_mode<synchronous>, transform_indices = @transform_3, window_bounds = array<i64: 32, 128>}, {transform_indices = @transform_4, window_bounds = array<i64: 8, 4, 32>}, {transform_indices = @transform_5, window_bounds = array<i64: 8, 4, 32>}]} {
    %c0_i32 = arith.constant 0 : i32
    %0 = arith.cmpi eq, %arg0, %c0_i32 : i32
    %1 = arith.extui %0 : i1 to i32
    %c0_i32_0 = arith.constant 0 : i32
    %2 = arith.cmpi ne, %1, %c0_i32_0 : i32
    scf.if %2 {
      %cst_312 = arith.constant 0.000000e+00 : f32
      %595 = vector.broadcast %cst_312 : f32 to vector<4x32xf32>
      %c0_313 = arith.constant 0 : index
      %c0_314 = arith.constant 0 : index
      %596 = vector.load %arg7[%c0_313, %c0_314] : memref<4x32xf32, #tpu.memory_space<vmem>>, vector<4x32xf32>
      tpu.vector_store %arg7[%c0_313, %c0_314], %595 {strides = array<i32>} : memref<4x32xf32, #tpu.memory_space<vmem>>, vector<4x32xf32>,
      %cst_315 = arith.constant 0.000000e+00 : f32
      %597 = vector.broadcast %cst_315 : f32 to vector<4x32xf32>
      %c0_316 = arith.constant 0 : index
      %c0_317 = arith.constant 0 : index
      %598 = vector.load %arg8[%c0_316, %c0_317] : memref<4x32xf32, #tpu.memory_space<vmem>>, vector<4x32xf32>
      tpu.vector_store %arg8[%c0_316, %c0_317], %597 {strides = array<i32>} : memref<4x32xf32, #tpu.memory_space<vmem>>, vector<4x32xf32>,
      %cst_318 = arith.constant 0.000000e+00 : f32
      %599 = vector.broadcast %cst_318 : f32 to vector<4x32xf32>
      %c0_319 = arith.constant 0 : index
      %c0_320 = arith.constant 0 : index
      %600 = vector.load %arg9[%c0_319, %c0_320] : memref<4x32xf32, #tpu.memory_space<vmem>>, vector<4x32xf32>
      tpu.vector_store %arg9[%c0_319, %c0_320], %599 {strides = array<i32>} : memref<4x32xf32, #tpu.memory_space<vmem>>, vector<4x32xf32>,
      %cst_321 = arith.constant 0.000000e+00 : f32
      %601 = vector.broadcast %cst_321 : f32 to vector<4x32xf32>
      %c0_322 = arith.constant 0 : index
      %c0_323 = arith.constant 0 : index
      %602 = vector.load %arg10[%c0_322, %c0_323] : memref<4x32xf32, #tpu.memory_space<vmem>>, vector<4x32xf32>
      tpu.vector_store %arg10[%c0_322, %c0_323], %601 {strides = array<i32>} : memref<4x32xf32, #tpu.memory_space<vmem>>, vector<4x32xf32>,
    } else {
    }
    %c0 = arith.constant 0 : index
    %c0_1 = arith.constant 0 : index
    %c0_2 = arith.constant 0 : index
    %3 = vector.load %arg1[%c0, %c0_1, %c0_2] : memref<8x4x128xf32, #tpu.memory_space<vmem>>, vector<1x4x128xf32>
    %4 = vector.shape_cast %3 : vector<1x4x128xf32> to vector<4x128xf32>
    %c0_3 = arith.constant 0 : index
    %c0_4 = arith.constant 0 : index
    %5 = vector.load %arg7[%c0_3, %c0_4] : memref<4x32xf32, #tpu.memory_space<vmem>>, vector<4x32xf32>
    %c0_5 = arith.constant 0 : index
    %c0_6 = arith.constant 0 : index
    %6 = vector.load %arg8[%c0_5, %c0_6] : memref<4x32xf32, #tpu.memory_space<vmem>>, vector<4x32xf32>
    %c0_7 = arith.constant 0 : index
    %c0_8 = arith.constant 0 : index
    %7 = vector.load %arg3[%c0_7, %c0_8] : memref<32x128xf32, #tpu.memory_space<vmem>>, vector<32x128xf32>
    %cst = arith.constant dense<0.000000e+00> : vector<4x128xf32>
    %8 = tpu.matmul %5, %7, %cst {dimension_numbers = #tpu.dot_dimension_numbers<[1], [0], [0], [1], [0, 0, 1, 1], [], []>} : vector<4x32xf32>, vector<32x128xf32>, vector<4x128xf32> -> vector<4x128xf32>
    %9 = arith.addf %4, %8 : vector<4x128xf32>
    %10 = vector.extract_strided_slice %9 {offsets = [0, 0], sizes = [4, 32], strides = [1, 1]} : vector<4x128xf32> to vector<4x32xf32>
    %11 = arith.negf %10 : vector<4x32xf32>
    %12 = math.exp %11 : vector<4x32xf32>
    %cst_9 = arith.constant 1.000000e+00 : f32
    %13 = vector.broadcast %cst_9 : f32 to vector<4x32xf32>
    %14 = arith.addf %13, %12 : vector<4x32xf32>
    %15 = arith.divf %13, %14 : vector<4x32xf32>
    %16 = vector.extract_strided_slice %9 {offsets = [0, 32], sizes = [4, 32], strides = [1, 1]} : vector<4x128xf32> to vector<4x32xf32>
    %17 = arith.negf %16 : vector<4x32xf32>
    %18 = math.exp %17 : vector<4x32xf32>
    %cst_10 = arith.constant 1.000000e+00 : f32
    %19 = vector.broadcast %cst_10 : f32 to vector<4x32xf32>
    %20 = arith.addf %19, %18 : vector<4x32xf32>
    %21 = arith.divf %19, %20 : vector<4x32xf32>
    %22 = vector.extract_strided_slice %9 {offsets = [0, 64], sizes = [4, 32], strides = [1, 1]} : vector<4x128xf32> to vector<4x32xf32>
    %23 = math.tanh %22 : vector<4x32xf32>
    %24 = vector.extract_strided_slice %9 {offsets = [0, 96], sizes = [4, 32], strides = [1, 1]} : vector<4x128xf32> to vector<4x32xf32>
    %25 = arith.negf %24 : vector<4x32xf32>
    %26 = math.exp %25 : vector<4x32xf32>
    %cst_11 = arith.constant 1.000000e+00 : f32
    %27 = vector.broadcast %cst_11 : f32 to vector<4x32xf32>
    %28 = arith.addf %27, %26 : vector<4x32xf32>
    %29 = arith.divf %27, %28 : vector<4x32xf32>
    %30 = arith.mulf %21, %6 : vector<4x32xf32>
    %31 = arith.mulf %15, %23 : vector<4x32xf32>
    %32 = arith.addf %30, %31 : vector<4x32xf32>
    %33 = math.tanh %32 : vector<4x32xf32>
    %34 = arith.mulf %29, %33 : vector<4x32xf32>
    %c0_12 = arith.constant 0 : index
    %c0_13 = arith.constant 0 : index
    %35 = vector.load %arg7[%c0_12, %c0_13] : memref<4x32xf32, #tpu.memory_space<vmem>>, vector<4x32xf32>
    tpu.vector_store %arg7[%c0_12, %c0_13], %34 {strides = array<i32>} : memref<4x32xf32, #tpu.memory_space<vmem>>, vector<4x32xf32>,
    %c0_14 = arith.constant 0 : index
    %c0_15 = arith.constant 0 : index
    %36 = vector.load %arg8[%c0_14, %c0_15] : memref<4x32xf32, #tpu.memory_space<vmem>>, vector<4x32xf32>
    tpu.vector_store %arg8[%c0_14, %c0_15], %32 {strides = array<i32>} : memref<4x32xf32, #tpu.memory_space<vmem>>, vector<4x32xf32>,
    %c0_16 = arith.constant 0 : index
    %c0_17 = arith.constant 0 : index
    %c0_18 = arith.constant 0 : index
    %37 = vector.load %arg5[%c0_16, %c0_17, %c0_18] : memref<8x4x32xf32, #tpu.memory_space<vmem>>, vector<1x4x32xf32>
    %38 = vector.shape_cast %37 : vector<1x4x32xf32> to vector<4x32xf32>
    %39 = vector.shape_cast %34 : vector<4x32xf32> to vector<1x4x32xf32>
    tpu.vector_store %arg5[%c0_16, %c0_17, %c0_18], %39 {strides = array<i32>} : memref<8x4x32xf32, #tpu.memory_space<vmem>>, vector<1x4x32xf32>,
    %c7 = arith.constant 7 : index
    %c0_19 = arith.constant 0 : index
    %c0_20 = arith.constant 0 : index
    %40 = vector.load %arg2[%c7, %c0_19, %c0_20] : memref<8x4x128xf32, #tpu.memory_space<vmem>>, vector<1x4x128xf32>
    %41 = vector.shape_cast %40 : vector<1x4x128xf32> to vector<4x128xf32>
    %c0_21 = arith.constant 0 : index
    %c0_22 = arith.constant 0 : index
    %42 = vector.load %arg9[%c0_21, %c0_22] : memref<4x32xf32, #tpu.memory_space<vmem>>, vector<4x32xf32>
    %c0_23 = arith.constant 0 : index
    %c0_24 = arith.constant 0 : index
    %43 = vector.load %arg10[%c0_23, %c0_24] : memref<4x32xf32, #tpu.memory_space<vmem>>, vector<4x32xf32>
    %c0_25 = arith.constant 0 : index
    %c0_26 = arith.constant 0 : index
    %44 = vector.load %arg4[%c0_25, %c0_26] : memref<32x128xf32, #tpu.memory_space<vmem>>, vector<32x128xf32>
    %cst_27 = arith.constant dense<0.000000e+00> : vector<4x128xf32>
    %45 = tpu.matmul %42, %44, %cst_27 {dimension_numbers = #tpu.dot_dimension_numbers<[1], [0], [0], [1], [0, 0, 1, 1], [], []>} : vector<4x32xf32>, vector<32x128xf32>, vector<4x128xf32> -> vector<4x128xf32>
    %46 = arith.addf %41, %45 : vector<4x128xf32>
    %47 = vector.extract_strided_slice %46 {offsets = [0, 0], sizes = [4, 32], strides = [1, 1]} : vector<4x128xf32> to vector<4x32xf32>
    %48 = arith.negf %47 : vector<4x32xf32>
    %49 = math.exp %48 : vector<4x32xf32>
    %cst_28 = arith.constant 1.000000e+00 : f32
    %50 = vector.broadcast %cst_28 : f32 to vector<4x32xf32>
    %51 = arith.addf %50, %49 : vector<4x32xf32>
    %52 = arith.divf %50, %51 : vector<4x32xf32>
    %53 = vector.extract_strided_slice %46 {offsets = [0, 32], sizes = [4, 32], strides = [1, 1]} : vector<4x128xf32> to vector<4x32xf32>
    %54 = arith.negf %53 : vector<4x32xf32>
    %55 = math.exp %54 : vector<4x32xf32>
    %cst_29 = arith.constant 1.000000e+00 : f32
    %56 = vector.broadcast %cst_29 : f32 to vector<4x32xf32>
    %57 = arith.addf %56, %55 : vector<4x32xf32>
    %58 = arith.divf %56, %57 : vector<4x32xf32>
    %59 = vector.extract_strided_slice %46 {offsets = [0, 64], sizes = [4, 32], strides = [1, 1]} : vector<4x128xf32> to vector<4x32xf32>
    %60 = math.tanh %59 : vector<4x32xf32>
    %61 = vector.extract_strided_slice %46 {offsets = [0, 96], sizes = [4, 32], strides = [1, 1]} : vector<4x128xf32> to vector<4x32xf32>
    %62 = arith.negf %61 : vector<4x32xf32>
    %63 = math.exp %62 : vector<4x32xf32>
    %cst_30 = arith.constant 1.000000e+00 : f32
    %64 = vector.broadcast %cst_30 : f32 to vector<4x32xf32>
    %65 = arith.addf %64, %63 : vector<4x32xf32>
    %66 = arith.divf %64, %65 : vector<4x32xf32>
    %67 = arith.mulf %58, %43 : vector<4x32xf32>
    %68 = arith.mulf %52, %60 : vector<4x32xf32>
    %69 = arith.addf %67, %68 : vector<4x32xf32>
    %70 = math.tanh %69 : vector<4x32xf32>
    %71 = arith.mulf %66, %70 : vector<4x32xf32>
    %c0_31 = arith.constant 0 : index
    %c0_32 = arith.constant 0 : index
    %72 = vector.load %arg9[%c0_31, %c0_32] : memref<4x32xf32, #tpu.memory_space<vmem>>, vector<4x32xf32>
    tpu.vector_store %arg9[%c0_31, %c0_32], %71 {strides = array<i32>} : memref<4x32xf32, #tpu.memory_space<vmem>>, vector<4x32xf32>,
    %c0_33 = arith.constant 0 : index
    %c0_34 = arith.constant 0 : index
    %73 = vector.load %arg10[%c0_33, %c0_34] : memref<4x32xf32, #tpu.memory_space<vmem>>, vector<4x32xf32>
    tpu.vector_store %arg10[%c0_33, %c0_34], %69 {strides = array<i32>} : memref<4x32xf32, #tpu.memory_space<vmem>>, vector<4x32xf32>,
    %c7_35 = arith.constant 7 : index
    %c0_36 = arith.constant 0 : index
    %c0_37 = arith.constant 0 : index
    %74 = vector.load %arg6[%c7_35, %c0_36, %c0_37] : memref<8x4x32xf32, #tpu.memory_space<vmem>>, vector<1x4x32xf32>
    %75 = vector.shape_cast %74 : vector<1x4x32xf32> to vector<4x32xf32>
    %76 = vector.shape_cast %71 : vector<4x32xf32> to vector<1x4x32xf32>
    tpu.vector_store %arg6[%c7_35, %c0_36, %c0_37], %76 {strides = array<i32>} : memref<8x4x32xf32, #tpu.memory_space<vmem>>, vector<1x4x32xf32>,
    %c1 = arith.constant 1 : index
    %c0_38 = arith.constant 0 : index
    %c0_39 = arith.constant 0 : index
    %77 = vector.load %arg1[%c1, %c0_38, %c0_39] : memref<8x4x128xf32, #tpu.memory_space<vmem>>, vector<1x4x128xf32>
    %78 = vector.shape_cast %77 : vector<1x4x128xf32> to vector<4x128xf32>
    %c0_40 = arith.constant 0 : index
    %c0_41 = arith.constant 0 : index
    %79 = vector.load %arg7[%c0_40, %c0_41] : memref<4x32xf32, #tpu.memory_space<vmem>>, vector<4x32xf32>
    %c0_42 = arith.constant 0 : index
    %c0_43 = arith.constant 0 : index
    %80 = vector.load %arg8[%c0_42, %c0_43] : memref<4x32xf32, #tpu.memory_space<vmem>>, vector<4x32xf32>
    %c0_44 = arith.constant 0 : index
    %c0_45 = arith.constant 0 : index
    %81 = vector.load %arg3[%c0_44, %c0_45] : memref<32x128xf32, #tpu.memory_space<vmem>>, vector<32x128xf32>
    %cst_46 = arith.constant dense<0.000000e+00> : vector<4x128xf32>
    %82 = tpu.matmul %79, %81, %cst_46 {dimension_numbers = #tpu.dot_dimension_numbers<[1], [0], [0], [1], [0, 0, 1, 1], [], []>} : vector<4x32xf32>, vector<32x128xf32>, vector<4x128xf32> -> vector<4x128xf32>
    %83 = arith.addf %78, %82 : vector<4x128xf32>
    %84 = vector.extract_strided_slice %83 {offsets = [0, 0], sizes = [4, 32], strides = [1, 1]} : vector<4x128xf32> to vector<4x32xf32>
    %85 = arith.negf %84 : vector<4x32xf32>
    %86 = math.exp %85 : vector<4x32xf32>
    %cst_47 = arith.constant 1.000000e+00 : f32
    %87 = vector.broadcast %cst_47 : f32 to vector<4x32xf32>
    %88 = arith.addf %87, %86 : vector<4x32xf32>
    %89 = arith.divf %87, %88 : vector<4x32xf32>
    %90 = vector.extract_strided_slice %83 {offsets = [0, 32], sizes = [4, 32], strides = [1, 1]} : vector<4x128xf32> to vector<4x32xf32>
    %91 = arith.negf %90 : vector<4x32xf32>
    %92 = math.exp %91 : vector<4x32xf32>
    %cst_48 = arith.constant 1.000000e+00 : f32
    %93 = vector.broadcast %cst_48 : f32 to vector<4x32xf32>
    %94 = arith.addf %93, %92 : vector<4x32xf32>
    %95 = arith.divf %93, %94 : vector<4x32xf32>
    %96 = vector.extract_strided_slice %83 {offsets = [0, 64], sizes = [4, 32], strides = [1, 1]} : vector<4x128xf32> to vector<4x32xf32>
    %97 = math.tanh %96 : vector<4x32xf32>
    %98 = vector.extract_strided_slice %83 {offsets = [0, 96], sizes = [4, 32], strides = [1, 1]} : vector<4x128xf32> to vector<4x32xf32>
    %99 = arith.negf %98 : vector<4x32xf32>
    %100 = math.exp %99 : vector<4x32xf32>
    %cst_49 = arith.constant 1.000000e+00 : f32
    %101 = vector.broadcast %cst_49 : f32 to vector<4x32xf32>
    %102 = arith.addf %101, %100 : vector<4x32xf32>
    %103 = arith.divf %101, %102 : vector<4x32xf32>
    %104 = arith.mulf %95, %80 : vector<4x32xf32>
    %105 = arith.mulf %89, %97 : vector<4x32xf32>
    %106 = arith.addf %104, %105 : vector<4x32xf32>
    %107 = math.tanh %106 : vector<4x32xf32>
    %108 = arith.mulf %103, %107 : vector<4x32xf32>
    %c0_50 = arith.constant 0 : index
    %c0_51 = arith.constant 0 : index
    %109 = vector.load %arg7[%c0_50, %c0_51] : memref<4x32xf32, #tpu.memory_space<vmem>>, vector<4x32xf32>
    tpu.vector_store %arg7[%c0_50, %c0_51], %108 {strides = array<i32>} : memref<4x32xf32, #tpu.memory_space<vmem>>, vector<4x32xf32>,
    %c0_52 = arith.constant 0 : index
    %c0_53 = arith.constant 0 : index
    %110 = vector.load %arg8[%c0_52, %c0_53] : memref<4x32xf32, #tpu.memory_space<vmem>>, vector<4x32xf32>
    tpu.vector_store %arg8[%c0_52, %c0_53], %106 {strides = array<i32>} : memref<4x32xf32, #tpu.memory_space<vmem>>, vector<4x32xf32>,
    %c1_54 = arith.constant 1 : index
    %c0_55 = arith.constant 0 : index
    %c0_56 = arith.constant 0 : index
    %111 = vector.load %arg5[%c1_54, %c0_55, %c0_56] : memref<8x4x32xf32, #tpu.memory_space<vmem>>, vector<1x4x32xf32>
    %112 = vector.shape_cast %111 : vector<1x4x32xf32> to vector<4x32xf32>
    %113 = vector.shape_cast %108 : vector<4x32xf32> to vector<1x4x32xf32>
    tpu.vector_store %arg5[%c1_54, %c0_55, %c0_56], %113 {strides = array<i32>} : memref<8x4x32xf32, #tpu.memory_space<vmem>>, vector<1x4x32xf32>,
    %c6 = arith.constant 6 : index
    %c0_57 = arith.constant 0 : index
    %c0_58 = arith.constant 0 : index
    %114 = vector.load %arg2[%c6, %c0_57, %c0_58] : memref<8x4x128xf32, #tpu.memory_space<vmem>>, vector<1x4x128xf32>
    %115 = vector.shape_cast %114 : vector<1x4x128xf32> to vector<4x128xf32>
    %c0_59 = arith.constant 0 : index
    %c0_60 = arith.constant 0 : index
    %116 = vector.load %arg9[%c0_59, %c0_60] : memref<4x32xf32, #tpu.memory_space<vmem>>, vector<4x32xf32>
    %c0_61 = arith.constant 0 : index
    %c0_62 = arith.constant 0 : index
    %117 = vector.load %arg10[%c0_61, %c0_62] : memref<4x32xf32, #tpu.memory_space<vmem>>, vector<4x32xf32>
    %c0_63 = arith.constant 0 : index
    %c0_64 = arith.constant 0 : index
    %118 = vector.load %arg4[%c0_63, %c0_64] : memref<32x128xf32, #tpu.memory_space<vmem>>, vector<32x128xf32>
    %cst_65 = arith.constant dense<0.000000e+00> : vector<4x128xf32>
    %119 = tpu.matmul %116, %118, %cst_65 {dimension_numbers = #tpu.dot_dimension_numbers<[1], [0], [0], [1], [0, 0, 1, 1], [], []>} : vector<4x32xf32>, vector<32x128xf32>, vector<4x128xf32> -> vector<4x128xf32>
    %120 = arith.addf %115, %119 : vector<4x128xf32>
    %121 = vector.extract_strided_slice %120 {offsets = [0, 0], sizes = [4, 32], strides = [1, 1]} : vector<4x128xf32> to vector<4x32xf32>
    %122 = arith.negf %121 : vector<4x32xf32>
    %123 = math.exp %122 : vector<4x32xf32>
    %cst_66 = arith.constant 1.000000e+00 : f32
    %124 = vector.broadcast %cst_66 : f32 to vector<4x32xf32>
    %125 = arith.addf %124, %123 : vector<4x32xf32>
    %126 = arith.divf %124, %125 : vector<4x32xf32>
    %127 = vector.extract_strided_slice %120 {offsets = [0, 32], sizes = [4, 32], strides = [1, 1]} : vector<4x128xf32> to vector<4x32xf32>
    %128 = arith.negf %127 : vector<4x32xf32>
    %129 = math.exp %128 : vector<4x32xf32>
    %cst_67 = arith.constant 1.000000e+00 : f32
    %130 = vector.broadcast %cst_67 : f32 to vector<4x32xf32>
    %131 = arith.addf %130, %129 : vector<4x32xf32>
    %132 = arith.divf %130, %131 : vector<4x32xf32>
    %133 = vector.extract_strided_slice %120 {offsets = [0, 64], sizes = [4, 32], strides = [1, 1]} : vector<4x128xf32> to vector<4x32xf32>
    %134 = math.tanh %133 : vector<4x32xf32>
    %135 = vector.extract_strided_slice %120 {offsets = [0, 96], sizes = [4, 32], strides = [1, 1]} : vector<4x128xf32> to vector<4x32xf32>
    %136 = arith.negf %135 : vector<4x32xf32>
    %137 = math.exp %136 : vector<4x32xf32>
    %cst_68 = arith.constant 1.000000e+00 : f32
    %138 = vector.broadcast %cst_68 : f32 to vector<4x32xf32>
    %139 = arith.addf %138, %137 : vector<4x32xf32>
    %140 = arith.divf %138, %139 : vector<4x32xf32>
    %141 = arith.mulf %132, %117 : vector<4x32xf32>
    %142 = arith.mulf %126, %134 : vector<4x32xf32>
    %143 = arith.addf %141, %142 : vector<4x32xf32>
    %144 = math.tanh %143 : vector<4x32xf32>
    %145 = arith.mulf %140, %144 : vector<4x32xf32>
    %c0_69 = arith.constant 0 : index
    %c0_70 = arith.constant 0 : index
    %146 = vector.load %arg9[%c0_69, %c0_70] : memref<4x32xf32, #tpu.memory_space<vmem>>, vector<4x32xf32>
    tpu.vector_store %arg9[%c0_69, %c0_70], %145 {strides = array<i32>} : memref<4x32xf32, #tpu.memory_space<vmem>>, vector<4x32xf32>,
    %c0_71 = arith.constant 0 : index
    %c0_72 = arith.constant 0 : index
    %147 = vector.load %arg10[%c0_71, %c0_72] : memref<4x32xf32, #tpu.memory_space<vmem>>, vector<4x32xf32>
    tpu.vector_store %arg10[%c0_71, %c0_72], %143 {strides = array<i32>} : memref<4x32xf32, #tpu.memory_space<vmem>>, vector<4x32xf32>,
    %c6_73 = arith.constant 6 : index
    %c0_74 = arith.constant 0 : index
    %c0_75 = arith.constant 0 : index
    %148 = vector.load %arg6[%c6_73, %c0_74, %c0_75] : memref<8x4x32xf32, #tpu.memory_space<vmem>>, vector<1x4x32xf32>
    %149 = vector.shape_cast %148 : vector<1x4x32xf32> to vector<4x32xf32>
    %150 = vector.shape_cast %145 : vector<4x32xf32> to vector<1x4x32xf32>
    tpu.vector_store %arg6[%c6_73, %c0_74, %c0_75], %150 {strides = array<i32>} : memref<8x4x32xf32, #tpu.memory_space<vmem>>, vector<1x4x32xf32>,
    %c2 = arith.constant 2 : index
    %c0_76 = arith.constant 0 : index
    %c0_77 = arith.constant 0 : index
    %151 = vector.load %arg1[%c2, %c0_76, %c0_77] : memref<8x4x128xf32, #tpu.memory_space<vmem>>, vector<1x4x128xf32>
    %152 = vector.shape_cast %151 : vector<1x4x128xf32> to vector<4x128xf32>
    %c0_78 = arith.constant 0 : index
    %c0_79 = arith.constant 0 : index
    %153 = vector.load %arg7[%c0_78, %c0_79] : memref<4x32xf32, #tpu.memory_space<vmem>>, vector<4x32xf32>
    %c0_80 = arith.constant 0 : index
    %c0_81 = arith.constant 0 : index
    %154 = vector.load %arg8[%c0_80, %c0_81] : memref<4x32xf32, #tpu.memory_space<vmem>>, vector<4x32xf32>
    %c0_82 = arith.constant 0 : index
    %c0_83 = arith.constant 0 : index
    %155 = vector.load %arg3[%c0_82, %c0_83] : memref<32x128xf32, #tpu.memory_space<vmem>>, vector<32x128xf32>
    %cst_84 = arith.constant dense<0.000000e+00> : vector<4x128xf32>
    %156 = tpu.matmul %153, %155, %cst_84 {dimension_numbers = #tpu.dot_dimension_numbers<[1], [0], [0], [1], [0, 0, 1, 1], [], []>} : vector<4x32xf32>, vector<32x128xf32>, vector<4x128xf32> -> vector<4x128xf32>
    %157 = arith.addf %152, %156 : vector<4x128xf32>
    %158 = vector.extract_strided_slice %157 {offsets = [0, 0], sizes = [4, 32], strides = [1, 1]} : vector<4x128xf32> to vector<4x32xf32>
    %159 = arith.negf %158 : vector<4x32xf32>
    %160 = math.exp %159 : vector<4x32xf32>
    %cst_85 = arith.constant 1.000000e+00 : f32
    %161 = vector.broadcast %cst_85 : f32 to vector<4x32xf32>
    %162 = arith.addf %161, %160 : vector<4x32xf32>
    %163 = arith.divf %161, %162 : vector<4x32xf32>
    %164 = vector.extract_strided_slice %157 {offsets = [0, 32], sizes = [4, 32], strides = [1, 1]} : vector<4x128xf32> to vector<4x32xf32>
    %165 = arith.negf %164 : vector<4x32xf32>
    %166 = math.exp %165 : vector<4x32xf32>
    %cst_86 = arith.constant 1.000000e+00 : f32
    %167 = vector.broadcast %cst_86 : f32 to vector<4x32xf32>
    %168 = arith.addf %167, %166 : vector<4x32xf32>
    %169 = arith.divf %167, %168 : vector<4x32xf32>
    %170 = vector.extract_strided_slice %157 {offsets = [0, 64], sizes = [4, 32], strides = [1, 1]} : vector<4x128xf32> to vector<4x32xf32>
    %171 = math.tanh %170 : vector<4x32xf32>
    %172 = vector.extract_strided_slice %157 {offsets = [0, 96], sizes = [4, 32], strides = [1, 1]} : vector<4x128xf32> to vector<4x32xf32>
    %173 = arith.negf %172 : vector<4x32xf32>
    %174 = math.exp %173 : vector<4x32xf32>
    %cst_87 = arith.constant 1.000000e+00 : f32
    %175 = vector.broadcast %cst_87 : f32 to vector<4x32xf32>
    %176 = arith.addf %175, %174 : vector<4x32xf32>
    %177 = arith.divf %175, %176 : vector<4x32xf32>
    %178 = arith.mulf %169, %154 : vector<4x32xf32>
    %179 = arith.mulf %163, %171 : vector<4x32xf32>
    %180 = arith.addf %178, %179 : vector<4x32xf32>
    %181 = math.tanh %180 : vector<4x32xf32>
    %182 = arith.mulf %177, %181 : vector<4x32xf32>
    %c0_88 = arith.constant 0 : index
    %c0_89 = arith.constant 0 : index
    %183 = vector.load %arg7[%c0_88, %c0_89] : memref<4x32xf32, #tpu.memory_space<vmem>>, vector<4x32xf32>
    tpu.vector_store %arg7[%c0_88, %c0_89], %182 {strides = array<i32>} : memref<4x32xf32, #tpu.memory_space<vmem>>, vector<4x32xf32>,
    %c0_90 = arith.constant 0 : index
    %c0_91 = arith.constant 0 : index
    %184 = vector.load %arg8[%c0_90, %c0_91] : memref<4x32xf32, #tpu.memory_space<vmem>>, vector<4x32xf32>
    tpu.vector_store %arg8[%c0_90, %c0_91], %180 {strides = array<i32>} : memref<4x32xf32, #tpu.memory_space<vmem>>, vector<4x32xf32>,
    %c2_92 = arith.constant 2 : index
    %c0_93 = arith.constant 0 : index
    %c0_94 = arith.constant 0 : index
    %185 = vector.load %arg5[%c2_92, %c0_93, %c0_94] : memref<8x4x32xf32, #tpu.memory_space<vmem>>, vector<1x4x32xf32>
    %186 = vector.shape_cast %185 : vector<1x4x32xf32> to vector<4x32xf32>
    %187 = vector.shape_cast %182 : vector<4x32xf32> to vector<1x4x32xf32>
    tpu.vector_store %arg5[%c2_92, %c0_93, %c0_94], %187 {strides = array<i32>} : memref<8x4x32xf32, #tpu.memory_space<vmem>>, vector<1x4x32xf32>,
    %c5 = arith.constant 5 : index
    %c0_95 = arith.constant 0 : index
    %c0_96 = arith.constant 0 : index
    %188 = vector.load %arg2[%c5, %c0_95, %c0_96] : memref<8x4x128xf32, #tpu.memory_space<vmem>>, vector<1x4x128xf32>
    %189 = vector.shape_cast %188 : vector<1x4x128xf32> to vector<4x128xf32>
    %c0_97 = arith.constant 0 : index
    %c0_98 = arith.constant 0 : index
    %190 = vector.load %arg9[%c0_97, %c0_98] : memref<4x32xf32, #tpu.memory_space<vmem>>, vector<4x32xf32>
    %c0_99 = arith.constant 0 : index
    %c0_100 = arith.constant 0 : index
    %191 = vector.load %arg10[%c0_99, %c0_100] : memref<4x32xf32, #tpu.memory_space<vmem>>, vector<4x32xf32>
    %c0_101 = arith.constant 0 : index
    %c0_102 = arith.constant 0 : index
    %192 = vector.load %arg4[%c0_101, %c0_102] : memref<32x128xf32, #tpu.memory_space<vmem>>, vector<32x128xf32>
    %cst_103 = arith.constant dense<0.000000e+00> : vector<4x128xf32>
    %193 = tpu.matmul %190, %192, %cst_103 {dimension_numbers = #tpu.dot_dimension_numbers<[1], [0], [0], [1], [0, 0, 1, 1], [], []>} : vector<4x32xf32>, vector<32x128xf32>, vector<4x128xf32> -> vector<4x128xf32>
    %194 = arith.addf %189, %193 : vector<4x128xf32>
    %195 = vector.extract_strided_slice %194 {offsets = [0, 0], sizes = [4, 32], strides = [1, 1]} : vector<4x128xf32> to vector<4x32xf32>
    %196 = arith.negf %195 : vector<4x32xf32>
    %197 = math.exp %196 : vector<4x32xf32>
    %cst_104 = arith.constant 1.000000e+00 : f32
    %198 = vector.broadcast %cst_104 : f32 to vector<4x32xf32>
    %199 = arith.addf %198, %197 : vector<4x32xf32>
    %200 = arith.divf %198, %199 : vector<4x32xf32>
    %201 = vector.extract_strided_slice %194 {offsets = [0, 32], sizes = [4, 32], strides = [1, 1]} : vector<4x128xf32> to vector<4x32xf32>
    %202 = arith.negf %201 : vector<4x32xf32>
    %203 = math.exp %202 : vector<4x32xf32>
    %cst_105 = arith.constant 1.000000e+00 : f32
    %204 = vector.broadcast %cst_105 : f32 to vector<4x32xf32>
    %205 = arith.addf %204, %203 : vector<4x32xf32>
    %206 = arith.divf %204, %205 : vector<4x32xf32>
    %207 = vector.extract_strided_slice %194 {offsets = [0, 64], sizes = [4, 32], strides = [1, 1]} : vector<4x128xf32> to vector<4x32xf32>
    %208 = math.tanh %207 : vector<4x32xf32>
    %209 = vector.extract_strided_slice %194 {offsets = [0, 96], sizes = [4, 32], strides = [1, 1]} : vector<4x128xf32> to vector<4x32xf32>
    %210 = arith.negf %209 : vector<4x32xf32>
    %211 = math.exp %210 : vector<4x32xf32>
    %cst_106 = arith.constant 1.000000e+00 : f32
    %212 = vector.broadcast %cst_106 : f32 to vector<4x32xf32>
    %213 = arith.addf %212, %211 : vector<4x32xf32>
    %214 = arith.divf %212, %213 : vector<4x32xf32>
    %215 = arith.mulf %206, %191 : vector<4x32xf32>
    %216 = arith.mulf %200, %208 : vector<4x32xf32>
    %217 = arith.addf %215, %216 : vector<4x32xf32>
    %218 = math.tanh %217 : vector<4x32xf32>
    %219 = arith.mulf %214, %218 : vector<4x32xf32>
    %c0_107 = arith.constant 0 : index
    %c0_108 = arith.constant 0 : index
    %220 = vector.load %arg9[%c0_107, %c0_108] : memref<4x32xf32, #tpu.memory_space<vmem>>, vector<4x32xf32>
    tpu.vector_store %arg9[%c0_107, %c0_108], %219 {strides = array<i32>} : memref<4x32xf32, #tpu.memory_space<vmem>>, vector<4x32xf32>,
    %c0_109 = arith.constant 0 : index
    %c0_110 = arith.constant 0 : index
    %221 = vector.load %arg10[%c0_109, %c0_110] : memref<4x32xf32, #tpu.memory_space<vmem>>, vector<4x32xf32>
    tpu.vector_store %arg10[%c0_109, %c0_110], %217 {strides = array<i32>} : memref<4x32xf32, #tpu.memory_space<vmem>>, vector<4x32xf32>,
    %c5_111 = arith.constant 5 : index
    %c0_112 = arith.constant 0 : index
    %c0_113 = arith.constant 0 : index
    %222 = vector.load %arg6[%c5_111, %c0_112, %c0_113] : memref<8x4x32xf32, #tpu.memory_space<vmem>>, vector<1x4x32xf32>
    %223 = vector.shape_cast %222 : vector<1x4x32xf32> to vector<4x32xf32>
    %224 = vector.shape_cast %219 : vector<4x32xf32> to vector<1x4x32xf32>
    tpu.vector_store %arg6[%c5_111, %c0_112, %c0_113], %224 {strides = array<i32>} : memref<8x4x32xf32, #tpu.memory_space<vmem>>, vector<1x4x32xf32>,
    %c3 = arith.constant 3 : index
    %c0_114 = arith.constant 0 : index
    %c0_115 = arith.constant 0 : index
    %225 = vector.load %arg1[%c3, %c0_114, %c0_115] : memref<8x4x128xf32, #tpu.memory_space<vmem>>, vector<1x4x128xf32>
    %226 = vector.shape_cast %225 : vector<1x4x128xf32> to vector<4x128xf32>
    %c0_116 = arith.constant 0 : index
    %c0_117 = arith.constant 0 : index
    %227 = vector.load %arg7[%c0_116, %c0_117] : memref<4x32xf32, #tpu.memory_space<vmem>>, vector<4x32xf32>
    %c0_118 = arith.constant 0 : index
    %c0_119 = arith.constant 0 : index
    %228 = vector.load %arg8[%c0_118, %c0_119] : memref<4x32xf32, #tpu.memory_space<vmem>>, vector<4x32xf32>
    %c0_120 = arith.constant 0 : index
    %c0_121 = arith.constant 0 : index
    %229 = vector.load %arg3[%c0_120, %c0_121] : memref<32x128xf32, #tpu.memory_space<vmem>>, vector<32x128xf32>
    %cst_122 = arith.constant dense<0.000000e+00> : vector<4x128xf32>
    %230 = tpu.matmul %227, %229, %cst_122 {dimension_numbers = #tpu.dot_dimension_numbers<[1], [0], [0], [1], [0, 0, 1, 1], [], []>} : vector<4x32xf32>, vector<32x128xf32>, vector<4x128xf32> -> vector<4x128xf32>
    %231 = arith.addf %226, %230 : vector<4x128xf32>
    %232 = vector.extract_strided_slice %231 {offsets = [0, 0], sizes = [4, 32], strides = [1, 1]} : vector<4x128xf32> to vector<4x32xf32>
    %233 = arith.negf %232 : vector<4x32xf32>
    %234 = math.exp %233 : vector<4x32xf32>
    %cst_123 = arith.constant 1.000000e+00 : f32
    %235 = vector.broadcast %cst_123 : f32 to vector<4x32xf32>
    %236 = arith.addf %235, %234 : vector<4x32xf32>
    %237 = arith.divf %235, %236 : vector<4x32xf32>
    %238 = vector.extract_strided_slice %231 {offsets = [0, 32], sizes = [4, 32], strides = [1, 1]} : vector<4x128xf32> to vector<4x32xf32>
    %239 = arith.negf %238 : vector<4x32xf32>
    %240 = math.exp %239 : vector<4x32xf32>
    %cst_124 = arith.constant 1.000000e+00 : f32
    %241 = vector.broadcast %cst_124 : f32 to vector<4x32xf32>
    %242 = arith.addf %241, %240 : vector<4x32xf32>
    %243 = arith.divf %241, %242 : vector<4x32xf32>
    %244 = vector.extract_strided_slice %231 {offsets = [0, 64], sizes = [4, 32], strides = [1, 1]} : vector<4x128xf32> to vector<4x32xf32>
    %245 = math.tanh %244 : vector<4x32xf32>
    %246 = vector.extract_strided_slice %231 {offsets = [0, 96], sizes = [4, 32], strides = [1, 1]} : vector<4x128xf32> to vector<4x32xf32>
    %247 = arith.negf %246 : vector<4x32xf32>
    %248 = math.exp %247 : vector<4x32xf32>
    %cst_125 = arith.constant 1.000000e+00 : f32
    %249 = vector.broadcast %cst_125 : f32 to vector<4x32xf32>
    %250 = arith.addf %249, %248 : vector<4x32xf32>
    %251 = arith.divf %249, %250 : vector<4x32xf32>
    %252 = arith.mulf %243, %228 : vector<4x32xf32>
    %253 = arith.mulf %237, %245 : vector<4x32xf32>
    %254 = arith.addf %252, %253 : vector<4x32xf32>
    %255 = math.tanh %254 : vector<4x32xf32>
    %256 = arith.mulf %251, %255 : vector<4x32xf32>
    %c0_126 = arith.constant 0 : index
    %c0_127 = arith.constant 0 : index
    %257 = vector.load %arg7[%c0_126, %c0_127] : memref<4x32xf32, #tpu.memory_space<vmem>>, vector<4x32xf32>
    tpu.vector_store %arg7[%c0_126, %c0_127], %256 {strides = array<i32>} : memref<4x32xf32, #tpu.memory_space<vmem>>, vector<4x32xf32>,
    %c0_128 = arith.constant 0 : index
    %c0_129 = arith.constant 0 : index
    %258 = vector.load %arg8[%c0_128, %c0_129] : memref<4x32xf32, #tpu.memory_space<vmem>>, vector<4x32xf32>
    tpu.vector_store %arg8[%c0_128, %c0_129], %254 {strides = array<i32>} : memref<4x32xf32, #tpu.memory_space<vmem>>, vector<4x32xf32>,
    %c3_130 = arith.constant 3 : index
    %c0_131 = arith.constant 0 : index
    %c0_132 = arith.constant 0 : index
    %259 = vector.load %arg5[%c3_130, %c0_131, %c0_132] : memref<8x4x32xf32, #tpu.memory_space<vmem>>, vector<1x4x32xf32>
    %260 = vector.shape_cast %259 : vector<1x4x32xf32> to vector<4x32xf32>
    %261 = vector.shape_cast %256 : vector<4x32xf32> to vector<1x4x32xf32>
    tpu.vector_store %arg5[%c3_130, %c0_131, %c0_132], %261 {strides = array<i32>} : memref<8x4x32xf32, #tpu.memory_space<vmem>>, vector<1x4x32xf32>,
    %c4 = arith.constant 4 : index
    %c0_133 = arith.constant 0 : index
    %c0_134 = arith.constant 0 : index
    %262 = vector.load %arg2[%c4, %c0_133, %c0_134] : memref<8x4x128xf32, #tpu.memory_space<vmem>>, vector<1x4x128xf32>
    %263 = vector.shape_cast %262 : vector<1x4x128xf32> to vector<4x128xf32>
    %c0_135 = arith.constant 0 : index
    %c0_136 = arith.constant 0 : index
    %264 = vector.load %arg9[%c0_135, %c0_136] : memref<4x32xf32, #tpu.memory_space<vmem>>, vector<4x32xf32>
    %c0_137 = arith.constant 0 : index
    %c0_138 = arith.constant 0 : index
    %265 = vector.load %arg10[%c0_137, %c0_138] : memref<4x32xf32, #tpu.memory_space<vmem>>, vector<4x32xf32>
    %c0_139 = arith.constant 0 : index
    %c0_140 = arith.constant 0 : index
    %266 = vector.load %arg4[%c0_139, %c0_140] : memref<32x128xf32, #tpu.memory_space<vmem>>, vector<32x128xf32>
    %cst_141 = arith.constant dense<0.000000e+00> : vector<4x128xf32>
    %267 = tpu.matmul %264, %266, %cst_141 {dimension_numbers = #tpu.dot_dimension_numbers<[1], [0], [0], [1], [0, 0, 1, 1], [], []>} : vector<4x32xf32>, vector<32x128xf32>, vector<4x128xf32> -> vector<4x128xf32>
    %268 = arith.addf %263, %267 : vector<4x128xf32>
    %269 = vector.extract_strided_slice %268 {offsets = [0, 0], sizes = [4, 32], strides = [1, 1]} : vector<4x128xf32> to vector<4x32xf32>
    %270 = arith.negf %269 : vector<4x32xf32>
    %271 = math.exp %270 : vector<4x32xf32>
    %cst_142 = arith.constant 1.000000e+00 : f32
    %272 = vector.broadcast %cst_142 : f32 to vector<4x32xf32>
    %273 = arith.addf %272, %271 : vector<4x32xf32>
    %274 = arith.divf %272, %273 : vector<4x32xf32>
    %275 = vector.extract_strided_slice %268 {offsets = [0, 32], sizes = [4, 32], strides = [1, 1]} : vector<4x128xf32> to vector<4x32xf32>
    %276 = arith.negf %275 : vector<4x32xf32>
    %277 = math.exp %276 : vector<4x32xf32>
    %cst_143 = arith.constant 1.000000e+00 : f32
    %278 = vector.broadcast %cst_143 : f32 to vector<4x32xf32>
    %279 = arith.addf %278, %277 : vector<4x32xf32>
    %280 = arith.divf %278, %279 : vector<4x32xf32>
    %281 = vector.extract_strided_slice %268 {offsets = [0, 64], sizes = [4, 32], strides = [1, 1]} : vector<4x128xf32> to vector<4x32xf32>
    %282 = math.tanh %281 : vector<4x32xf32>
    %283 = vector.extract_strided_slice %268 {offsets = [0, 96], sizes = [4, 32], strides = [1, 1]} : vector<4x128xf32> to vector<4x32xf32>
    %284 = arith.negf %283 : vector<4x32xf32>
    %285 = math.exp %284 : vector<4x32xf32>
    %cst_144 = arith.constant 1.000000e+00 : f32
    %286 = vector.broadcast %cst_144 : f32 to vector<4x32xf32>
    %287 = arith.addf %286, %285 : vector<4x32xf32>
    %288 = arith.divf %286, %287 : vector<4x32xf32>
    %289 = arith.mulf %280, %265 : vector<4x32xf32>
    %290 = arith.mulf %274, %282 : vector<4x32xf32>
    %291 = arith.addf %289, %290 : vector<4x32xf32>
    %292 = math.tanh %291 : vector<4x32xf32>
    %293 = arith.mulf %288, %292 : vector<4x32xf32>
    %c0_145 = arith.constant 0 : index
    %c0_146 = arith.constant 0 : index
    %294 = vector.load %arg9[%c0_145, %c0_146] : memref<4x32xf32, #tpu.memory_space<vmem>>, vector<4x32xf32>
    tpu.vector_store %arg9[%c0_145, %c0_146], %293 {strides = array<i32>} : memref<4x32xf32, #tpu.memory_space<vmem>>, vector<4x32xf32>,
    %c0_147 = arith.constant 0 : index
    %c0_148 = arith.constant 0 : index
    %295 = vector.load %arg10[%c0_147, %c0_148] : memref<4x32xf32, #tpu.memory_space<vmem>>, vector<4x32xf32>
    tpu.vector_store %arg10[%c0_147, %c0_148], %291 {strides = array<i32>} : memref<4x32xf32, #tpu.memory_space<vmem>>, vector<4x32xf32>,
    %c4_149 = arith.constant 4 : index
    %c0_150 = arith.constant 0 : index
    %c0_151 = arith.constant 0 : index
    %296 = vector.load %arg6[%c4_149, %c0_150, %c0_151] : memref<8x4x32xf32, #tpu.memory_space<vmem>>, vector<1x4x32xf32>
    %297 = vector.shape_cast %296 : vector<1x4x32xf32> to vector<4x32xf32>
    %298 = vector.shape_cast %293 : vector<4x32xf32> to vector<1x4x32xf32>
    tpu.vector_store %arg6[%c4_149, %c0_150, %c0_151], %298 {strides = array<i32>} : memref<8x4x32xf32, #tpu.memory_space<vmem>>, vector<1x4x32xf32>,
    %c4_152 = arith.constant 4 : index
    %c0_153 = arith.constant 0 : index
    %c0_154 = arith.constant 0 : index
    %299 = vector.load %arg1[%c4_152, %c0_153, %c0_154] : memref<8x4x128xf32, #tpu.memory_space<vmem>>, vector<1x4x128xf32>
    %300 = vector.shape_cast %299 : vector<1x4x128xf32> to vector<4x128xf32>
    %c0_155 = arith.constant 0 : index
    %c0_156 = arith.constant 0 : index
    %301 = vector.load %arg7[%c0_155, %c0_156] : memref<4x32xf32, #tpu.memory_space<vmem>>, vector<4x32xf32>
    %c0_157 = arith.constant 0 : index
    %c0_158 = arith.constant 0 : index
    %302 = vector.load %arg8[%c0_157, %c0_158] : memref<4x32xf32, #tpu.memory_space<vmem>>, vector<4x32xf32>
    %c0_159 = arith.constant 0 : index
    %c0_160 = arith.constant 0 : index
    %303 = vector.load %arg3[%c0_159, %c0_160] : memref<32x128xf32, #tpu.memory_space<vmem>>, vector<32x128xf32>
    %cst_161 = arith.constant dense<0.000000e+00> : vector<4x128xf32>
    %304 = tpu.matmul %301, %303, %cst_161 {dimension_numbers = #tpu.dot_dimension_numbers<[1], [0], [0], [1], [0, 0, 1, 1], [], []>} : vector<4x32xf32>, vector<32x128xf32>, vector<4x128xf32> -> vector<4x128xf32>
    %305 = arith.addf %300, %304 : vector<4x128xf32>
    %306 = vector.extract_strided_slice %305 {offsets = [0, 0], sizes = [4, 32], strides = [1, 1]} : vector<4x128xf32> to vector<4x32xf32>
    %307 = arith.negf %306 : vector<4x32xf32>
    %308 = math.exp %307 : vector<4x32xf32>
    %cst_162 = arith.constant 1.000000e+00 : f32
    %309 = vector.broadcast %cst_162 : f32 to vector<4x32xf32>
    %310 = arith.addf %309, %308 : vector<4x32xf32>
    %311 = arith.divf %309, %310 : vector<4x32xf32>
    %312 = vector.extract_strided_slice %305 {offsets = [0, 32], sizes = [4, 32], strides = [1, 1]} : vector<4x128xf32> to vector<4x32xf32>
    %313 = arith.negf %312 : vector<4x32xf32>
    %314 = math.exp %313 : vector<4x32xf32>
    %cst_163 = arith.constant 1.000000e+00 : f32
    %315 = vector.broadcast %cst_163 : f32 to vector<4x32xf32>
    %316 = arith.addf %315, %314 : vector<4x32xf32>
    %317 = arith.divf %315, %316 : vector<4x32xf32>
    %318 = vector.extract_strided_slice %305 {offsets = [0, 64], sizes = [4, 32], strides = [1, 1]} : vector<4x128xf32> to vector<4x32xf32>
    %319 = math.tanh %318 : vector<4x32xf32>
    %320 = vector.extract_strided_slice %305 {offsets = [0, 96], sizes = [4, 32], strides = [1, 1]} : vector<4x128xf32> to vector<4x32xf32>
    %321 = arith.negf %320 : vector<4x32xf32>
    %322 = math.exp %321 : vector<4x32xf32>
    %cst_164 = arith.constant 1.000000e+00 : f32
    %323 = vector.broadcast %cst_164 : f32 to vector<4x32xf32>
    %324 = arith.addf %323, %322 : vector<4x32xf32>
    %325 = arith.divf %323, %324 : vector<4x32xf32>
    %326 = arith.mulf %317, %302 : vector<4x32xf32>
    %327 = arith.mulf %311, %319 : vector<4x32xf32>
    %328 = arith.addf %326, %327 : vector<4x32xf32>
    %329 = math.tanh %328 : vector<4x32xf32>
    %330 = arith.mulf %325, %329 : vector<4x32xf32>
    %c0_165 = arith.constant 0 : index
    %c0_166 = arith.constant 0 : index
    %331 = vector.load %arg7[%c0_165, %c0_166] : memref<4x32xf32, #tpu.memory_space<vmem>>, vector<4x32xf32>
    tpu.vector_store %arg7[%c0_165, %c0_166], %330 {strides = array<i32>} : memref<4x32xf32, #tpu.memory_space<vmem>>, vector<4x32xf32>,
    %c0_167 = arith.constant 0 : index
    %c0_168 = arith.constant 0 : index
    %332 = vector.load %arg8[%c0_167, %c0_168] : memref<4x32xf32, #tpu.memory_space<vmem>>, vector<4x32xf32>
    tpu.vector_store %arg8[%c0_167, %c0_168], %328 {strides = array<i32>} : memref<4x32xf32, #tpu.memory_space<vmem>>, vector<4x32xf32>,
    %c4_169 = arith.constant 4 : index
    %c0_170 = arith.constant 0 : index
    %c0_171 = arith.constant 0 : index
    %333 = vector.load %arg5[%c4_169, %c0_170, %c0_171] : memref<8x4x32xf32, #tpu.memory_space<vmem>>, vector<1x4x32xf32>
    %334 = vector.shape_cast %333 : vector<1x4x32xf32> to vector<4x32xf32>
    %335 = vector.shape_cast %330 : vector<4x32xf32> to vector<1x4x32xf32>
    tpu.vector_store %arg5[%c4_169, %c0_170, %c0_171], %335 {strides = array<i32>} : memref<8x4x32xf32, #tpu.memory_space<vmem>>, vector<1x4x32xf32>,
    %c3_172 = arith.constant 3 : index
    %c0_173 = arith.constant 0 : index
    %c0_174 = arith.constant 0 : index
    %336 = vector.load %arg2[%c3_172, %c0_173, %c0_174] : memref<8x4x128xf32, #tpu.memory_space<vmem>>, vector<1x4x128xf32>
    %337 = vector.shape_cast %336 : vector<1x4x128xf32> to vector<4x128xf32>
    %c0_175 = arith.constant 0 : index
    %c0_176 = arith.constant 0 : index
    %338 = vector.load %arg9[%c0_175, %c0_176] : memref<4x32xf32, #tpu.memory_space<vmem>>, vector<4x32xf32>
    %c0_177 = arith.constant 0 : index
    %c0_178 = arith.constant 0 : index
    %339 = vector.load %arg10[%c0_177, %c0_178] : memref<4x32xf32, #tpu.memory_space<vmem>>, vector<4x32xf32>
    %c0_179 = arith.constant 0 : index
    %c0_180 = arith.constant 0 : index
    %340 = vector.load %arg4[%c0_179, %c0_180] : memref<32x128xf32, #tpu.memory_space<vmem>>, vector<32x128xf32>
    %cst_181 = arith.constant dense<0.000000e+00> : vector<4x128xf32>
    %341 = tpu.matmul %338, %340, %cst_181 {dimension_numbers = #tpu.dot_dimension_numbers<[1], [0], [0], [1], [0, 0, 1, 1], [], []>} : vector<4x32xf32>, vector<32x128xf32>, vector<4x128xf32> -> vector<4x128xf32>
    %342 = arith.addf %337, %341 : vector<4x128xf32>
    %343 = vector.extract_strided_slice %342 {offsets = [0, 0], sizes = [4, 32], strides = [1, 1]} : vector<4x128xf32> to vector<4x32xf32>
    %344 = arith.negf %343 : vector<4x32xf32>
    %345 = math.exp %344 : vector<4x32xf32>
    %cst_182 = arith.constant 1.000000e+00 : f32
    %346 = vector.broadcast %cst_182 : f32 to vector<4x32xf32>
    %347 = arith.addf %346, %345 : vector<4x32xf32>
    %348 = arith.divf %346, %347 : vector<4x32xf32>
    %349 = vector.extract_strided_slice %342 {offsets = [0, 32], sizes = [4, 32], strides = [1, 1]} : vector<4x128xf32> to vector<4x32xf32>
    %350 = arith.negf %349 : vector<4x32xf32>
    %351 = math.exp %350 : vector<4x32xf32>
    %cst_183 = arith.constant 1.000000e+00 : f32
    %352 = vector.broadcast %cst_183 : f32 to vector<4x32xf32>
    %353 = arith.addf %352, %351 : vector<4x32xf32>
    %354 = arith.divf %352, %353 : vector<4x32xf32>
    %355 = vector.extract_strided_slice %342 {offsets = [0, 64], sizes = [4, 32], strides = [1, 1]} : vector<4x128xf32> to vector<4x32xf32>
    %356 = math.tanh %355 : vector<4x32xf32>
    %357 = vector.extract_strided_slice %342 {offsets = [0, 96], sizes = [4, 32], strides = [1, 1]} : vector<4x128xf32> to vector<4x32xf32>
    %358 = arith.negf %357 : vector<4x32xf32>
    %359 = math.exp %358 : vector<4x32xf32>
    %cst_184 = arith.constant 1.000000e+00 : f32
    %360 = vector.broadcast %cst_184 : f32 to vector<4x32xf32>
    %361 = arith.addf %360, %359 : vector<4x32xf32>
    %362 = arith.divf %360, %361 : vector<4x32xf32>
    %363 = arith.mulf %354, %339 : vector<4x32xf32>
    %364 = arith.mulf %348, %356 : vector<4x32xf32>
    %365 = arith.addf %363, %364 : vector<4x32xf32>
    %366 = math.tanh %365 : vector<4x32xf32>
    %367 = arith.mulf %362, %366 : vector<4x32xf32>
    %c0_185 = arith.constant 0 : index
    %c0_186 = arith.constant 0 : index
    %368 = vector.load %arg9[%c0_185, %c0_186] : memref<4x32xf32, #tpu.memory_space<vmem>>, vector<4x32xf32>
    tpu.vector_store %arg9[%c0_185, %c0_186], %367 {strides = array<i32>} : memref<4x32xf32, #tpu.memory_space<vmem>>, vector<4x32xf32>,
    %c0_187 = arith.constant 0 : index
    %c0_188 = arith.constant 0 : index
    %369 = vector.load %arg10[%c0_187, %c0_188] : memref<4x32xf32, #tpu.memory_space<vmem>>, vector<4x32xf32>
    tpu.vector_store %arg10[%c0_187, %c0_188], %365 {strides = array<i32>} : memref<4x32xf32, #tpu.memory_space<vmem>>, vector<4x32xf32>,
    %c3_189 = arith.constant 3 : index
    %c0_190 = arith.constant 0 : index
    %c0_191 = arith.constant 0 : index
    %370 = vector.load %arg6[%c3_189, %c0_190, %c0_191] : memref<8x4x32xf32, #tpu.memory_space<vmem>>, vector<1x4x32xf32>
    %371 = vector.shape_cast %370 : vector<1x4x32xf32> to vector<4x32xf32>
    %372 = vector.shape_cast %367 : vector<4x32xf32> to vector<1x4x32xf32>
    tpu.vector_store %arg6[%c3_189, %c0_190, %c0_191], %372 {strides = array<i32>} : memref<8x4x32xf32, #tpu.memory_space<vmem>>, vector<1x4x32xf32>,
    %c5_192 = arith.constant 5 : index
    %c0_193 = arith.constant 0 : index
    %c0_194 = arith.constant 0 : index
    %373 = vector.load %arg1[%c5_192, %c0_193, %c0_194] : memref<8x4x128xf32, #tpu.memory_space<vmem>>, vector<1x4x128xf32>
    %374 = vector.shape_cast %373 : vector<1x4x128xf32> to vector<4x128xf32>
    %c0_195 = arith.constant 0 : index
    %c0_196 = arith.constant 0 : index
    %375 = vector.load %arg7[%c0_195, %c0_196] : memref<4x32xf32, #tpu.memory_space<vmem>>, vector<4x32xf32>
    %c0_197 = arith.constant 0 : index
    %c0_198 = arith.constant 0 : index
    %376 = vector.load %arg8[%c0_197, %c0_198] : memref<4x32xf32, #tpu.memory_space<vmem>>, vector<4x32xf32>
    %c0_199 = arith.constant 0 : index
    %c0_200 = arith.constant 0 : index
    %377 = vector.load %arg3[%c0_199, %c0_200] : memref<32x128xf32, #tpu.memory_space<vmem>>, vector<32x128xf32>
    %cst_201 = arith.constant dense<0.000000e+00> : vector<4x128xf32>
    %378 = tpu.matmul %375, %377, %cst_201 {dimension_numbers = #tpu.dot_dimension_numbers<[1], [0], [0], [1], [0, 0, 1, 1], [], []>} : vector<4x32xf32>, vector<32x128xf32>, vector<4x128xf32> -> vector<4x128xf32>
    %379 = arith.addf %374, %378 : vector<4x128xf32>
    %380 = vector.extract_strided_slice %379 {offsets = [0, 0], sizes = [4, 32], strides = [1, 1]} : vector<4x128xf32> to vector<4x32xf32>
    %381 = arith.negf %380 : vector<4x32xf32>
    %382 = math.exp %381 : vector<4x32xf32>
    %cst_202 = arith.constant 1.000000e+00 : f32
    %383 = vector.broadcast %cst_202 : f32 to vector<4x32xf32>
    %384 = arith.addf %383, %382 : vector<4x32xf32>
    %385 = arith.divf %383, %384 : vector<4x32xf32>
    %386 = vector.extract_strided_slice %379 {offsets = [0, 32], sizes = [4, 32], strides = [1, 1]} : vector<4x128xf32> to vector<4x32xf32>
    %387 = arith.negf %386 : vector<4x32xf32>
    %388 = math.exp %387 : vector<4x32xf32>
    %cst_203 = arith.constant 1.000000e+00 : f32
    %389 = vector.broadcast %cst_203 : f32 to vector<4x32xf32>
    %390 = arith.addf %389, %388 : vector<4x32xf32>
    %391 = arith.divf %389, %390 : vector<4x32xf32>
    %392 = vector.extract_strided_slice %379 {offsets = [0, 64], sizes = [4, 32], strides = [1, 1]} : vector<4x128xf32> to vector<4x32xf32>
    %393 = math.tanh %392 : vector<4x32xf32>
    %394 = vector.extract_strided_slice %379 {offsets = [0, 96], sizes = [4, 32], strides = [1, 1]} : vector<4x128xf32> to vector<4x32xf32>
    %395 = arith.negf %394 : vector<4x32xf32>
    %396 = math.exp %395 : vector<4x32xf32>
    %cst_204 = arith.constant 1.000000e+00 : f32
    %397 = vector.broadcast %cst_204 : f32 to vector<4x32xf32>
    %398 = arith.addf %397, %396 : vector<4x32xf32>
    %399 = arith.divf %397, %398 : vector<4x32xf32>
    %400 = arith.mulf %391, %376 : vector<4x32xf32>
    %401 = arith.mulf %385, %393 : vector<4x32xf32>
    %402 = arith.addf %400, %401 : vector<4x32xf32>
    %403 = math.tanh %402 : vector<4x32xf32>
    %404 = arith.mulf %399, %403 : vector<4x32xf32>
    %c0_205 = arith.constant 0 : index
    %c0_206 = arith.constant 0 : index
    %405 = vector.load %arg7[%c0_205, %c0_206] : memref<4x32xf32, #tpu.memory_space<vmem>>, vector<4x32xf32>
    tpu.vector_store %arg7[%c0_205, %c0_206], %404 {strides = array<i32>} : memref<4x32xf32, #tpu.memory_space<vmem>>, vector<4x32xf32>,
    %c0_207 = arith.constant 0 : index
    %c0_208 = arith.constant 0 : index
    %406 = vector.load %arg8[%c0_207, %c0_208] : memref<4x32xf32, #tpu.memory_space<vmem>>, vector<4x32xf32>
    tpu.vector_store %arg8[%c0_207, %c0_208], %402 {strides = array<i32>} : memref<4x32xf32, #tpu.memory_space<vmem>>, vector<4x32xf32>,
    %c5_209 = arith.constant 5 : index
    %c0_210 = arith.constant 0 : index
    %c0_211 = arith.constant 0 : index
    %407 = vector.load %arg5[%c5_209, %c0_210, %c0_211] : memref<8x4x32xf32, #tpu.memory_space<vmem>>, vector<1x4x32xf32>
    %408 = vector.shape_cast %407 : vector<1x4x32xf32> to vector<4x32xf32>
    %409 = vector.shape_cast %404 : vector<4x32xf32> to vector<1x4x32xf32>
    tpu.vector_store %arg5[%c5_209, %c0_210, %c0_211], %409 {strides = array<i32>} : memref<8x4x32xf32, #tpu.memory_space<vmem>>, vector<1x4x32xf32>,
    %c2_212 = arith.constant 2 : index
    %c0_213 = arith.constant 0 : index
    %c0_214 = arith.constant 0 : index
    %410 = vector.load %arg2[%c2_212, %c0_213, %c0_214] : memref<8x4x128xf32, #tpu.memory_space<vmem>>, vector<1x4x128xf32>
    %411 = vector.shape_cast %410 : vector<1x4x128xf32> to vector<4x128xf32>
    %c0_215 = arith.constant 0 : index
    %c0_216 = arith.constant 0 : index
    %412 = vector.load %arg9[%c0_215, %c0_216] : memref<4x32xf32, #tpu.memory_space<vmem>>, vector<4x32xf32>
    %c0_217 = arith.constant 0 : index
    %c0_218 = arith.constant 0 : index
    %413 = vector.load %arg10[%c0_217, %c0_218] : memref<4x32xf32, #tpu.memory_space<vmem>>, vector<4x32xf32>
    %c0_219 = arith.constant 0 : index
    %c0_220 = arith.constant 0 : index
    %414 = vector.load %arg4[%c0_219, %c0_220] : memref<32x128xf32, #tpu.memory_space<vmem>>, vector<32x128xf32>
    %cst_221 = arith.constant dense<0.000000e+00> : vector<4x128xf32>
    %415 = tpu.matmul %412, %414, %cst_221 {dimension_numbers = #tpu.dot_dimension_numbers<[1], [0], [0], [1], [0, 0, 1, 1], [], []>} : vector<4x32xf32>, vector<32x128xf32>, vector<4x128xf32> -> vector<4x128xf32>
    %416 = arith.addf %411, %415 : vector<4x128xf32>
    %417 = vector.extract_strided_slice %416 {offsets = [0, 0], sizes = [4, 32], strides = [1, 1]} : vector<4x128xf32> to vector<4x32xf32>
    %418 = arith.negf %417 : vector<4x32xf32>
    %419 = math.exp %418 : vector<4x32xf32>
    %cst_222 = arith.constant 1.000000e+00 : f32
    %420 = vector.broadcast %cst_222 : f32 to vector<4x32xf32>
    %421 = arith.addf %420, %419 : vector<4x32xf32>
    %422 = arith.divf %420, %421 : vector<4x32xf32>
    %423 = vector.extract_strided_slice %416 {offsets = [0, 32], sizes = [4, 32], strides = [1, 1]} : vector<4x128xf32> to vector<4x32xf32>
    %424 = arith.negf %423 : vector<4x32xf32>
    %425 = math.exp %424 : vector<4x32xf32>
    %cst_223 = arith.constant 1.000000e+00 : f32
    %426 = vector.broadcast %cst_223 : f32 to vector<4x32xf32>
    %427 = arith.addf %426, %425 : vector<4x32xf32>
    %428 = arith.divf %426, %427 : vector<4x32xf32>
    %429 = vector.extract_strided_slice %416 {offsets = [0, 64], sizes = [4, 32], strides = [1, 1]} : vector<4x128xf32> to vector<4x32xf32>
    %430 = math.tanh %429 : vector<4x32xf32>
    %431 = vector.extract_strided_slice %416 {offsets = [0, 96], sizes = [4, 32], strides = [1, 1]} : vector<4x128xf32> to vector<4x32xf32>
    %432 = arith.negf %431 : vector<4x32xf32>
    %433 = math.exp %432 : vector<4x32xf32>
    %cst_224 = arith.constant 1.000000e+00 : f32
    %434 = vector.broadcast %cst_224 : f32 to vector<4x32xf32>
    %435 = arith.addf %434, %433 : vector<4x32xf32>
    %436 = arith.divf %434, %435 : vector<4x32xf32>
    %437 = arith.mulf %428, %413 : vector<4x32xf32>
    %438 = arith.mulf %422, %430 : vector<4x32xf32>
    %439 = arith.addf %437, %438 : vector<4x32xf32>
    %440 = math.tanh %439 : vector<4x32xf32>
    %441 = arith.mulf %436, %440 : vector<4x32xf32>
    %c0_225 = arith.constant 0 : index
    %c0_226 = arith.constant 0 : index
    %442 = vector.load %arg9[%c0_225, %c0_226] : memref<4x32xf32, #tpu.memory_space<vmem>>, vector<4x32xf32>
    tpu.vector_store %arg9[%c0_225, %c0_226], %441 {strides = array<i32>} : memref<4x32xf32, #tpu.memory_space<vmem>>, vector<4x32xf32>,
    %c0_227 = arith.constant 0 : index
    %c0_228 = arith.constant 0 : index
    %443 = vector.load %arg10[%c0_227, %c0_228] : memref<4x32xf32, #tpu.memory_space<vmem>>, vector<4x32xf32>
    tpu.vector_store %arg10[%c0_227, %c0_228], %439 {strides = array<i32>} : memref<4x32xf32, #tpu.memory_space<vmem>>, vector<4x32xf32>,
    %c2_229 = arith.constant 2 : index
    %c0_230 = arith.constant 0 : index
    %c0_231 = arith.constant 0 : index
    %444 = vector.load %arg6[%c2_229, %c0_230, %c0_231] : memref<8x4x32xf32, #tpu.memory_space<vmem>>, vector<1x4x32xf32>
    %445 = vector.shape_cast %444 : vector<1x4x32xf32> to vector<4x32xf32>
    %446 = vector.shape_cast %441 : vector<4x32xf32> to vector<1x4x32xf32>
    tpu.vector_store %arg6[%c2_229, %c0_230, %c0_231], %446 {strides = array<i32>} : memref<8x4x32xf32, #tpu.memory_space<vmem>>, vector<1x4x32xf32>,
    %c6_232 = arith.constant 6 : index
    %c0_233 = arith.constant 0 : index
    %c0_234 = arith.constant 0 : index
    %447 = vector.load %arg1[%c6_232, %c0_233, %c0_234] : memref<8x4x128xf32, #tpu.memory_space<vmem>>, vector<1x4x128xf32>
    %448 = vector.shape_cast %447 : vector<1x4x128xf32> to vector<4x128xf32>
    %c0_235 = arith.constant 0 : index
    %c0_236 = arith.constant 0 : index
    %449 = vector.load %arg7[%c0_235, %c0_236] : memref<4x32xf32, #tpu.memory_space<vmem>>, vector<4x32xf32>
    %c0_237 = arith.constant 0 : index
    %c0_238 = arith.constant 0 : index
    %450 = vector.load %arg8[%c0_237, %c0_238] : memref<4x32xf32, #tpu.memory_space<vmem>>, vector<4x32xf32>
    %c0_239 = arith.constant 0 : index
    %c0_240 = arith.constant 0 : index
    %451 = vector.load %arg3[%c0_239, %c0_240] : memref<32x128xf32, #tpu.memory_space<vmem>>, vector<32x128xf32>
    %cst_241 = arith.constant dense<0.000000e+00> : vector<4x128xf32>
    %452 = tpu.matmul %449, %451, %cst_241 {dimension_numbers = #tpu.dot_dimension_numbers<[1], [0], [0], [1], [0, 0, 1, 1], [], []>} : vector<4x32xf32>, vector<32x128xf32>, vector<4x128xf32> -> vector<4x128xf32>
    %453 = arith.addf %448, %452 : vector<4x128xf32>
    %454 = vector.extract_strided_slice %453 {offsets = [0, 0], sizes = [4, 32], strides = [1, 1]} : vector<4x128xf32> to vector<4x32xf32>
    %455 = arith.negf %454 : vector<4x32xf32>
    %456 = math.exp %455 : vector<4x32xf32>
    %cst_242 = arith.constant 1.000000e+00 : f32
    %457 = vector.broadcast %cst_242 : f32 to vector<4x32xf32>
    %458 = arith.addf %457, %456 : vector<4x32xf32>
    %459 = arith.divf %457, %458 : vector<4x32xf32>
    %460 = vector.extract_strided_slice %453 {offsets = [0, 32], sizes = [4, 32], strides = [1, 1]} : vector<4x128xf32> to vector<4x32xf32>
    %461 = arith.negf %460 : vector<4x32xf32>
    %462 = math.exp %461 : vector<4x32xf32>
    %cst_243 = arith.constant 1.000000e+00 : f32
    %463 = vector.broadcast %cst_243 : f32 to vector<4x32xf32>
    %464 = arith.addf %463, %462 : vector<4x32xf32>
    %465 = arith.divf %463, %464 : vector<4x32xf32>
    %466 = vector.extract_strided_slice %453 {offsets = [0, 64], sizes = [4, 32], strides = [1, 1]} : vector<4x128xf32> to vector<4x32xf32>
    %467 = math.tanh %466 : vector<4x32xf32>
    %468 = vector.extract_strided_slice %453 {offsets = [0, 96], sizes = [4, 32], strides = [1, 1]} : vector<4x128xf32> to vector<4x32xf32>
    %469 = arith.negf %468 : vector<4x32xf32>
    %470 = math.exp %469 : vector<4x32xf32>
    %cst_244 = arith.constant 1.000000e+00 : f32
    %471 = vector.broadcast %cst_244 : f32 to vector<4x32xf32>
    %472 = arith.addf %471, %470 : vector<4x32xf32>
    %473 = arith.divf %471, %472 : vector<4x32xf32>
    %474 = arith.mulf %465, %450 : vector<4x32xf32>
    %475 = arith.mulf %459, %467 : vector<4x32xf32>
    %476 = arith.addf %474, %475 : vector<4x32xf32>
    %477 = math.tanh %476 : vector<4x32xf32>
    %478 = arith.mulf %473, %477 : vector<4x32xf32>
    %c0_245 = arith.constant 0 : index
    %c0_246 = arith.constant 0 : index
    %479 = vector.load %arg7[%c0_245, %c0_246] : memref<4x32xf32, #tpu.memory_space<vmem>>, vector<4x32xf32>
    tpu.vector_store %arg7[%c0_245, %c0_246], %478 {strides = array<i32>} : memref<4x32xf32, #tpu.memory_space<vmem>>, vector<4x32xf32>,
    %c0_247 = arith.constant 0 : index
    %c0_248 = arith.constant 0 : index
    %480 = vector.load %arg8[%c0_247, %c0_248] : memref<4x32xf32, #tpu.memory_space<vmem>>, vector<4x32xf32>
    tpu.vector_store %arg8[%c0_247, %c0_248], %476 {strides = array<i32>} : memref<4x32xf32, #tpu.memory_space<vmem>>, vector<4x32xf32>,
    %c6_249 = arith.constant 6 : index
    %c0_250 = arith.constant 0 : index
    %c0_251 = arith.constant 0 : index
    %481 = vector.load %arg5[%c6_249, %c0_250, %c0_251] : memref<8x4x32xf32, #tpu.memory_space<vmem>>, vector<1x4x32xf32>
    %482 = vector.shape_cast %481 : vector<1x4x32xf32> to vector<4x32xf32>
    %483 = vector.shape_cast %478 : vector<4x32xf32> to vector<1x4x32xf32>
    tpu.vector_store %arg5[%c6_249, %c0_250, %c0_251], %483 {strides = array<i32>} : memref<8x4x32xf32, #tpu.memory_space<vmem>>, vector<1x4x32xf32>,
    %c1_252 = arith.constant 1 : index
    %c0_253 = arith.constant 0 : index
    %c0_254 = arith.constant 0 : index
    %484 = vector.load %arg2[%c1_252, %c0_253, %c0_254] : memref<8x4x128xf32, #tpu.memory_space<vmem>>, vector<1x4x128xf32>
    %485 = vector.shape_cast %484 : vector<1x4x128xf32> to vector<4x128xf32>
    %c0_255 = arith.constant 0 : index
    %c0_256 = arith.constant 0 : index
    %486 = vector.load %arg9[%c0_255, %c0_256] : memref<4x32xf32, #tpu.memory_space<vmem>>, vector<4x32xf32>
    %c0_257 = arith.constant 0 : index
    %c0_258 = arith.constant 0 : index
    %487 = vector.load %arg10[%c0_257, %c0_258] : memref<4x32xf32, #tpu.memory_space<vmem>>, vector<4x32xf32>
    %c0_259 = arith.constant 0 : index
    %c0_260 = arith.constant 0 : index
    %488 = vector.load %arg4[%c0_259, %c0_260] : memref<32x128xf32, #tpu.memory_space<vmem>>, vector<32x128xf32>
    %cst_261 = arith.constant dense<0.000000e+00> : vector<4x128xf32>
    %489 = tpu.matmul %486, %488, %cst_261 {dimension_numbers = #tpu.dot_dimension_numbers<[1], [0], [0], [1], [0, 0, 1, 1], [], []>} : vector<4x32xf32>, vector<32x128xf32>, vector<4x128xf32> -> vector<4x128xf32>
    %490 = arith.addf %485, %489 : vector<4x128xf32>
    %491 = vector.extract_strided_slice %490 {offsets = [0, 0], sizes = [4, 32], strides = [1, 1]} : vector<4x128xf32> to vector<4x32xf32>
    %492 = arith.negf %491 : vector<4x32xf32>
    %493 = math.exp %492 : vector<4x32xf32>
    %cst_262 = arith.constant 1.000000e+00 : f32
    %494 = vector.broadcast %cst_262 : f32 to vector<4x32xf32>
    %495 = arith.addf %494, %493 : vector<4x32xf32>
    %496 = arith.divf %494, %495 : vector<4x32xf32>
    %497 = vector.extract_strided_slice %490 {offsets = [0, 32], sizes = [4, 32], strides = [1, 1]} : vector<4x128xf32> to vector<4x32xf32>
    %498 = arith.negf %497 : vector<4x32xf32>
    %499 = math.exp %498 : vector<4x32xf32>
    %cst_263 = arith.constant 1.000000e+00 : f32
    %500 = vector.broadcast %cst_263 : f32 to vector<4x32xf32>
    %501 = arith.addf %500, %499 : vector<4x32xf32>
    %502 = arith.divf %500, %501 : vector<4x32xf32>
    %503 = vector.extract_strided_slice %490 {offsets = [0, 64], sizes = [4, 32], strides = [1, 1]} : vector<4x128xf32> to vector<4x32xf32>
    %504 = math.tanh %503 : vector<4x32xf32>
    %505 = vector.extract_strided_slice %490 {offsets = [0, 96], sizes = [4, 32], strides = [1, 1]} : vector<4x128xf32> to vector<4x32xf32>
    %506 = arith.negf %505 : vector<4x32xf32>
    %507 = math.exp %506 : vector<4x32xf32>
    %cst_264 = arith.constant 1.000000e+00 : f32
    %508 = vector.broadcast %cst_264 : f32 to vector<4x32xf32>
    %509 = arith.addf %508, %507 : vector<4x32xf32>
    %510 = arith.divf %508, %509 : vector<4x32xf32>
    %511 = arith.mulf %502, %487 : vector<4x32xf32>
    %512 = arith.mulf %496, %504 : vector<4x32xf32>
    %513 = arith.addf %511, %512 : vector<4x32xf32>
    %514 = math.tanh %513 : vector<4x32xf32>
    %515 = arith.mulf %510, %514 : vector<4x32xf32>
    %c0_265 = arith.constant 0 : index
    %c0_266 = arith.constant 0 : index
    %516 = vector.load %arg9[%c0_265, %c0_266] : memref<4x32xf32, #tpu.memory_space<vmem>>, vector<4x32xf32>
    tpu.vector_store %arg9[%c0_265, %c0_266], %515 {strides = array<i32>} : memref<4x32xf32, #tpu.memory_space<vmem>>, vector<4x32xf32>,
    %c0_267 = arith.constant 0 : index
    %c0_268 = arith.constant 0 : index
    %517 = vector.load %arg10[%c0_267, %c0_268] : memref<4x32xf32, #tpu.memory_space<vmem>>, vector<4x32xf32>
    tpu.vector_store %arg10[%c0_267, %c0_268], %513 {strides = array<i32>} : memref<4x32xf32, #tpu.memory_space<vmem>>, vector<4x32xf32>,
    %c1_269 = arith.constant 1 : index
    %c0_270 = arith.constant 0 : index
    %c0_271 = arith.constant 0 : index
    %518 = vector.load %arg6[%c1_269, %c0_270, %c0_271] : memref<8x4x32xf32, #tpu.memory_space<vmem>>, vector<1x4x32xf32>
    %519 = vector.shape_cast %518 : vector<1x4x32xf32> to vector<4x32xf32>
    %520 = vector.shape_cast %515 : vector<4x32xf32> to vector<1x4x32xf32>
    tpu.vector_store %arg6[%c1_269, %c0_270, %c0_271], %520 {strides = array<i32>} : memref<8x4x32xf32, #tpu.memory_space<vmem>>, vector<1x4x32xf32>,
    %c7_272 = arith.constant 7 : index
    %c0_273 = arith.constant 0 : index
    %c0_274 = arith.constant 0 : index
    %521 = vector.load %arg1[%c7_272, %c0_273, %c0_274] : memref<8x4x128xf32, #tpu.memory_space<vmem>>, vector<1x4x128xf32>
    %522 = vector.shape_cast %521 : vector<1x4x128xf32> to vector<4x128xf32>
    %c0_275 = arith.constant 0 : index
    %c0_276 = arith.constant 0 : index
    %523 = vector.load %arg7[%c0_275, %c0_276] : memref<4x32xf32, #tpu.memory_space<vmem>>, vector<4x32xf32>
    %c0_277 = arith.constant 0 : index
    %c0_278 = arith.constant 0 : index
    %524 = vector.load %arg8[%c0_277, %c0_278] : memref<4x32xf32, #tpu.memory_space<vmem>>, vector<4x32xf32>
    %c0_279 = arith.constant 0 : index
    %c0_280 = arith.constant 0 : index
    %525 = vector.load %arg3[%c0_279, %c0_280] : memref<32x128xf32, #tpu.memory_space<vmem>>, vector<32x128xf32>
    %cst_281 = arith.constant dense<0.000000e+00> : vector<4x128xf32>
    %526 = tpu.matmul %523, %525, %cst_281 {dimension_numbers = #tpu.dot_dimension_numbers<[1], [0], [0], [1], [0, 0, 1, 1], [], []>} : vector<4x32xf32>, vector<32x128xf32>, vector<4x128xf32> -> vector<4x128xf32>
    %527 = arith.addf %522, %526 : vector<4x128xf32>
    %528 = vector.extract_strided_slice %527 {offsets = [0, 0], sizes = [4, 32], strides = [1, 1]} : vector<4x128xf32> to vector<4x32xf32>
    %529 = arith.negf %528 : vector<4x32xf32>
    %530 = math.exp %529 : vector<4x32xf32>
    %cst_282 = arith.constant 1.000000e+00 : f32
    %531 = vector.broadcast %cst_282 : f32 to vector<4x32xf32>
    %532 = arith.addf %531, %530 : vector<4x32xf32>
    %533 = arith.divf %531, %532 : vector<4x32xf32>
    %534 = vector.extract_strided_slice %527 {offsets = [0, 32], sizes = [4, 32], strides = [1, 1]} : vector<4x128xf32> to vector<4x32xf32>
    %535 = arith.negf %534 : vector<4x32xf32>
    %536 = math.exp %535 : vector<4x32xf32>
    %cst_283 = arith.constant 1.000000e+00 : f32
    %537 = vector.broadcast %cst_283 : f32 to vector<4x32xf32>
    %538 = arith.addf %537, %536 : vector<4x32xf32>
    %539 = arith.divf %537, %538 : vector<4x32xf32>
    %540 = vector.extract_strided_slice %527 {offsets = [0, 64], sizes = [4, 32], strides = [1, 1]} : vector<4x128xf32> to vector<4x32xf32>
    %541 = math.tanh %540 : vector<4x32xf32>
    %542 = vector.extract_strided_slice %527 {offsets = [0, 96], sizes = [4, 32], strides = [1, 1]} : vector<4x128xf32> to vector<4x32xf32>
    %543 = arith.negf %542 : vector<4x32xf32>
    %544 = math.exp %543 : vector<4x32xf32>
    %cst_284 = arith.constant 1.000000e+00 : f32
    %545 = vector.broadcast %cst_284 : f32 to vector<4x32xf32>
    %546 = arith.addf %545, %544 : vector<4x32xf32>
    %547 = arith.divf %545, %546 : vector<4x32xf32>
    %548 = arith.mulf %539, %524 : vector<4x32xf32>
    %549 = arith.mulf %533, %541 : vector<4x32xf32>
    %550 = arith.addf %548, %549 : vector<4x32xf32>
    %551 = math.tanh %550 : vector<4x32xf32>
    %552 = arith.mulf %547, %551 : vector<4x32xf32>
    %c0_285 = arith.constant 0 : index
    %c0_286 = arith.constant 0 : index
    %553 = vector.load %arg7[%c0_285, %c0_286] : memref<4x32xf32, #tpu.memory_space<vmem>>, vector<4x32xf32>
    tpu.vector_store %arg7[%c0_285, %c0_286], %552 {strides = array<i32>} : memref<4x32xf32, #tpu.memory_space<vmem>>, vector<4x32xf32>,
    %c0_287 = arith.constant 0 : index
    %c0_288 = arith.constant 0 : index
    %554 = vector.load %arg8[%c0_287, %c0_288] : memref<4x32xf32, #tpu.memory_space<vmem>>, vector<4x32xf32>
    tpu.vector_store %arg8[%c0_287, %c0_288], %550 {strides = array<i32>} : memref<4x32xf32, #tpu.memory_space<vmem>>, vector<4x32xf32>,
    %c7_289 = arith.constant 7 : index
    %c0_290 = arith.constant 0 : index
    %c0_291 = arith.constant 0 : index
    %555 = vector.load %arg5[%c7_289, %c0_290, %c0_291] : memref<8x4x32xf32, #tpu.memory_space<vmem>>, vector<1x4x32xf32>
    %556 = vector.shape_cast %555 : vector<1x4x32xf32> to vector<4x32xf32>
    %557 = vector.shape_cast %552 : vector<4x32xf32> to vector<1x4x32xf32>
    tpu.vector_store %arg5[%c7_289, %c0_290, %c0_291], %557 {strides = array<i32>} : memref<8x4x32xf32, #tpu.memory_space<vmem>>, vector<1x4x32xf32>,
    %c0_292 = arith.constant 0 : index
    %c0_293 = arith.constant 0 : index
    %c0_294 = arith.constant 0 : index
    %558 = vector.load %arg2[%c0_292, %c0_293, %c0_294] : memref<8x4x128xf32, #tpu.memory_space<vmem>>, vector<1x4x128xf32>
    %559 = vector.shape_cast %558 : vector<1x4x128xf32> to vector<4x128xf32>
    %c0_295 = arith.constant 0 : index
    %c0_296 = arith.constant 0 : index
    %560 = vector.load %arg9[%c0_295, %c0_296] : memref<4x32xf32, #tpu.memory_space<vmem>>, vector<4x32xf32>
    %c0_297 = arith.constant 0 : index
    %c0_298 = arith.constant 0 : index
    %561 = vector.load %arg10[%c0_297, %c0_298] : memref<4x32xf32, #tpu.memory_space<vmem>>, vector<4x32xf32>
    %c0_299 = arith.constant 0 : index
    %c0_300 = arith.constant 0 : index
    %562 = vector.load %arg4[%c0_299, %c0_300] : memref<32x128xf32, #tpu.memory_space<vmem>>, vector<32x128xf32>
    %cst_301 = arith.constant dense<0.000000e+00> : vector<4x128xf32>
    %563 = tpu.matmul %560, %562, %cst_301 {dimension_numbers = #tpu.dot_dimension_numbers<[1], [0], [0], [1], [0, 0, 1, 1], [], []>} : vector<4x32xf32>, vector<32x128xf32>, vector<4x128xf32> -> vector<4x128xf32>
    %564 = arith.addf %559, %563 : vector<4x128xf32>
    %565 = vector.extract_strided_slice %564 {offsets = [0, 0], sizes = [4, 32], strides = [1, 1]} : vector<4x128xf32> to vector<4x32xf32>
    %566 = arith.negf %565 : vector<4x32xf32>
    %567 = math.exp %566 : vector<4x32xf32>
    %cst_302 = arith.constant 1.000000e+00 : f32
    %568 = vector.broadcast %cst_302 : f32 to vector<4x32xf32>
    %569 = arith.addf %568, %567 : vector<4x32xf32>
    %570 = arith.divf %568, %569 : vector<4x32xf32>
    %571 = vector.extract_strided_slice %564 {offsets = [0, 32], sizes = [4, 32], strides = [1, 1]} : vector<4x128xf32> to vector<4x32xf32>
    %572 = arith.negf %571 : vector<4x32xf32>
    %573 = math.exp %572 : vector<4x32xf32>
    %cst_303 = arith.constant 1.000000e+00 : f32
    %574 = vector.broadcast %cst_303 : f32 to vector<4x32xf32>
    %575 = arith.addf %574, %573 : vector<4x32xf32>
    %576 = arith.divf %574, %575 : vector<4x32xf32>
    %577 = vector.extract_strided_slice %564 {offsets = [0, 64], sizes = [4, 32], strides = [1, 1]} : vector<4x128xf32> to vector<4x32xf32>
    %578 = math.tanh %577 : vector<4x32xf32>
    %579 = vector.extract_strided_slice %564 {offsets = [0, 96], sizes = [4, 32], strides = [1, 1]} : vector<4x128xf32> to vector<4x32xf32>
    %580 = arith.negf %579 : vector<4x32xf32>
    %581 = math.exp %580 : vector<4x32xf32>
    %cst_304 = arith.constant 1.000000e+00 : f32
    %582 = vector.broadcast %cst_304 : f32 to vector<4x32xf32>
    %583 = arith.addf %582, %581 : vector<4x32xf32>
    %584 = arith.divf %582, %583 : vector<4x32xf32>
    %585 = arith.mulf %576, %561 : vector<4x32xf32>
    %586 = arith.mulf %570, %578 : vector<4x32xf32>
    %587 = arith.addf %585, %586 : vector<4x32xf32>
    %588 = math.tanh %587 : vector<4x32xf32>
    %589 = arith.mulf %584, %588 : vector<4x32xf32>
    %c0_305 = arith.constant 0 : index
    %c0_306 = arith.constant 0 : index
    %590 = vector.load %arg9[%c0_305, %c0_306] : memref<4x32xf32, #tpu.memory_space<vmem>>, vector<4x32xf32>
    tpu.vector_store %arg9[%c0_305, %c0_306], %589 {strides = array<i32>} : memref<4x32xf32, #tpu.memory_space<vmem>>, vector<4x32xf32>,
    %c0_307 = arith.constant 0 : index
    %c0_308 = arith.constant 0 : index
    %591 = vector.load %arg10[%c0_307, %c0_308] : memref<4x32xf32, #tpu.memory_space<vmem>>, vector<4x32xf32>
    tpu.vector_store %arg10[%c0_307, %c0_308], %587 {strides = array<i32>} : memref<4x32xf32, #tpu.memory_space<vmem>>, vector<4x32xf32>,
    %c0_309 = arith.constant 0 : index
    %c0_310 = arith.constant 0 : index
    %c0_311 = arith.constant 0 : index
    %592 = vector.load %arg6[%c0_309, %c0_310, %c0_311] : memref<8x4x32xf32, #tpu.memory_space<vmem>>, vector<1x4x32xf32>
    %593 = vector.shape_cast %592 : vector<1x4x32xf32> to vector<4x32xf32>
    %594 = vector.shape_cast %589 : vector<4x32xf32> to vector<1x4x32xf32>
    tpu.vector_store %arg6[%c0_309, %c0_310, %c0_311], %594 {strides = array<i32>} : memref<8x4x32xf32, #tpu.memory_space<vmem>>, vector<1x4x32xf32>,
    return
  }
  func.func @transform_0(%arg0: i32) -> (i32, i32, i32) {
    %c0_i32 = arith.constant 0 : i32
    %c0_i32_0 = arith.constant 0 : i32
    %c0_i32_1 = arith.constant 0 : i32
    return %arg0, %c0_i32, %c0_i32_0 : i32, i32, i32
  }
  func.func @transform_1(%arg0: i32) -> (i32, i32, i32) {
    %c0_i32 = arith.constant 0 : i32
    %0 = arith.subi %c0_i32, %arg0 : i32
    %c0_i32_0 = arith.constant 0 : i32
    %c0_i32_1 = arith.constant 0 : i32
    %c0_i32_2 = arith.constant 0 : i32
    return %0, %c0_i32_0, %c0_i32_1 : i32, i32, i32
  }
  func.func @transform_2(%arg0: i32) -> (i32, i32) {
    %c0_i32 = arith.constant 0 : i32
    %c0_i32_0 = arith.constant 0 : i32
    %c0_i32_1 = arith.constant 0 : i32
    return %c0_i32, %c0_i32_0 : i32, i32
  }
  func.func @transform_3(%arg0: i32) -> (i32, i32) {
    %c0_i32 = arith.constant 0 : i32
    %c0_i32_0 = arith.constant 0 : i32
    %c0_i32_1 = arith.constant 0 : i32
    return %c0_i32, %c0_i32_0 : i32, i32
  }
  func.func @transform_4(%arg0: i32) -> (i32, i32, i32) {
    %c0_i32 = arith.constant 0 : i32
    %c0_i32_0 = arith.constant 0 : i32
    %c0_i32_1 = arith.constant 0 : i32
    return %arg0, %c0_i32, %c0_i32_0 : i32, i32, i32
  }
  func.func @transform_5(%arg0: i32) -> (i32, i32, i32) {
    %c0_i32 = arith.constant 0 : i32
    %0 = arith.subi %c0_i32, %arg0 : i32
    %c0_i32_0 = arith.constant 0 : i32
    %c0_i32_1 = arith.constant 0 : i32
    %c0_i32_2 = arith.constant 0 : i32
    return %0, %c0_i32_0, %c0_i32_1 : i32, i32, i32
  }
}

module attributes {stable_mosaic.version = 11 : i64} {
  func.func @_head_kernel(%arg0: memref<4x32xf32, #tpu.memory_space<vmem>>, %arg1: memref<4x32xf32, #tpu.memory_space<vmem>>, %arg2: memref<1x32xf32, #tpu.memory_space<vmem>>, %arg3: memref<1x32xf32, #tpu.memory_space<vmem>>, %arg4: memref<1x32xf32, #tpu.memory_space<vmem>>, %arg5: memref<1x32xf32, #tpu.memory_space<vmem>>, %arg6: memref<1x32xf32, #tpu.memory_space<vmem>>, %arg7: memref<1x32xf32, #tpu.memory_space<vmem>>, %arg8: memref<1x32xf32, #tpu.memory_space<vmem>>, %arg9: memref<1x32xf32, #tpu.memory_space<vmem>>, %arg10: memref<32x5xf32, #tpu.memory_space<vmem>>, %arg11: memref<32x5xf32, #tpu.memory_space<vmem>>, %arg12: memref<1x5xf32, #tpu.memory_space<vmem>>, %arg13: memref<4x5xf32, #tpu.memory_space<vmem>>) attributes {dimension_semantics = [], scalar_prefetch = 0 : i64, scratch_operands = 0 : i64, tpu.core_type = #tpu.core_type<tc>} {
    %c0 = arith.constant 0 : index
    %c0_0 = arith.constant 0 : index
    %0 = vector.load %arg0[%c0, %c0_0] : memref<4x32xf32, #tpu.memory_space<vmem>>, vector<4x32xf32>
    %c0_1 = arith.constant 0 : index
    %c0_2 = arith.constant 0 : index
    %1 = vector.load %arg4[%c0_1, %c0_2] : memref<1x32xf32, #tpu.memory_space<vmem>>, vector<1x32xf32>
    %2 = vector.broadcast %1 : vector<1x32xf32> to vector<4x32xf32>
    %3 = arith.subf %0, %2 : vector<4x32xf32>
    %c0_3 = arith.constant 0 : index
    %c0_4 = arith.constant 0 : index
    %4 = vector.load %arg5[%c0_3, %c0_4] : memref<1x32xf32, #tpu.memory_space<vmem>>, vector<1x32xf32>
    %cst = arith.constant 9.99999974E-6 : f32
    %5 = vector.broadcast %cst : f32 to vector<1x32xf32>
    %6 = arith.addf %4, %5 : vector<1x32xf32>
    %7 = math.rsqrt %6 : vector<1x32xf32>
    %8 = vector.broadcast %7 : vector<1x32xf32> to vector<4x32xf32>
    %9 = arith.mulf %3, %8 : vector<4x32xf32>
    %c0_5 = arith.constant 0 : index
    %c0_6 = arith.constant 0 : index
    %10 = vector.load %arg2[%c0_5, %c0_6] : memref<1x32xf32, #tpu.memory_space<vmem>>, vector<1x32xf32>
    %11 = vector.broadcast %10 : vector<1x32xf32> to vector<4x32xf32>
    %12 = arith.mulf %9, %11 : vector<4x32xf32>
    %c0_7 = arith.constant 0 : index
    %c0_8 = arith.constant 0 : index
    %13 = vector.load %arg3[%c0_7, %c0_8] : memref<1x32xf32, #tpu.memory_space<vmem>>, vector<1x32xf32>
    %14 = vector.broadcast %13 : vector<1x32xf32> to vector<4x32xf32>
    %15 = arith.addf %12, %14 : vector<4x32xf32>
    %c0_9 = arith.constant 0 : index
    %c0_10 = arith.constant 0 : index
    %16 = vector.load %arg1[%c0_9, %c0_10] : memref<4x32xf32, #tpu.memory_space<vmem>>, vector<4x32xf32>
    %c0_11 = arith.constant 0 : index
    %c0_12 = arith.constant 0 : index
    %17 = vector.load %arg8[%c0_11, %c0_12] : memref<1x32xf32, #tpu.memory_space<vmem>>, vector<1x32xf32>
    %18 = vector.broadcast %17 : vector<1x32xf32> to vector<4x32xf32>
    %19 = arith.subf %16, %18 : vector<4x32xf32>
    %c0_13 = arith.constant 0 : index
    %c0_14 = arith.constant 0 : index
    %20 = vector.load %arg9[%c0_13, %c0_14] : memref<1x32xf32, #tpu.memory_space<vmem>>, vector<1x32xf32>
    %cst_15 = arith.constant 9.99999974E-6 : f32
    %21 = vector.broadcast %cst_15 : f32 to vector<1x32xf32>
    %22 = arith.addf %20, %21 : vector<1x32xf32>
    %23 = math.rsqrt %22 : vector<1x32xf32>
    %24 = vector.broadcast %23 : vector<1x32xf32> to vector<4x32xf32>
    %25 = arith.mulf %19, %24 : vector<4x32xf32>
    %c0_16 = arith.constant 0 : index
    %c0_17 = arith.constant 0 : index
    %26 = vector.load %arg6[%c0_16, %c0_17] : memref<1x32xf32, #tpu.memory_space<vmem>>, vector<1x32xf32>
    %27 = vector.broadcast %26 : vector<1x32xf32> to vector<4x32xf32>
    %28 = arith.mulf %25, %27 : vector<4x32xf32>
    %c0_18 = arith.constant 0 : index
    %c0_19 = arith.constant 0 : index
    %29 = vector.load %arg7[%c0_18, %c0_19] : memref<1x32xf32, #tpu.memory_space<vmem>>, vector<1x32xf32>
    %30 = vector.broadcast %29 : vector<1x32xf32> to vector<4x32xf32>
    %31 = arith.addf %28, %30 : vector<4x32xf32>
    %c0_20 = arith.constant 0 : index
    %c0_21 = arith.constant 0 : index
    %32 = vector.load %arg10[%c0_20, %c0_21] : memref<32x5xf32, #tpu.memory_space<vmem>>, vector<32x5xf32>
    %cst_22 = arith.constant dense<0.000000e+00> : vector<4x5xf32>
    %33 = tpu.matmul %15, %32, %cst_22 {dimension_numbers = #tpu.dot_dimension_numbers<[1], [0], [0], [1], [0, 0, 1, 1], [], []>} : vector<4x32xf32>, vector<32x5xf32>, vector<4x5xf32> -> vector<4x5xf32>
    %c0_23 = arith.constant 0 : index
    %c0_24 = arith.constant 0 : index
    %34 = vector.load %arg11[%c0_23, %c0_24] : memref<32x5xf32, #tpu.memory_space<vmem>>, vector<32x5xf32>
    %cst_25 = arith.constant dense<0.000000e+00> : vector<4x5xf32>
    %35 = tpu.matmul %31, %34, %cst_25 {dimension_numbers = #tpu.dot_dimension_numbers<[1], [0], [0], [1], [0, 0, 1, 1], [], []>} : vector<4x32xf32>, vector<32x5xf32>, vector<4x5xf32> -> vector<4x5xf32>
    %36 = arith.addf %33, %35 : vector<4x5xf32>
    %c0_26 = arith.constant 0 : index
    %c0_27 = arith.constant 0 : index
    %37 = vector.load %arg12[%c0_26, %c0_27] : memref<1x5xf32, #tpu.memory_space<vmem>>, vector<1x5xf32>
    %38 = vector.broadcast %37 : vector<1x5xf32> to vector<4x5xf32>
    %39 = arith.addf %36, %38 : vector<4x5xf32>
    %c0_28 = arith.constant 0 : index
    %c0_29 = arith.constant 0 : index
    %40 = vector.load %arg13[%c0_28, %c0_29] : memref<4x5xf32, #tpu.memory_space<vmem>>, vector<4x5xf32>
    tpu.vector_store %arg13[%c0_28, %c0_29], %39 {strides = array<i32>} : memref<4x5xf32, #tpu.memory_space<vmem>>, vector<4x5xf32>,
    return
  }
}

</mosaic_0001>

<bundles_post_ra>
// kernel: textrnn_forward.5
= control target key start
LH: loop header
LB: loop body
LE: loop exit
PB: predicated region body
PF: predicated region fallthrough
CT: control target
= control target key end

     0   :  { %vm30_vm0 = vcmask 130048   ;;  %s244_s1 = inlined_call_operand.vmem [shape: f32[16,128], index: 1, kind: input, shape index: {}]   ;;  %s245_s2 = inlined_call_operand.vmem [shape: f32[16,128], index: 2, kind: input, shape index: {}]   ;;  %s246_s0 = inlined_call_operand.vmem [shape: f32[32,16], index: 0, kind: input, shape index: {}]   ;;  %s247_s3 = inlined_call_operand.vmem [shape: f32[1,128], index: 3, kind: input, shape index: {}]   ;;  %s248_s4 = inlined_call_operand.vmem [shape: f32[1,128], index: 4, kind: input, shape index: {}]   ;;  %s249_s5 = inlined_call_operand.vmem [shape: f32[32,128], index: 5, kind: output, shape index: {0}]   ;;  %s250_s6 = inlined_call_operand.vmem [shape: f32[32,128], index: 6, kind: output, shape index: {1}]  }
   0x1   :  { %v29_v0 = vld [vmem:[%s244_s1 + $0x8] sm:$0xff]  ;;  %v28_v2 = vld [vmem:[%s244_s1] sm:$0xff]  ;;  %v26_v4 = vld [vmem:[%s246_s0 + $0x10] sm:$0xff] }
   0x2   :  { %v80_v1 = vld [vmem:[%s245_s2 + $0x8] sm:$0xff]  ;;  %141 = vmatpush.msra.mxu2 %v29_v0  ;;  %v79_v3 = vld [vmem:[%s245_s2] sm:$0xff]  ;;  %57 = vmatpush.msra.mxu0 %v29_v0  ;;  %v27_v6 = vld [vmem:[%s246_s0 + $0x18] sm:$0xff] }
   0x3   :  { %143 = vmatpush.msra.mxu3 %v80_v1  ;;  %95 = vmatpush.msra.mxu1 %v80_v1  ;;  %v24_v5 = vld [vmem:[%s246_s0] sm:$0xff]  ;;  %v25_v7 = vld [vmem:[%s246_s0 + $0x8] sm:$0xff] }
   0x4   :  { %142 = vmatpush.msra.mxu2 %v28_v2  ;;  %58 = vmatpush.msra.mxu0 %v28_v2  ;;  %v145_v8 = vld [vmem:[%s247_s3] ss:$0 sm:$0xff] }
   0x5   :  { %144 = vmatpush.msra.mxu3 %v79_v3  ;;  %135 = vmatmul.msk.f32.vlgmr.msra.gmra.mxu2 %vm30_vm0, %v26_v4  ;;  %v146_v9 = vld [vmem:[%s248_s4] ss:$0 sm:$0xff] }
   0x6   :  { %139 = vmatmul.msk.f32.vlgmr.msra.gmra.mxu3 %vm30_vm0, %v26_v4  ;;  %96 = vmatpush.msra.mxu1 %v79_v3 }
   0x7   :  { %133 = vmatmul.msk.f32.vlgmr.msra.gmra.mxu0 %vm30_vm0, %v24_v5  ;;  %137 = vmatmul.msk.f32.vlgmr.msra.gmra.mxu1 %vm30_vm0, %v24_v5 }
   0xd   :  { %136 = vmatmul.msk.f32.gmra.mxu2 %vm30_vm0, %v27_v6 }
   0xe   :  { %140 = vmatmul.msk.f32.gmra.mxu3 %vm30_vm0, %v27_v6 }
   0xf   :  { %134 = vmatmul.msk.f32.gmra.mxu0 %vm30_vm0, %v25_v7  ;;  %138 = vmatmul.msk.f32.gmra.mxu1 %vm30_vm0, %v25_v7 }
  0x84   :  { %v60_v10 = vpop.f32.mrf.mxu0  ;;  %v98_v11 = vpop.f32.mrf.mxu1 }
  0x85   :  { %v75_v12 = vadd.f32 %v145_v8, %v60_v10  ;;  %v113_v13 = vadd.f32 %v146_v9, %v98_v11 }
  0x87   :  { %117 = vst [vmem:[%s249_s5] sm:$0xff] %v75_v12 }
  0x88   :  { %v66_v14 = vpop.f32.mrf.mxu2  ;;  %121 = vst [vmem:[%s250_s6] sm:$0xff] %v113_v13 }
  0x89   :  { %v104_v15 = vpop.f32.mrf.mxu3  ;;  %v77_v16 = vadd.f32 %v145_v8, %v66_v14 }
  0x8a   :  { %v115_v17 = vadd.f32 %v146_v9, %v104_v15 }
  0x8b   :  { %119 = vst [vmem:[%s249_s5 + $0x10] sm:$0xff] %v77_v16 }
  0x8c   :  { %123 = vst [vmem:[%s250_s6 + $0x10] sm:$0xff] %v115_v17  ;;  %v63_v18 = vpop.f32.mrf.mxu0  ;;  %v101_v19 = vpop.f32.mrf.mxu1 }
  0x8d   :  { %v76_v20 = vadd.f32 %v145_v8, %v63_v18  ;;  %v114_v21 = vadd.f32 %v146_v9, %v101_v19 }
  0x8f   :  { %118 = vst [vmem:[%s249_s5 + $0x8] sm:$0xff] %v76_v20 }
  0x90   :  { %v69_v22 = vpop.f32.mrf.mxu2  ;;  %122 = vst [vmem:[%s250_s6 + $0x8] sm:$0xff] %v114_v21 }
  0x91   :  { %v107_v23 = vpop.f32.mrf.mxu3  ;;  %v78_v24 = vadd.f32 %v145_v8, %v69_v22 }
  0x92   :  { %v116_v25 = vadd.f32 %v146_v9, %v107_v23 }
  0x93   :  { %120 = vst [vmem:[%s249_s5 + $0x18] sm:$0xff] %v78_v24 }
  0x94   :  { %124 = vst [vmem:[%s250_s6 + $0x18] sm:$0xff] %v116_v25 }

// kernel: textrnn_forward.7
= control target key start
LH: loop header
LB: loop body
LE: loop exit
PB: predicated region body
PF: predicated region fallthrough
CT: control target
= control target key end

     0   :  { %vm41_vm0 = vcmask 261120   ;;  %s422_s3 = inlined_call_operand.vmem [shape: f32[32,128], index: 3, kind: input, shape index: {}]   ;;  %s423_s5 = inlined_call_operand.vmem [shape: f32[32,128], index: 5, kind: input, shape index: {}]   ;;  %s424_s2 = inlined_call_operand.vmem [shape: f32[32,128], index: 2, kind: input, shape index: {}]   ;;  %s425_s4 = inlined_call_operand.vmem [shape: f32[32,128], index: 4, kind: input, shape index: {}]   ;;  %s426_s1 = inlined_call_operand.vmem [shape: f32[32,32], index: 1, kind: input, shape index: {}]   ;;  %s427_s0 = inlined_call_operand.vmem [shape: f32[32,32], index: 0, kind: input, shape index: {}]   ;;  %s428_s6 = inlined_call_operand.vmem [shape: f32[1,128], index: 6, kind: input, shape index: {}]   ;;  %s429_s7 = inlined_call_operand.vmem [shape: f32[1,128], index: 7, kind: input, shape index: {}]   ;;  %s430_s8 = inlined_call_operand.vmem [shape: f32[32,128], index: 8, kind: output, shape index: {0}]   ;;  %s431_s9 = inlined_call_operand.vmem [shape: f32[32,128], index: 9, kind: output, shape index: {1}]  }
   0x1   :  { %v137_v0 = vld [vmem:[%s422_s3 + $0x18] sm:$0xff]  ;;  %v136_v2 = vld [vmem:[%s422_s3 + $0x10] sm:$0xff]  ;;  %v135_v6 = vld [vmem:[%s422_s3 + $0x8] sm:$0xff] }
   0x2   :  { %v186_v1 = vld [vmem:[%s423_s5 + $0x18] sm:$0xff]  ;;  %162 = vmatpush.msra.mxu2 %v137_v0  ;;  %v185_v3 = vld [vmem:[%s423_s5 + $0x10] sm:$0xff]  ;;  %v184_v7 = vld [vmem:[%s423_s5 + $0x8] sm:$0xff] }
   0x3   :  { %199 = vmatpush.msra.mxu3 %v186_v1  ;;  %v40_v4 = vld [vmem:[%s424_s2 + $0x18] sm:$0xff]  ;;  %v39_v8 = vld [vmem:[%s424_s2 + $0x10] sm:$0xff]  ;;  %v134_v10 = vld [vmem:[%s422_s3] sm:$0xff] }
   0x4   :  { %v93_v5 = vld [vmem:[%s425_s4 + $0x18] sm:$0xff]  ;;  %66 = vmatpush.msra.mxu0 %v40_v4  ;;  %163 = vmatpush.msra.mxu2 %v136_v2  ;;  %v92_v9 = vld [vmem:[%s425_s4 + $0x10] sm:$0xff]  ;;  %v183_v11 = vld [vmem:[%s423_s5] sm:$0xff] }
   0x5   :  { %106 = vmatpush.msra.mxu1 %v93_v5  ;;  %200 = vmatpush.msra.mxu3 %v185_v3  ;;  %v38_v12 = vld [vmem:[%s424_s2 + $0x8] sm:$0xff]  ;;  %v130_v14 = vld [vmem:[%s426_s1] sm:$0xff]  ;;  %v132_v20 = vld [vmem:[%s426_s1 + $0x10] sm:$0xff] }
   0x6   :  { %67 = vmatpush.msra.mxu0 %v39_v8  ;;  %v91_v13 = vld [vmem:[%s425_s4 + $0x8] sm:$0xff]  ;;  %164 = vmatpush.msra.mxu2 %v135_v6  ;;  %v37_v15 = vld [vmem:[%s424_s2] sm:$0xff]  ;;  %v35_v21 = vld [vmem:[%s427_s0 + $0x10] sm:$0xff] }
   0x7   :  { %107 = vmatpush.msra.mxu1 %v92_v9  ;;  %201 = vmatpush.msra.mxu3 %v184_v7  ;;  %v90_v16 = vld [vmem:[%s425_s4] sm:$0xff]  ;;  %v131_v18 = vld [vmem:[%s426_s1 + $0x8] sm:$0xff]  ;;  %v133_v22 = vld [vmem:[%s426_s1 + $0x18] sm:$0xff] }
   0x8   :  { %68 = vmatpush.msra.mxu0 %v38_v12  ;;  %165 = vmatpush.msra.mxu2 %v134_v10  ;;  %v33_v17 = vld [vmem:[%s427_s0] sm:$0xff]  ;;  %v34_v19 = vld [vmem:[%s427_s0 + $0x8] sm:$0xff]  ;;  %v36_v23 = vld [vmem:[%s427_s0 + $0x18] sm:$0xff] }
   0x9   :  { %108 = vmatpush.msra.mxu1 %v91_v13  ;;  %202 = vmatpush.msra.mxu3 %v183_v11  ;;  %v252_v24 = vld [vmem:[%s428_s6] ss:$0 sm:$0xff] }
   0xa   :  { %244 = vmatmul.msk.f32.vlgmr.msra.gmra.mxu2 %vm41_vm0, %v130_v14  ;;  %248 = vmatmul.msk.f32.vlgmr.msra.gmra.mxu3 %vm41_vm0, %v130_v14  ;;  %v253_v25 = vld [vmem:[%s429_s7] ss:$0 sm:$0xff] }
   0xb   :  { %69 = vmatpush.msra.mxu0 %v37_v15  ;;  %109 = vmatpush.msra.mxu1 %v90_v16 }
   0xc   :  { %236 = vmatmul.msk.f32.vlgmr.msra.gmra.mxu0 %vm41_vm0, %v33_v17  ;;  %240 = vmatmul.msk.f32.vlgmr.msra.gmra.mxu1 %vm41_vm0, %v33_v17 }
  0x12   :  { %245 = vmatmul.msk.f32.gmra.mxu2 %vm41_vm0, %v131_v18  ;;  %249 = vmatmul.msk.f32.gmra.mxu3 %vm41_vm0, %v131_v18 }
  0x14   :  { %237 = vmatmul.msk.f32.gmra.mxu0 %vm41_vm0, %v34_v19  ;;  %241 = vmatmul.msk.f32.gmra.mxu1 %vm41_vm0, %v34_v19 }
  0x1a   :  { %246 = vmatmul.msk.f32.gmra.mxu2 %vm41_vm0, %v132_v20  ;;  %250 = vmatmul.msk.f32.gmra.mxu3 %vm41_vm0, %v132_v20 }
  0x1c   :  { %238 = vmatmul.msk.f32.gmra.mxu0 %vm41_vm0, %v35_v21  ;;  %242 = vmatmul.msk.f32.gmra.mxu1 %vm41_vm0, %v35_v21 }
  0x22   :  { %247 = vmatmul.msk.f32.gmra.mxu2 %vm41_vm0, %v133_v22  ;;  %251 = vmatmul.msk.f32.gmra.mxu3 %vm41_vm0, %v133_v22 }
  0x24   :  { %239 = vmatmul.msk.f32.gmra.mxu0 %vm41_vm0, %v36_v23  ;;  %243 = vmatmul.msk.f32.gmra.mxu1 %vm41_vm0, %v36_v23 }
  0x89   :  { %v71_v26 = vpop.f32.mrf.mxu0  ;;  %v111_v27 = vpop.f32.mrf.mxu1 }
  0x8a   :  { %v86_v28 = vadd.f32 %v252_v24, %v71_v26  ;;  %v126_v29 = vadd.f32 %v253_v25, %v111_v27 }
  0x8d   :  { %v167_v30 = vpop.f32.mrf.mxu2  ;;  %v204_v31 = vpop.f32.mrf.mxu3 }
  0x8e   :  { %v179_v32 = vadd.f32 %v167_v30, %v86_v28  ;;  %v216_v33 = vadd.f32 %v204_v31, %v126_v29 }
  0x90   :  { %220 = vst [vmem:[%s430_s8] sm:$0xff] %v179_v32 }
  0x91   :  { %224 = vst [vmem:[%s431_s9] sm:$0xff] %v216_v33  ;;  %v74_v34 = vpop.f32.mrf.mxu0  ;;  %v114_v35 = vpop.f32.mrf.mxu1 }
  0x92   :  { %v87_v36 = vadd.f32 %v252_v24, %v74_v34  ;;  %v127_v37 = vadd.f32 %v253_v25, %v114_v35 }
  0x95   :  { %v170_v38 = vpop.f32.mrf.mxu2  ;;  %v207_v39 = vpop.f32.mrf.mxu3 }
  0x96   :  { %v180_v40 = vadd.f32 %v170_v38, %v87_v36  ;;  %v217_v41 = vadd.f32 %v207_v39, %v127_v37 }
  0x98   :  { %221 = vst [vmem:[%s430_s8 + $0x8] sm:$0xff] %v180_v40 }
  0x99   :  { %225 = vst [vmem:[%s431_s9 + $0x8] sm:$0xff] %v217_v41  ;;  %v77_v42 = vpop.f32.mrf.mxu0  ;;  %v117_v43 = vpop.f32.mrf.mxu1 }
  0x9a   :  { %v88_v44 = vadd.f32 %v252_v24, %v77_v42  ;;  %v128_v45 = vadd.f32 %v253_v25, %v117_v43 }
  0x9d   :  { %v173_v46 = vpop.f32.mrf.mxu2  ;;  %v210_v47 = vpop.f32.mrf.mxu3 }
  0x9e   :  { %v181_v48 = vadd.f32 %v173_v46, %v88_v44  ;;  %v218_v49 = vadd.f32 %v210_v47, %v128_v45 }
  0xa0   :  { %222 = vst [vmem:[%s430_s8 + $0x10] sm:$0xff] %v181_v48 }
  0xa1   :  { %226 = vst [vmem:[%s431_s9 + $0x10] sm:$0xff] %v218_v49  ;;  %v80_v50 = vpop.f32.mrf.mxu0  ;;  %v120_v51 = vpop.f32.mrf.mxu1 }
  0xa2   :  { %v89_v52 = vadd.f32 %v252_v24, %v80_v50  ;;  %v129_v53 = vadd.f32 %v253_v25, %v120_v51 }
  0xa5   :  { %v176_v54 = vpop.f32.mrf.mxu2  ;;  %v213_v55 = vpop.f32.mrf.mxu3 }
  0xa6   :  { %v182_v56 = vadd.f32 %v176_v54, %v89_v52  ;;  %v219_v57 = vadd.f32 %v213_v55, %v129_v53 }
  0xa8   :  { %223 = vst [vmem:[%s430_s8 + $0x18] sm:$0xff] %v182_v56 }
  0xa9   :  { %227 = vst [vmem:[%s431_s9 + $0x18] sm:$0xff] %v219_v57 }

// kernel: textrnn_forward.9
= control target key start
LH: loop header
LB: loop body
LE: loop exit
PB: predicated region body
PF: predicated region fallthrough
CT: control target
= control target key end

     0   :  { %s358_s0 = inlined_call_operand.vmem [shape: f32[4,32], index: 0, kind: input, shape index: {}]   ;;  %s359_s1 = inlined_call_operand.vmem [shape: f32[4,32], index: 1, kind: input, shape index: {}]   ;;  %s360_s2 = inlined_call_operand.vmem [shape: f32[1,32], index: 2, kind: input, shape index: {}]   ;;  %s361_s3 = inlined_call_operand.vmem [shape: f32[1,32], index: 3, kind: input, shape index: {}]   ;;  %s362_s4 = inlined_call_operand.vmem [shape: f32[1,32], index: 4, kind: input, shape index: {}]   ;;  %s363_s5 = inlined_call_operand.vmem [shape: f32[1,32], index: 5, kind: input, shape index: {}]   ;;  %s364_s6 = inlined_call_operand.vmem [shape: f32[1,32], index: 6, kind: input, shape index: {}]   ;;  %s365_s7 = inlined_call_operand.vmem [shape: f32[1,32], index: 7, kind: input, shape index: {}]   ;;  %s366_s8 = inlined_call_operand.vmem [shape: f32[1,32], index: 8, kind: input, shape index: {}]   ;;  %s367_s9 = inlined_call_operand.vmem [shape: f32[1,32], index: 9, kind: input, shape index: {}]   ;;  %s368_s10 = inlined_call_operand.vmem [shape: f32[32,5], index: 10, kind: input, shape index: {}]   ;;  %s369_s11 = inlined_call_operand.vmem [shape: f32[32,5], index: 11, kind: input, shape index: {}]   ;;  %s370_s12 = inlined_call_operand.vmem [shape: f32[1,5], index: 12, kind: input, shape index: {}]   ;;  %s371_s13 = inlined_call_operand.hbm [shape: f32[4,5], index: 13, kind: output, shape index: {}]  }
   0x1   :  { %v116_v0 = vld [vmem:[%s369_s11 + $0x18] sm:$0xff]  ;;  %v115_v2 = vld [vmem:[%s369_s11 + $0x10] sm:$0xff]  ;;  %v114_v4 = vld [vmem:[%s369_s11 + $0x8] sm:$0xff] }
   0x2   :  { %v112_v1 = vld [vmem:[%s368_s10 + $0x18] sm:$0xff]  ;;  %133 = vmatpush.msra.mxu0 %v116_v0  ;;  %v111_v3 = vld [vmem:[%s368_s10 + $0x10] sm:$0xff]  ;;  %v110_v5 = vld [vmem:[%s368_s10 + $0x8] sm:$0xff] }
   0x3   :  { %156 = vmatpush.msra.mxu1 %v112_v1  ;;  %v83_v6 = vld [vmem:[%s367_s9] sm:$0x1] }
   0x4   :  { %134 = vmatpush.msra.mxu0 %v115_v2  ;;  %v113_v7 = vld [vmem:[%s369_s11] sm:$0xff]  ;;  %v84_v9 = vadd.f32 1e-05, %v83_v6 }
   0x5   :  { %157 = vmatpush.msra.mxu1 %v111_v3  ;;  %v109_v8 = vld [vmem:[%s368_s10] sm:$0xff] }
   0x6   :  { %135 = vmatpush.msra.mxu0 %v114_v4  ;;  %197 = vrsqrt.f32 %v84_v9  ;;  %v51_v10 = vld [vmem:[%s363_s5] sm:$0x1] }
   0x7   :  { %158 = vmatpush.msra.mxu1 %v110_v5  ;;  %v52_v11 = vadd.f32 1e-05, %v51_v10 }
   0x8   :  { %136 = vmatpush.msra.mxu0 %v113_v7 }
   0x9   :  { %159 = vmatpush.msra.mxu1 %v109_v8  ;;  %199 = vrsqrt.f32 %v52_v11 }
   0xa   :  { %18 = vsyncpa [#allocation3], 0  ;;  %vm91_vm0 = vweird.f32 %v84_v9  ;;  %v190_v18 = vld [vmem:[%s366_s8] ss:$0 sm:$0xff]  ;;  %vm59_vm3 = vweird.f32 %v52_v11  ;;  %vm117_vm6 = vcmask 261120   ;;  %s227_s19 = smov [#allocation2]  }
   0xb   :  { %v77_v20 = vld [vmem:[%s359_s1] sm:$0xf]  ;;  %s178_s22 = sshll.u32 %s371_s13, 4  ;;  %vm169_vm7 = vcmask 35840   ;;  %s179_s22 = int_to_ptr.hbm [resolvable:$true] %s178_s22 }
   0xc   :  { %v198_v12 = vpop.eup %197  ;;  %v193_v24 = vld [vmem:[%s362_s4] ss:$0 sm:$0xff]  ;;  %v82_v25 = vsub.f32 %v77_v20, %v190_v18 }
   0xd   :  { %v86_v13 = vmul.f32 %v198_v12, %v84_v9  ;;  %vm92_vm1 = vweird.f32 %v198_v12  ;;  %v45_v26 = vld [vmem:[%s358_s0] sm:$0xf] }
   0xe   :  { %vm93_vm2 = vmor %vm91_vm0, %vm92_vm1  ;;  %v191_v30 = vld [vmem:[%s364_s6] ss:$0 sm:$0xff]  ;;  %v50_v32 = vsub.f32 %v45_v26, %v193_v24 }
   0xf   :  { %v200_v14 = vpop.eup %199  ;;  %v87_v15 = vmul.f32 %v198_v12, %v86_v13  ;;  %v192_v34 = vld [vmem:[%s365_s7] ss:$0 sm:$0xff] }
  0x10   :  { %v54_v16 = vmul.f32 %v200_v14, %v52_v11  ;;  %vm60_vm4 = vweird.f32 %v200_v14  ;;  %v194_v37 = vld [vmem:[%s360_s2] ss:$0 sm:$0xff]  ;;  %s176_s2 = sshll.u32 %s227_s19, 4  ;;  %s177_s2 = int_to_ptr.vmem [resolvable:$true] %s176_s2 }
  0x11   :  { %v88_v17 = vmul.f32 0.5, %v87_v15  ;;  %vm61_vm5 = vmor %vm59_vm3, %vm60_vm4  ;;  %v195_v40 = vld [vmem:[%s361_s3] ss:$0 sm:$0xff] }
  0x12   :  { %v55_v19 = vmul.f32 %v200_v14, %v54_v16  ;;  %v196_v45 = vld [vmem:[%s370_s12] ss:$0 sm:$0xff] }
  0x13   :  { %v89_v21 = vsub.f32 1.5, %v88_v17 }
  0x14   :  { %v56_v22 = vmul.f32 0.5, %v55_v19 }
  0x15   :  { %v90_v23 = vmul.f32 %v198_v12, %v89_v21 }
  0x16   :  { %v57_v27 = vsub.f32 1.5, %v56_v22 }
  0x17   :  { %v94_v28 = vsel %vm93_vm2, %v198_v12, %v90_v23 }
  0x18   :  { %v96_v29 = vperm.slane %v94_v28, 0  ;;  %v58_v31 = vmul.f32 %v200_v14, %v57_v27 }
  0x1a   :  { %v98_v33 = vmul.f32 %v96_v29, %v82_v25  ;;  %v62_v35 = vsel %vm61_vm5, %v200_v14, %v58_v31 }
  0x1b   :  { %v64_v36 = vperm.slane %v62_v35, 0 }
  0x1c   :  { %v103_v38 = vmul.f32 %v191_v30, %v98_v33 }
  0x1d   :  { %v66_v39 = vmul.f32 %v64_v36, %v50_v32 }
  0x1e   :  { %v108_v41 = vadd.f32 %v192_v34, %v103_v38 }
  0x1f   :  { %v71_v42 = vmul.f32 %v194_v37, %v66_v39 }
  0x20   :  { %187 = vmatmul.msk.f32.vlgmr.msra.gmra.mxu0 %vm117_vm6, %v108_v41 }
  0x21   :  { %v76_v43 = vadd.f32 %v195_v40, %v71_v42 }
  0x23   :  { %188 = vmatmul.msk.f32.vlgmr.msra.gmra.mxu1 %vm117_vm6, %v76_v43 }
  0x9d   :  { %v138_v44 = vpop.f32.mrf.mxu0 }
  0xa0   :  { %v161_v46 = vpop.f32.mrf.mxu1 }
  0xa1   :  { %v162_v47 = vadd.f32 %v161_v46, %v138_v44 }
  0xa3   :  { %v168_v48 = vadd.f32 %v196_v45, %v162_v47 }
  0xa5   :  { %170 = vst.msk [vmem:[#allocation2] sm:$0xf] %vm169_vm7, %v168_v48 }
  0xa6   :  { %181 = dma.vmem_to_hbm [thread:$0]  %s177_s2, 64, %s179_s22, [#allocation3]  }
  0xa7   :  { %225 = dma.done.wait [#allocation3], 64  }
  0xa8   :  { %226 = vsyncadd [#allocation3], 4294967232 }
  0xa9   :  { %186 = vsyncpa [#allocation3], 1 }

// kernel: textrnn_forward.6
= control target key start
LH: loop header
LB: loop body
LE: loop exit
PB: predicated region body
PF: predicated region fallthrough
CT: control target
= control target key end

     0   :  { %vm59_vm0 = vcmask 257024   ;;  %v1650_v3 = vmov 0.0   ;;  %vm71_vm1 = vcmask 261120   ;;  %s1651_s9 = smov 32   ;;  %s1652_s14 = smov 64   ;;  %s1992_s2 = inlined_call_operand.vmem [shape: f32[32,128], index: 2, kind: input, shape index: {}]   ;;  %s1993_s3 = inlined_call_operand.vmem [shape: f32[32,128], index: 3, kind: input, shape index: {}]   ;;  %s1994_s0 = inlined_call_operand.vmem [shape: f32[8,4,128], index: 0, kind: input, shape index: {}]   ;;  %s1995_s1 = inlined_call_operand.vmem [shape: f32[8,4,128], index: 1, kind: input, shape index: {}]   ;;  %s1996_s4 = inlined_call_operand.vmem [shape: f32[8,4,32], index: 4, kind: output, shape index: {0}]   ;;  %s1997_s5 = inlined_call_operand.vmem [shape: f32[8,4,32], index: 5, kind: output, shape index: {1}]  }
   0x1   :  { %v70_v0 = vld [vmem:[%s1992_s2 + $0x18] sm:$0xff]  ;;  %v69_v2 = vld [vmem:[%s1992_s2 + $0x10] sm:$0xff]  ;;  %60 = vst.msk [vmem:[#allocation2] sm:$0xf] %vm59_vm0, %v1650_v3  ;;  %v68_v5 = vld [vmem:[%s1992_s2 + $0x8] sm:$0xff]  ;;  %s1653_s15 = smov 96  }
   0x2   :  { %v156_v1 = vld [vmem:[%s1993_s3 + $0x18] sm:$0xff]  ;;  %87 = vmatpush.msra.mxu0 %v70_v0  ;;  %v155_v4 = vld [vmem:[%s1993_s3 + $0x10] sm:$0xff]  ;;  %61 = vst.msk [vmem:[#allocation3] sm:$0xf] %vm59_vm0, %v1650_v3  ;;  %v154_v6 = vld [vmem:[%s1993_s3 + $0x8] sm:$0xff]  ;;  %257 = vmatpush.msra.mxu2 %v70_v0 }
   0x3   :  { %172 = vmatpush.msra.mxu1 %v156_v1  ;;  %62 = vst.msk [vmem:[#allocation4] sm:$0xf] %vm59_vm0, %v1650_v3  ;;  %342 = vmatpush.msra.mxu3 %v156_v1  ;;  %v67_v7 = vld [vmem:[%s1992_s2] sm:$0xff]  ;;  %v1460_v16 = vld [vmem:[%s1995_s1 + $0x1c] sm:$0xf] }
   0x4   :  { %88 = vmatpush.msra.mxu0 %v69_v2  ;;  %63 = vst.msk [vmem:[#allocation5] sm:$0xf] %vm59_vm0, %v1650_v3  ;;  %v153_v8 = vld [vmem:[%s1993_s3] sm:$0xff]  ;;  %258 = vmatpush.msra.mxu2 %v69_v2 }
   0x5   :  { %173 = vmatpush.msra.mxu1 %v155_v4  ;;  %343 = vmatpush.msra.mxu3 %v155_v4  ;;  %v64_v13 = vld [vmem:[%s1994_s0] sm:$0xf] }
   0x6   :  { %89 = vmatpush.msra.mxu0 %v68_v5  ;;  %259 = vmatpush.msra.mxu2 %v68_v5 }
   0x7   :  { %174 = vmatpush.msra.mxu1 %v154_v6  ;;  %344 = vmatpush.msra.mxu3 %v154_v6 }
   0x8   :  { %90 = vmatpush.msra.mxu0 %v67_v7  ;;  %v65_v9 = vld [vmem:[#allocation2] sm:$0xf]  ;;  %260 = vmatpush.msra.mxu2 %v67_v7 }
   0x9   :  { %175 = vmatpush.msra.mxu1 %v153_v8  ;;  %1458 = vmatmul.msk.f32.vlgmr.msra.gmra.mxu0 %vm71_vm1, %v65_v9  ;;  %v66_v10 = vld [vmem:[#allocation3] sm:$0xf] }
   0xa   :  { %v151_v11 = vld [vmem:[#allocation4] sm:$0xf]  ;;  %117 = vrot.lane.b32.xlu1 %v66_v10, %s1651_s9  ;;  %345 = vmatpush.msra.mxu3 %v153_v8 }
   0xb   :  { %1461 = vmatmul.msk.f32.vlgmr.msra.gmra.mxu1 %vm71_vm1, %v151_v11  ;;  %427 = vmatpush.msrb.mxu0 %v70_v0  ;;  %v152_v12 = vld [vmem:[#allocation5] sm:$0xf] }
   0xc   :  { %512 = vmatpush.msrb.mxu1 %v156_v1  ;;  %597 = vmatpush.msrb.mxu2 %v70_v0 }
   0xd   :  { %428 = vmatpush.msrb.mxu0 %v69_v2  ;;  %682 = vmatpush.msrb.mxu3 %v156_v1 }
   0xe   :  { %513 = vmatpush.msrb.mxu1 %v155_v4  ;;  %598 = vmatpush.msrb.mxu2 %v69_v2 }
   0xf   :  { %429 = vmatpush.msrb.mxu0 %v68_v5  ;;  %683 = vmatpush.msrb.mxu3 %v155_v4 }
  0x10   :  { %514 = vmatpush.msrb.mxu1 %v154_v6  ;;  %599 = vmatpush.msrb.mxu2 %v68_v5 }
  0x11   :  { %430 = vmatpush.msrb.mxu0 %v67_v7  ;;  %684 = vmatpush.msrb.mxu3 %v154_v6 }
  0x12   :  { %202 = vrot.lane.b32.xlu1 %v152_v12, %s1651_s9  ;;  %515 = vmatpush.msrb.mxu1 %v153_v8 }
  0x13   :  { %600 = vmatpush.msrb.mxu2 %v67_v7  ;;  %685 = vmatpush.msrb.mxu3 %v153_v8 }
  0x14   :  { %767 = vmatpush.msra.mxu0 %v70_v0  ;;  %852 = vmatpush.msra.mxu1 %v156_v1 }
  0x16   :  { %768 = vmatpush.msra.mxu0 %v69_v2  ;;  %853 = vmatpush.msra.mxu1 %v155_v4 }
  0x18   :  { %769 = vmatpush.msra.mxu0 %v68_v5  ;;  %854 = vmatpush.msra.mxu1 %v154_v6 }
  0x1a   :  { %770 = vmatpush.msra.mxu0 %v67_v7  ;;  %855 = vmatpush.msra.mxu1 %v153_v8  ;;  %v1464_v8 = vld [vmem:[%s1994_s0 + $0x4] sm:$0xf] }
  0x7c   :  { %v118_v51 = vpop.permute.xlu1 %117 }
  0x84   :  { %v203_v55 = vpop.permute.xlu1 %202 }
  0x86   :  { %v92_v14 = vpop.f32.mrf.mxu0 }
  0x87   :  { %v95_v15 = vadd.f32 %v92_v14, %v64_v13  ;;  %v1468_v13 = vld [vmem:[%s1995_s1 + $0x18] sm:$0xf] }
  0x88   :  { %v177_v17 = vpop.f32.mrf.mxu1 }
  0x89   :  { %1522 = vtanh.f32 %v95_v15  ;;  %v180_v18 = vadd.f32 %v1460_v16, %v177_v17  ;;  %v1459_v21 = vmul.f32 -1.442695, %v95_v15 }
  0x8b   :  { %1524 = vtanh.f32 %v180_v18  ;;  %v1462_v22 = vmul.f32 -1.442695, %v180_v18 }
  0x8c   :  { %1526 = vpow2.f32 %v1459_v21 }
  0x8d   :  { %1528 = vpow2.f32 %v1462_v22 }
  0x8f   :  { %v1523_v19 = vpop.eup %1522 }
  0x90   :  { %122 = vrot.lane.b32.xlu0 %v1523_v19, %s1652_s14 }
  0x91   :  { %v1525_v20 = vpop.eup %1524 }
  0x92   :  { %v1527_v23 = vpop.eup %1526 }
  0x93   :  { %v99_v24 = vadd.f32 1.0, %v1527_v23  ;;  %v1529_v25 = vpop.eup %1528 }
  0x94   :  { %v184_v26 = vadd.f32 1.0, %v1529_v25 }
  0x95   :  { %1530 = vrcp.f32 %v99_v24  ;;  %v111_v35 = vand.u32 2147483648, %v99_v24  ;;  %vm105_vm3 = vweird.f32 %v99_v24  ;;  %v109_v36 = vand.u32 2147483647, %v99_v24 }
  0x96   :  { %1532 = vrcp.f32 %v184_v26  ;;  %vm190_vm6 = vweird.f32 %v184_v26  ;;  %v196_v44 = vand.u32 2147483648, %v184_v26  ;;  %v194_v45 = vand.u32 2147483647, %v184_v26 }
  0x97   :  { %v112_v39 = vor.u32 1.1754944e-38, %v111_v35  ;;  %vm110_vm5 = vcmp.eq.f32.partialorder %v109_v36, 8.507059e+37 }
  0x98   :  { %207 = vrot.lane.b32.xlu0 %v1525_v20, %s1652_s14  ;;  %v197_v47 = vor.u32 1.1754944e-38, %v196_v44  ;;  %vm195_vm9 = vcmp.eq.f32.partialorder %v194_v45, 8.507059e+37 }
  0x9b   :  { %v1531_v27 = vpop.eup %1530 }
  0x9c   :  { %v101_v28 = vmul.f32 %v1531_v27, %v99_v24  ;;  %v1533_v30 = vpop.eup %1532  ;;  %vm106_vm2 = vweird.f32 %v1531_v27 }
  0x9d   :  { %v186_v32 = vmul.f32 %v1533_v30, %v184_v26  ;;  %vm107_vm4 = vmor %vm105_vm3, %vm106_vm2  ;;  %vm191_vm7 = vweird.f32 %v1533_v30 }
  0x9e   :  { %v102_v29 = vsub.f32 1.0, %v101_v28  ;;  %vm192_vm8 = vmor %vm190_vm6, %vm191_vm7 }
  0x9f   :  { %v187_v34 = vsub.f32 1.0, %v186_v32 }
  0xa0   :  { %v103_v31 = vmul.f32 %v1531_v27, %v102_v29 }
  0xa1   :  { %v188_v38 = vmul.f32 %v1533_v30, %v187_v34 }
  0xa2   :  { %v104_v33 = vadd.f32 %v1531_v27, %v103_v31 }
  0xa3   :  { %v189_v42 = vadd.f32 %v1533_v30, %v188_v38 }
  0xa4   :  { %v108_v37 = vsel %vm107_vm4, %v1531_v27, %v104_v33 }
  0xa5   :  { %v113_v40 = vsel %vm110_vm5, %v112_v39, %v108_v37  ;;  %v193_v46 = vsel %vm192_vm8, %v1533_v30, %v189_v42 }
  0xa6   :  { %v198_v48 = vsel %vm195_vm9, %v197_v47, %v193_v46  ;;  %v120_v52 = vmul.f32 %v118_v51, %v113_v40 }
  0xa7   :  { %v205_v56 = vmul.f32 %v203_v55, %v198_v48 }
 0x102   :  { %v123_v41 = vpop.permute.xlu0 %122 }
 0x103   :  { %v125_v43 = vmul.f32 %v123_v41, %v113_v40 }
 0x105   :  { %127 = vrot.lane.b32.xlu2 %v125_v43, %s1651_s9 }
 0x10a   :  { %v208_v49 = vpop.permute.xlu0 %207 }
 0x10b   :  { %v210_v50 = vmul.f32 %v208_v49, %v198_v48 }
 0x10d   :  { %212 = vrot.lane.b32.xlu2 %v210_v50, %s1651_s9 }
 0x15f   :  { %v128_v53 = vpop.permute.xlu2 %127 }
 0x160   :  { %v130_v54 = vadd.f32 %v128_v53, %v120_v52 }
 0x162   :  { %1534 = vtanh.f32 %v130_v54 }
 0x167   :  { %v213_v57 = vpop.permute.xlu2 %212 }
 0x168   :  { %v1535_v58 = vpop.eup %1534  ;;  %v215_v59 = vadd.f32 %v213_v57, %v205_v56 }
 0x169   :  { %133 = vrot.lane.b32.xlu0 %v1535_v58, %s1652_s14 }
 0x16a   :  { %1536 = vtanh.f32 %v215_v59 }
 0x170   :  { %v1537_v60 = vpop.eup %1536 }
 0x171   :  { %218 = vrot.lane.b32.xlu1 %v1537_v60, %s1652_s14 }
 0x179   :  { %144 = vrot.lane.b32.xlu1 %v130_v54, %s1653_s15 }
 0x1db   :  { %v134_v61 = vpop.permute.xlu0 %133 }
 0x1dc   :  { %v136_v62 = vmul.f32 %v134_v61, %v113_v40 }
 0x1de   :  { %138 = vrot.lane.b32.xlu2 %v136_v62, %s1651_s9 }
 0x1e3   :  { %v219_v63 = vpop.permute.xlu1 %218 }
 0x1e4   :  { %v221_v0 = vmul.f32 %v219_v63, %v198_v48 }
 0x1e6   :  { %223 = vrot.lane.b32.xlu0 %v221_v0, %s1651_s9  ;;  %228 = vrot.lane.b32.xlu2 %v215_v59, %s1653_s15 }
 0x1eb   :  { %v145_v1 = vpop.permute.xlu1 %144 }
 0x1ec   :  { %147 = vst.msk [vmem:[#allocation3] sm:$0xf] %vm59_vm0, %v145_v1 }
 0x1f3   :  { %v237_v2 = vld [vmem:[#allocation3] sm:$0xf] }
 0x1f4   :  { %287 = vrot.lane.b32.xlu2 %v237_v2, %s1651_s9 }
 0x238   :  { %v139_v3 = vpop.permute.xlu2 %138 }
 0x239   :  { %142 = vst.msk [vmem:[#allocation2] sm:$0xf] %vm59_vm0, %v139_v3 }
 0x23a   :  { %148 = vst.msk [vmem:[%s1996_s4] sm:$0xf] %vm59_vm0, %v139_v3 }
 0x240   :  { %v229_v4 = vpop.permute.xlu2 %228  ;;  %v236_v5 = vld [vmem:[#allocation2] sm:$0xf] }
 0x241   :  { %231 = vst.msk [vmem:[#allocation5] sm:$0xf] %vm59_vm0, %v229_v4  ;;  %1465 = vmatmul.msk.f32.vlgmr.msra.gmra.mxu2 %vm71_vm1, %v236_v5  ;;  %v1472_v4 = vld [vmem:[%s1994_s0 + $0x8] sm:$0xf] }
 0x248   :  { %v322_v12 = vld [vmem:[#allocation5] sm:$0xf] }
 0x24e   :  { %v288_v47 = vpop.permute.xlu2 %287 }
 0x258   :  { %v224_v6 = vpop.permute.xlu0 %223 }
 0x259   :  { %226 = vst.msk [vmem:[#allocation4] sm:$0xf] %vm59_vm0, %v224_v6 }
 0x25a   :  { %1463 = vst.msk [vmem:[%s1997_s5 + $0x1c] sm:$0xf] %vm59_vm0, %v224_v6 }
 0x260   :  { %v321_v7 = vld [vmem:[#allocation4] sm:$0xf] }
 0x261   :  { %1469 = vmatmul.msk.f32.vlgmr.msra.gmra.mxu3 %vm71_vm1, %v321_v7 }
 0x2c4   :  { %v262_v9 = vpop.f32.mrf.mxu2 }
 0x2c5   :  { %v265_v10 = vadd.f32 %v1464_v8, %v262_v9  ;;  %v1476_v9 = vld [vmem:[%s1995_s1 + $0x14] sm:$0xf] }
 0x2c7   :  { %1538 = vtanh.f32 %v265_v10  ;;  %v1466_v17 = vmul.f32 -1.442695, %v265_v10 }
 0x2cd   :  { %v1539_v11 = vpop.eup %1538 }
 0x2ce   :  { %292 = vrot.lane.b32.xlu0 %v1539_v11, %s1652_s14 }
 0x2d6   :  { %372 = vrot.lane.b32.xlu0 %v322_v12, %s1651_s9 }
 0x2e4   :  { %v347_v14 = vpop.f32.mrf.mxu3 }
 0x2e5   :  { %v350_v15 = vadd.f32 %v1468_v13, %v347_v14 }
 0x2e7   :  { %1540 = vtanh.f32 %v350_v15  ;;  %v1470_v23 = vmul.f32 -1.442695, %v350_v15 }
 0x2e8   :  { %1542 = vpow2.f32 %v1466_v17 }
 0x2ed   :  { %v1541_v16 = vpop.eup %1540 }
 0x2ee   :  { %377 = vrot.lane.b32.xlu1 %v1541_v16, %s1652_s14  ;;  %v1543_v18 = vpop.eup %1542 }
 0x2ef   :  { %v269_v19 = vadd.f32 1.0, %v1543_v18 }
 0x2f1   :  { %1544 = vrcp.f32 %v269_v19  ;;  %v281_v26 = vand.u32 2147483648, %v269_v19  ;;  %vm275_vm11 = vweird.f32 %v269_v19  ;;  %v279_v27 = vand.u32 2147483647, %v269_v19 }
 0x2f2   :  { %1546 = vpow2.f32 %v1470_v23 }
 0x2f3   :  { %v282_v30 = vor.u32 1.1754944e-38, %v281_v26  ;;  %vm280_vm13 = vcmp.eq.f32.partialorder %v279_v27, 8.507059e+37 }
 0x2f7   :  { %v1545_v20 = vpop.eup %1544 }
 0x2f8   :  { %v271_v21 = vmul.f32 %v1545_v20, %v269_v19  ;;  %vm276_vm10 = vweird.f32 %v1545_v20  ;;  %v1547_v28 = vpop.eup %1546 }
 0x2f9   :  { %vm277_vm12 = vmor %vm275_vm11, %vm276_vm10  ;;  %v354_v31 = vadd.f32 1.0, %v1547_v28 }
 0x2fa   :  { %v272_v22 = vsub.f32 1.0, %v271_v21 }
 0x2fb   :  { %1548 = vrcp.f32 %v354_v31  ;;  %v366_v40 = vand.u32 2147483648, %v354_v31  ;;  %vm360_vm15 = vweird.f32 %v354_v31  ;;  %v364_v41 = vand.u32 2147483647, %v354_v31 }
 0x2fc   :  { %v273_v24 = vmul.f32 %v1545_v20, %v272_v22 }
 0x2fd   :  { %v367_v43 = vor.u32 1.1754944e-38, %v366_v40  ;;  %vm365_vm3 = vcmp.eq.f32.partialorder %v364_v41, 8.507059e+37 }
 0x2fe   :  { %v274_v25 = vadd.f32 %v1545_v20, %v273_v24 }
 0x300   :  { %v278_v29 = vsel %vm277_vm12, %v1545_v20, %v274_v25 }
 0x301   :  { %v283_v32 = vsel %vm280_vm13, %v282_v30, %v278_v29  ;;  %v1549_v35 = vpop.eup %1548 }
 0x302   :  { %v356_v36 = vmul.f32 %v1549_v35, %v354_v31  ;;  %vm361_vm14 = vweird.f32 %v1549_v35  ;;  %v290_v48 = vmul.f32 %v288_v47, %v283_v32 }
 0x303   :  { %vm362_vm2 = vmor %vm360_vm15, %vm361_vm14 }
 0x304   :  { %v357_v37 = vsub.f32 1.0, %v356_v36 }
 0x306   :  { %v358_v38 = vmul.f32 %v1549_v35, %v357_v37 }
 0x308   :  { %v359_v39 = vadd.f32 %v1549_v35, %v358_v38 }
 0x30a   :  { %v363_v42 = vsel %vm362_vm2, %v1549_v35, %v359_v39 }
 0x30b   :  { %v368_v44 = vsel %vm365_vm3, %v367_v43, %v363_v42 }
 0x340   :  { %v293_v33 = vpop.permute.xlu0 %292 }
 0x341   :  { %v295_v34 = vmul.f32 %v293_v33, %v283_v32 }
 0x343   :  { %297 = vrot.lane.b32.xlu1 %v295_v34, %s1651_s9 }
 0x348   :  { %v373_v51 = vpop.permute.xlu0 %372 }
 0x349   :  { %v375_v52 = vmul.f32 %v373_v51, %v368_v44 }
 0x360   :  { %v378_v45 = vpop.permute.xlu1 %377 }
 0x361   :  { %v380_v46 = vmul.f32 %v378_v45, %v368_v44 }
 0x363   :  { %382 = vrot.lane.b32.xlu2 %v380_v46, %s1651_s9 }
 0x3b5   :  { %v298_v49 = vpop.permute.xlu1 %297 }
 0x3b6   :  { %v300_v50 = vadd.f32 %v298_v49, %v290_v48 }
 0x3b8   :  { %1550 = vtanh.f32 %v300_v50 }
 0x3bd   :  { %v383_v53 = vpop.permute.xlu2 %382 }
 0x3be   :  { %v1551_v54 = vpop.eup %1550  ;;  %v385_v55 = vadd.f32 %v383_v53, %v375_v52 }
 0x3bf   :  { %303 = vrot.lane.b32.xlu0 %v1551_v54, %s1652_s14 }
 0x3c0   :  { %1552 = vtanh.f32 %v385_v55 }
 0x3c6   :  { %v1553_v56 = vpop.eup %1552 }
 0x3c7   :  { %388 = vrot.lane.b32.xlu1 %v1553_v56, %s1652_s14 }
 0x3cf   :  { %313 = vrot.lane.b32.xlu1 %v300_v50, %s1653_s15 }
 0x431   :  { %v304_v57 = vpop.permute.xlu0 %303 }
 0x432   :  { %v306_v58 = vmul.f32 %v304_v57, %v283_v32 }
 0x434   :  { %308 = vrot.lane.b32.xlu2 %v306_v58, %s1651_s9 }
 0x439   :  { %v389_v59 = vpop.permute.xlu1 %388 }
 0x43a   :  { %v391_v60 = vmul.f32 %v389_v59, %v368_v44 }
 0x43c   :  { %393 = vrot.lane.b32.xlu0 %v391_v60, %s1651_s9  ;;  %398 = vrot.lane.b32.xlu2 %v385_v55, %s1653_s15 }
 0x441   :  { %v314_v61 = vpop.permute.xlu1 %313 }
 0x442   :  { %316 = vst.msk [vmem:[#allocation3] sm:$0xf] %vm59_vm0, %v314_v61 }
 0x449   :  { %v407_v62 = vld [vmem:[#allocation3] sm:$0xf] }
 0x44a   :  { %457 = vrot.lane.b32.xlu2 %v407_v62, %s1651_s9 }
 0x48e   :  { %v309_v63 = vpop.permute.xlu2 %308 }
 0x48f   :  { %311 = vst.msk [vmem:[#allocation2] sm:$0xf] %vm59_vm0, %v309_v63 }
 0x490   :  { %1467 = vst.msk [vmem:[%s1996_s4 + $0x4] sm:$0xf] %vm59_vm0, %v309_v63 }
 0x496   :  { %v399_v0 = vpop.permute.xlu2 %398  ;;  %v406_v1 = vld [vmem:[#allocation2] sm:$0xf] }
 0x497   :  { %401 = vst.msk [vmem:[#allocation5] sm:$0xf] %vm59_vm0, %v399_v0  ;;  %1473 = vmatmul.msk.f32.vlgmr.msrb.gmra.mxu0 %vm71_vm1, %v406_v1  ;;  %v1480_v0 = vld [vmem:[%s1994_s0 + $0xc] sm:$0xf] }
 0x49e   :  { %v492_v8 = vld [vmem:[#allocation5] sm:$0xf] }
 0x4a4   :  { %v458_v43 = vpop.permute.xlu2 %457 }
 0x4ae   :  { %v394_v2 = vpop.permute.xlu0 %393 }
 0x4af   :  { %396 = vst.msk [vmem:[#allocation4] sm:$0xf] %vm59_vm0, %v394_v2 }
 0x4b0   :  { %1471 = vst.msk [vmem:[%s1997_s5 + $0x18] sm:$0xf] %vm59_vm0, %v394_v2 }
 0x4b6   :  { %v491_v3 = vld [vmem:[#allocation4] sm:$0xf] }
 0x4b7   :  { %1477 = vmatmul.msk.f32.vlgmr.msrb.gmra.mxu1 %vm71_vm1, %v491_v3 }
 0x514   :  { %v432_v5 = vpop.f32.mrf.mxu0 }
 0x515   :  { %v435_v6 = vadd.f32 %v1472_v4, %v432_v5  ;;  %v1484_v5 = vld [vmem:[%s1995_s1 + $0x10] sm:$0xf] }
 0x517   :  { %1554 = vtanh.f32 %v435_v6  ;;  %v1474_v13 = vmul.f32 -1.442695, %v435_v6 }
 0x51d   :  { %v1555_v7 = vpop.eup %1554 }
 0x51e   :  { %462 = vrot.lane.b32.xlu0 %v1555_v7, %s1652_s14 }
 0x526   :  { %542 = vrot.lane.b32.xlu0 %v492_v8, %s1651_s9 }
 0x534   :  { %v517_v10 = vpop.f32.mrf.mxu1 }
 0x535   :  { %v520_v11 = vadd.f32 %v1476_v9, %v517_v10 }
 0x537   :  { %1556 = vtanh.f32 %v520_v11  ;;  %v1478_v19 = vmul.f32 -1.442695, %v520_v11 }
 0x538   :  { %1558 = vpow2.f32 %v1474_v13 }
 0x53d   :  { %v1557_v12 = vpop.eup %1556 }
 0x53e   :  { %547 = vrot.lane.b32.xlu1 %v1557_v12, %s1652_s14  ;;  %v1559_v14 = vpop.eup %1558 }
 0x53f   :  { %v439_v15 = vadd.f32 1.0, %v1559_v14 }
 0x541   :  { %1560 = vrcp.f32 %v439_v15  ;;  %v451_v22 = vand.u32 2147483648, %v439_v15  ;;  %vm445_vm5 = vweird.f32 %v439_v15  ;;  %v449_v23 = vand.u32 2147483647, %v439_v15 }
 0x542   :  { %1562 = vpow2.f32 %v1478_v19 }
 0x543   :  { %v452_v26 = vor.u32 1.1754944e-38, %v451_v22  ;;  %vm450_vm7 = vcmp.eq.f32.partialorder %v449_v23, 8.507059e+37 }
 0x547   :  { %v1561_v16 = vpop.eup %1560 }
 0x548   :  { %v441_v17 = vmul.f32 %v1561_v16, %v439_v15  ;;  %vm446_vm4 = vweird.f32 %v1561_v16  ;;  %v1563_v24 = vpop.eup %1562 }
 0x549   :  { %vm447_vm6 = vmor %vm445_vm5, %vm446_vm4  ;;  %v524_v27 = vadd.f32 1.0, %v1563_v24 }
 0x54a   :  { %v442_v18 = vsub.f32 1.0, %v441_v17 }
 0x54b   :  { %1564 = vrcp.f32 %v524_v27  ;;  %v536_v36 = vand.u32 2147483648, %v524_v27  ;;  %vm530_vm9 = vweird.f32 %v524_v27  ;;  %v534_v37 = vand.u32 2147483647, %v524_v27 }
 0x54c   :  { %v443_v20 = vmul.f32 %v1561_v16, %v442_v18 }
 0x54d   :  { %v537_v39 = vor.u32 1.1754944e-38, %v536_v36  ;;  %vm535_vm11 = vcmp.eq.f32.partialorder %v534_v37, 8.507059e+37 }
 0x54e   :  { %v444_v21 = vadd.f32 %v1561_v16, %v443_v20 }
 0x550   :  { %v448_v25 = vsel %vm447_vm6, %v1561_v16, %v444_v21 }
 0x551   :  { %v453_v28 = vsel %vm450_vm7, %v452_v26, %v448_v25  ;;  %v1565_v31 = vpop.eup %1564 }
 0x552   :  { %v526_v32 = vmul.f32 %v1565_v31, %v524_v27  ;;  %vm531_vm8 = vweird.f32 %v1565_v31  ;;  %v460_v44 = vmul.f32 %v458_v43, %v453_v28 }
 0x553   :  { %vm532_vm10 = vmor %vm530_vm9, %vm531_vm8 }
 0x554   :  { %v527_v33 = vsub.f32 1.0, %v526_v32 }
 0x556   :  { %v528_v34 = vmul.f32 %v1565_v31, %v527_v33 }
 0x558   :  { %v529_v35 = vadd.f32 %v1565_v31, %v528_v34 }
 0x55a   :  { %v533_v38 = vsel %vm532_vm10, %v1565_v31, %v529_v35 }
 0x55b   :  { %v538_v40 = vsel %vm535_vm11, %v537_v39, %v533_v38 }
 0x590   :  { %v463_v29 = vpop.permute.xlu0 %462 }
 0x591   :  { %v465_v30 = vmul.f32 %v463_v29, %v453_v28 }
 0x593   :  { %467 = vrot.lane.b32.xlu1 %v465_v30, %s1651_s9 }
 0x598   :  { %v543_v47 = vpop.permute.xlu0 %542 }
 0x599   :  { %v545_v48 = vmul.f32 %v543_v47, %v538_v40 }
 0x5b0   :  { %v548_v41 = vpop.permute.xlu1 %547 }
 0x5b1   :  { %v550_v42 = vmul.f32 %v548_v41, %v538_v40 }
 0x5b3   :  { %552 = vrot.lane.b32.xlu2 %v550_v42, %s1651_s9 }
 0x605   :  { %v468_v45 = vpop.permute.xlu1 %467 }
 0x606   :  { %v470_v46 = vadd.f32 %v468_v45, %v460_v44 }
 0x608   :  { %1566 = vtanh.f32 %v470_v46 }
 0x60d   :  { %v553_v49 = vpop.permute.xlu2 %552 }
 0x60e   :  { %v1567_v50 = vpop.eup %1566  ;;  %v555_v51 = vadd.f32 %v553_v49, %v545_v48 }
 0x60f   :  { %473 = vrot.lane.b32.xlu0 %v1567_v50, %s1652_s14 }
 0x610   :  { %1568 = vtanh.f32 %v555_v51 }
 0x616   :  { %v1569_v52 = vpop.eup %1568 }
 0x617   :  { %558 = vrot.lane.b32.xlu1 %v1569_v52, %s1652_s14 }
 0x61f   :  { %483 = vrot.lane.b32.xlu1 %v470_v46, %s1653_s15 }
 0x681   :  { %v474_v53 = vpop.permute.xlu0 %473 }
 0x682   :  { %v476_v54 = vmul.f32 %v474_v53, %v453_v28 }
 0x684   :  { %478 = vrot.lane.b32.xlu2 %v476_v54, %s1651_s9 }
 0x689   :  { %v559_v55 = vpop.permute.xlu1 %558 }
 0x68a   :  { %v561_v56 = vmul.f32 %v559_v55, %v538_v40 }
 0x68c   :  { %563 = vrot.lane.b32.xlu0 %v561_v56, %s1651_s9  ;;  %568 = vrot.lane.b32.xlu2 %v555_v51, %s1653_s15 }
 0x691   :  { %v484_v57 = vpop.permute.xlu1 %483 }
 0x692   :  { %486 = vst.msk [vmem:[#allocation3] sm:$0xf] %vm59_vm0, %v484_v57 }
 0x699   :  { %v577_v58 = vld [vmem:[#allocation3] sm:$0xf] }
 0x69a   :  { %627 = vrot.lane.b32.xlu2 %v577_v58, %s1651_s9 }
 0x6de   :  { %v479_v59 = vpop.permute.xlu2 %478 }
 0x6df   :  { %481 = vst.msk [vmem:[#allocation2] sm:$0xf] %vm59_vm0, %v479_v59 }
 0x6e0   :  { %1475 = vst.msk [vmem:[%s1996_s4 + $0x8] sm:$0xf] %vm59_vm0, %v479_v59 }
 0x6e6   :  { %v569_v60 = vpop.permute.xlu2 %568  ;;  %v576_v61 = vld [vmem:[#allocation2] sm:$0xf] }
 0x6e7   :  { %571 = vst.msk [vmem:[#allocation5] sm:$0xf] %vm59_vm0, %v569_v60  ;;  %1481 = vmatmul.msk.f32.vlgmr.msrb.gmra.mxu2 %vm71_vm1, %v576_v61  ;;  %v1488_v60 = vld [vmem:[%s1994_s0 + $0x10] sm:$0xf] }
 0x6ee   :  { %v662_v4 = vld [vmem:[#allocation5] sm:$0xf] }
 0x6f4   :  { %v628_v39 = vpop.permute.xlu2 %627 }
 0x6fe   :  { %v564_v62 = vpop.permute.xlu0 %563 }
 0x6ff   :  { %566 = vst.msk [vmem:[#allocation4] sm:$0xf] %vm59_vm0, %v564_v62 }
 0x700   :  { %1479 = vst.msk [vmem:[%s1997_s5 + $0x14] sm:$0xf] %vm59_vm0, %v564_v62 }
 0x706   :  { %v661_v63 = vld [vmem:[#allocation4] sm:$0xf] }
 0x707   :  { %1485 = vmatmul.msk.f32.vlgmr.msrb.gmra.mxu3 %vm71_vm1, %v661_v63 }
 0x76a   :  { %v602_v1 = vpop.f32.mrf.mxu2 }
 0x76b   :  { %v605_v2 = vadd.f32 %v1480_v0, %v602_v1  ;;  %v1492_v1 = vld [vmem:[%s1995_s1 + $0xc] sm:$0xf] }
 0x76d   :  { %1570 = vtanh.f32 %v605_v2  ;;  %v1482_v9 = vmul.f32 -1.442695, %v605_v2 }
 0x773   :  { %v1571_v3 = vpop.eup %1570 }
 0x774   :  { %632 = vrot.lane.b32.xlu0 %v1571_v3, %s1652_s14 }
 0x77c   :  { %712 = vrot.lane.b32.xlu0 %v662_v4, %s1651_s9 }
 0x78a   :  { %v687_v6 = vpop.f32.mrf.mxu3 }
 0x78b   :  { %v690_v7 = vadd.f32 %v1484_v5, %v687_v6 }
 0x78d   :  { %1572 = vtanh.f32 %v690_v7  ;;  %v1486_v15 = vmul.f32 -1.442695, %v690_v7 }
 0x78e   :  { %1574 = vpow2.f32 %v1482_v9 }
 0x793   :  { %v1573_v8 = vpop.eup %1572 }
 0x794   :  { %717 = vrot.lane.b32.xlu1 %v1573_v8, %s1652_s14  ;;  %v1575_v10 = vpop.eup %1574 }
 0x795   :  { %v609_v11 = vadd.f32 1.0, %v1575_v10 }
 0x797   :  { %1576 = vrcp.f32 %v609_v11  ;;  %v621_v18 = vand.u32 2147483648, %v609_v11  ;;  %vm615_vm13 = vweird.f32 %v609_v11  ;;  %v619_v19 = vand.u32 2147483647, %v609_v11 }
 0x798   :  { %1578 = vpow2.f32 %v1486_v15 }
 0x799   :  { %v622_v22 = vor.u32 1.1754944e-38, %v621_v18  ;;  %vm620_vm15 = vcmp.eq.f32.partialorder %v619_v19, 8.507059e+37 }
 0x79d   :  { %v1577_v12 = vpop.eup %1576 }
 0x79e   :  { %v611_v13 = vmul.f32 %v1577_v12, %v609_v11  ;;  %vm616_vm12 = vweird.f32 %v1577_v12  ;;  %v1579_v20 = vpop.eup %1578 }
 0x79f   :  { %vm617_vm14 = vmor %vm615_vm13, %vm616_vm12  ;;  %v694_v23 = vadd.f32 1.0, %v1579_v20 }
 0x7a0   :  { %v612_v14 = vsub.f32 1.0, %v611_v13 }
 0x7a1   :  { %1580 = vrcp.f32 %v694_v23  ;;  %v706_v32 = vand.u32 2147483648, %v694_v23  ;;  %vm700_vm3 = vweird.f32 %v694_v23  ;;  %v704_v33 = vand.u32 2147483647, %v694_v23 }
 0x7a2   :  { %v613_v16 = vmul.f32 %v1577_v12, %v612_v14 }
 0x7a3   :  { %v707_v35 = vor.u32 1.1754944e-38, %v706_v32  ;;  %vm705_vm5 = vcmp.eq.f32.partialorder %v704_v33, 8.507059e+37 }
 0x7a4   :  { %v614_v17 = vadd.f32 %v1577_v12, %v613_v16 }
 0x7a6   :  { %v618_v21 = vsel %vm617_vm14, %v1577_v12, %v614_v17 }
 0x7a7   :  { %v623_v24 = vsel %vm620_vm15, %v622_v22, %v618_v21  ;;  %v1581_v27 = vpop.eup %1580 }
 0x7a8   :  { %v696_v28 = vmul.f32 %v1581_v27, %v694_v23  ;;  %vm701_vm2 = vweird.f32 %v1581_v27  ;;  %v630_v40 = vmul.f32 %v628_v39, %v623_v24 }
 0x7a9   :  { %vm702_vm4 = vmor %vm700_vm3, %vm701_vm2 }
 0x7aa   :  { %v697_v29 = vsub.f32 1.0, %v696_v28 }
 0x7ac   :  { %v698_v30 = vmul.f32 %v1581_v27, %v697_v29 }
 0x7ae   :  { %v699_v31 = vadd.f32 %v1581_v27, %v698_v30 }
 0x7b0   :  { %v703_v34 = vsel %vm702_vm4, %v1581_v27, %v699_v31 }
 0x7b1   :  { %v708_v36 = vsel %vm705_vm5, %v707_v35, %v703_v34 }
 0x7e6   :  { %v633_v25 = vpop.permute.xlu0 %632 }
 0x7e7   :  { %v635_v26 = vmul.f32 %v633_v25, %v623_v24 }
 0x7e9   :  { %637 = vrot.lane.b32.xlu1 %v635_v26, %s1651_s9 }
 0x7ee   :  { %v713_v43 = vpop.permute.xlu0 %712 }
 0x7ef   :  { %v715_v44 = vmul.f32 %v713_v43, %v708_v36 }
 0x806   :  { %v718_v37 = vpop.permute.xlu1 %717 }
 0x807   :  { %v720_v38 = vmul.f32 %v718_v37, %v708_v36 }
 0x809   :  { %722 = vrot.lane.b32.xlu2 %v720_v38, %s1651_s9 }
 0x85b   :  { %v638_v41 = vpop.permute.xlu1 %637 }
 0x85c   :  { %v640_v42 = vadd.f32 %v638_v41, %v630_v40 }
 0x85e   :  { %1582 = vtanh.f32 %v640_v42 }
 0x863   :  { %v723_v45 = vpop.permute.xlu2 %722 }
 0x864   :  { %v1583_v46 = vpop.eup %1582  ;;  %v725_v47 = vadd.f32 %v723_v45, %v715_v44 }
 0x865   :  { %643 = vrot.lane.b32.xlu0 %v1583_v46, %s1652_s14 }
 0x866   :  { %1584 = vtanh.f32 %v725_v47 }
 0x86c   :  { %v1585_v48 = vpop.eup %1584 }
 0x86d   :  { %728 = vrot.lane.b32.xlu1 %v1585_v48, %s1652_s14 }
 0x875   :  { %653 = vrot.lane.b32.xlu1 %v640_v42, %s1653_s15 }
 0x8d7   :  { %v644_v49 = vpop.permute.xlu0 %643 }
 0x8d8   :  { %v646_v50 = vmul.f32 %v644_v49, %v623_v24 }
 0x8da   :  { %648 = vrot.lane.b32.xlu2 %v646_v50, %s1651_s9 }
 0x8df   :  { %v729_v51 = vpop.permute.xlu1 %728 }
 0x8e0   :  { %v731_v52 = vmul.f32 %v729_v51, %v708_v36  ;;  %v921_v51 = vld [vmem:[%s1992_s2 + $0x18] sm:$0xff] }
 0x8e1   :  { %937 = vmatpush.msra.mxu2 %v921_v51  ;;  %1107 = vmatpush.msrb.mxu0 %v921_v51 }
 0x8e2   :  { %733 = vrot.lane.b32.xlu0 %v731_v52, %s1651_s9  ;;  %738 = vrot.lane.b32.xlu2 %v725_v47, %s1653_s15  ;;  %v920_v52 = vld [vmem:[%s1992_s2 + $0x10] sm:$0xff] }
 0x8e3   :  { %938 = vmatpush.msra.mxu2 %v920_v52  ;;  %1108 = vmatpush.msrb.mxu0 %v920_v52 }
 0x8e7   :  { %v654_v53 = vpop.permute.xlu1 %653 }
 0x8e8   :  { %656 = vst.msk [vmem:[#allocation3] sm:$0xf] %vm59_vm0, %v654_v53  ;;  %v919_v53 = vld [vmem:[%s1992_s2 + $0x8] sm:$0xff] }
 0x8e9   :  { %939 = vmatpush.msra.mxu2 %v919_v53  ;;  %1109 = vmatpush.msrb.mxu0 %v919_v53 }
 0x8ef   :  { %v747_v54 = vld [vmem:[#allocation3] sm:$0xf] }
 0x8f0   :  { %797 = vrot.lane.b32.xlu2 %v747_v54, %s1651_s9  ;;  %v918_v54 = vld [vmem:[%s1992_s2] sm:$0xff] }
 0x8f1   :  { %940 = vmatpush.msra.mxu2 %v918_v54  ;;  %1110 = vmatpush.msrb.mxu0 %v918_v54 }
 0x8f3   :  { %1277 = vmatpush.msrb.mxu2 %v921_v51 }
 0x8f5   :  { %1278 = vmatpush.msrb.mxu2 %v920_v52 }
 0x8f7   :  { %1279 = vmatpush.msrb.mxu2 %v919_v53 }
 0x8f9   :  { %1280 = vmatpush.msrb.mxu2 %v918_v54 }
 0x934   :  { %v649_v55 = vpop.permute.xlu2 %648 }
 0x935   :  { %651 = vst.msk [vmem:[#allocation2] sm:$0xf] %vm59_vm0, %v649_v55 }
 0x936   :  { %1483 = vst.msk [vmem:[%s1996_s4 + $0xc] sm:$0xf] %vm59_vm0, %v649_v55 }
 0x93c   :  { %v739_v56 = vpop.permute.xlu2 %738  ;;  %v746_v57 = vld [vmem:[#allocation2] sm:$0xf] }
 0x93d   :  { %741 = vst.msk [vmem:[#allocation5] sm:$0xf] %vm59_vm0, %v739_v56  ;;  %1489 = vmatmul.msk.f32.vlgmr.msra.gmra.mxu0 %vm71_vm1, %v746_v57  ;;  %v1006_v56 = vld [vmem:[%s1993_s3 + $0x18] sm:$0xff]  ;;  %v1005_v57 = vld [vmem:[%s1993_s3 + $0x10] sm:$0xff] }
 0x93e   :  { %1022 = vmatpush.msra.mxu3 %v1006_v56  ;;  %1192 = vmatpush.msrb.mxu1 %v1006_v56 }
 0x940   :  { %1023 = vmatpush.msra.mxu3 %v1005_v57  ;;  %1193 = vmatpush.msrb.mxu1 %v1005_v57 }
 0x944   :  { %v832_v0 = vld [vmem:[#allocation5] sm:$0xf] }
 0x94a   :  { %v798_v35 = vpop.permute.xlu2 %797 }
 0x954   :  { %v734_v58 = vpop.permute.xlu0 %733 }
 0x955   :  { %736 = vst.msk [vmem:[#allocation4] sm:$0xf] %vm59_vm0, %v734_v58 }
 0x956   :  { %1487 = vst.msk [vmem:[%s1997_s5 + $0x10] sm:$0xf] %vm59_vm0, %v734_v58  ;;  %v1004_v58 = vld [vmem:[%s1993_s3 + $0x8] sm:$0xff] }
 0x957   :  { %1024 = vmatpush.msra.mxu3 %v1004_v58  ;;  %1194 = vmatpush.msrb.mxu1 %v1004_v58 }
 0x95c   :  { %v831_v59 = vld [vmem:[#allocation4] sm:$0xf] }
 0x95d   :  { %1493 = vmatmul.msk.f32.vlgmr.msra.gmra.mxu1 %vm71_vm1, %v831_v59  ;;  %v1003_v59 = vld [vmem:[%s1993_s3] sm:$0xff] }
 0x95e   :  { %1025 = vmatpush.msra.mxu3 %v1003_v59  ;;  %1195 = vmatpush.msrb.mxu1 %v1003_v59 }
 0x960   :  { %1361 = vmatpush.msrb.mxu3 %v1006_v56 }
 0x962   :  { %1362 = vmatpush.msrb.mxu3 %v1005_v57 }
 0x964   :  { %1363 = vmatpush.msrb.mxu3 %v1004_v58 }
 0x966   :  { %1364 = vmatpush.msrb.mxu3 %v1003_v59 }
 0x9ba   :  { %v772_v61 = vpop.f32.mrf.mxu0 }
 0x9bb   :  { %v775_v62 = vadd.f32 %v1488_v60, %v772_v61 }
 0x9bd   :  { %1586 = vtanh.f32 %v775_v62  ;;  %v1490_v5 = vmul.f32 -1.442695, %v775_v62 }
 0x9c3   :  { %v1587_v63 = vpop.eup %1586 }
 0x9c4   :  { %802 = vrot.lane.b32.xlu0 %v1587_v63, %s1652_s14 }
 0x9cc   :  { %882 = vrot.lane.b32.xlu0 %v832_v0, %s1651_s9  ;;  %v1496_v0 = vld [vmem:[%s1994_s0 + $0x14] sm:$0xf] }
 0x9da   :  { %v857_v2 = vpop.f32.mrf.mxu1 }
 0x9db   :  { %v860_v3 = vadd.f32 %v1492_v1, %v857_v2 }
 0x9dd   :  { %1588 = vtanh.f32 %v860_v3  ;;  %v1494_v11 = vmul.f32 -1.442695, %v860_v3 }
 0x9de   :  { %1590 = vpow2.f32 %v1490_v5  ;;  %v1500_v5 = vld [vmem:[%s1995_s1 + $0x8] sm:$0xf] }
 0x9e3   :  { %v1589_v4 = vpop.eup %1588 }
 0x9e4   :  { %887 = vrot.lane.b32.xlu1 %v1589_v4, %s1652_s14  ;;  %v1591_v6 = vpop.eup %1590 }
 0x9e5   :  { %v779_v7 = vadd.f32 1.0, %v1591_v6 }
 0x9e7   :  { %1592 = vrcp.f32 %v779_v7  ;;  %v791_v14 = vand.u32 2147483648, %v779_v7  ;;  %vm785_vm7 = vweird.f32 %v779_v7  ;;  %v789_v15 = vand.u32 2147483647, %v779_v7 }
 0x9e8   :  { %1594 = vpow2.f32 %v1494_v11 }
 0x9e9   :  { %v792_v18 = vor.u32 1.1754944e-38, %v791_v14  ;;  %vm790_vm9 = vcmp.eq.f32.partialorder %v789_v15, 8.507059e+37 }
 0x9ed   :  { %v1593_v8 = vpop.eup %1592 }
 0x9ee   :  { %v781_v9 = vmul.f32 %v1593_v8, %v779_v7  ;;  %vm786_vm6 = vweird.f32 %v1593_v8  ;;  %v1595_v16 = vpop.eup %1594 }
 0x9ef   :  { %vm787_vm8 = vmor %vm785_vm7, %vm786_vm6  ;;  %v864_v19 = vadd.f32 1.0, %v1595_v16 }
 0x9f0   :  { %v782_v10 = vsub.f32 1.0, %v781_v9 }
 0x9f1   :  { %1596 = vrcp.f32 %v864_v19  ;;  %v876_v28 = vand.u32 2147483648, %v864_v19  ;;  %vm870_vm11 = vweird.f32 %v864_v19  ;;  %v874_v29 = vand.u32 2147483647, %v864_v19 }
 0x9f2   :  { %v783_v12 = vmul.f32 %v1593_v8, %v782_v10 }
 0x9f3   :  { %v877_v31 = vor.u32 1.1754944e-38, %v876_v28  ;;  %vm875_vm13 = vcmp.eq.f32.partialorder %v874_v29, 8.507059e+37 }
 0x9f4   :  { %v784_v13 = vadd.f32 %v1593_v8, %v783_v12 }
 0x9f6   :  { %v788_v17 = vsel %vm787_vm8, %v1593_v8, %v784_v13 }
 0x9f7   :  { %v793_v20 = vsel %vm790_vm9, %v792_v18, %v788_v17  ;;  %v1597_v23 = vpop.eup %1596 }
 0x9f8   :  { %v866_v24 = vmul.f32 %v1597_v23, %v864_v19  ;;  %vm871_vm10 = vweird.f32 %v1597_v23  ;;  %v800_v36 = vmul.f32 %v798_v35, %v793_v20 }
 0x9f9   :  { %vm872_vm12 = vmor %vm870_vm11, %vm871_vm10 }
 0x9fa   :  { %v867_v25 = vsub.f32 1.0, %v866_v24 }
 0x9fc   :  { %v868_v26 = vmul.f32 %v1597_v23, %v867_v25 }
 0x9fe   :  { %v869_v27 = vadd.f32 %v1597_v23, %v868_v26 }
 0xa00   :  { %v873_v30 = vsel %vm872_vm12, %v1597_v23, %v869_v27 }
 0xa01   :  { %v878_v32 = vsel %vm875_vm13, %v877_v31, %v873_v30 }
 0xa36   :  { %v803_v21 = vpop.permute.xlu0 %802 }
 0xa37   :  { %v805_v22 = vmul.f32 %v803_v21, %v793_v20 }
 0xa39   :  { %807 = vrot.lane.b32.xlu1 %v805_v22, %s1651_s9 }
 0xa3e   :  { %v883_v39 = vpop.permute.xlu0 %882 }
 0xa3f   :  { %v885_v40 = vmul.f32 %v883_v39, %v878_v32 }
 0xa56   :  { %v888_v33 = vpop.permute.xlu1 %887 }
 0xa57   :  { %v890_v34 = vmul.f32 %v888_v33, %v878_v32 }
 0xa59   :  { %892 = vrot.lane.b32.xlu2 %v890_v34, %s1651_s9 }
 0xaab   :  { %v808_v37 = vpop.permute.xlu1 %807 }
 0xaac   :  { %v810_v38 = vadd.f32 %v808_v37, %v800_v36 }
 0xaae   :  { %1598 = vtanh.f32 %v810_v38 }
 0xab3   :  { %v893_v41 = vpop.permute.xlu2 %892 }
 0xab4   :  { %v1599_v42 = vpop.eup %1598  ;;  %v895_v43 = vadd.f32 %v893_v41, %v885_v40 }
 0xab5   :  { %813 = vrot.lane.b32.xlu0 %v1599_v42, %s1652_s14 }
 0xab6   :  { %1600 = vtanh.f32 %v895_v43 }
 0xabc   :  { %v1601_v44 = vpop.eup %1600 }
 0xabd   :  { %898 = vrot.lane.b32.xlu1 %v1601_v44, %s1652_s14 }
 0xac5   :  { %823 = vrot.lane.b32.xlu1 %v810_v38, %s1653_s15 }
 0xb27   :  { %v814_v45 = vpop.permute.xlu0 %813 }
 0xb28   :  { %v816_v46 = vmul.f32 %v814_v45, %v793_v20 }
 0xb2a   :  { %818 = vrot.lane.b32.xlu2 %v816_v46, %s1651_s9 }
 0xb2f   :  { %v899_v47 = vpop.permute.xlu1 %898 }
 0xb30   :  { %v901_v48 = vmul.f32 %v899_v47, %v878_v32 }
 0xb32   :  { %903 = vrot.lane.b32.xlu0 %v901_v48, %s1651_s9  ;;  %908 = vrot.lane.b32.xlu2 %v895_v43, %s1653_s15 }
 0xb37   :  { %v824_v49 = vpop.permute.xlu1 %823 }
 0xb38   :  { %826 = vst.msk [vmem:[#allocation3] sm:$0xf] %vm59_vm0, %v824_v49 }
 0xb3f   :  { %v917_v50 = vld [vmem:[#allocation3] sm:$0xf] }
 0xb40   :  { %967 = vrot.lane.b32.xlu2 %v917_v50, %s1651_s9 }
 0xb84   :  { %v819_v55 = vpop.permute.xlu2 %818 }
 0xb85   :  { %821 = vst.msk [vmem:[#allocation2] sm:$0xf] %vm59_vm0, %v819_v55 }
 0xb86   :  { %1491 = vst.msk [vmem:[%s1996_s4 + $0x10] sm:$0xf] %vm59_vm0, %v819_v55 }
 0xb8c   :  { %v909_v60 = vpop.permute.xlu2 %908  ;;  %v916_v61 = vld [vmem:[#allocation2] sm:$0xf] }
 0xb8d   :  { %911 = vst.msk [vmem:[#allocation5] sm:$0xf] %vm59_vm0, %v909_v60  ;;  %1497 = vmatmul.msk.f32.vlgmr.msra.gmra.mxu2 %vm71_vm1, %v916_v61  ;;  %v1504_v60 = vld [vmem:[%s1994_s0 + $0x18] sm:$0xf] }
 0xb94   :  { %v1002_v4 = vld [vmem:[#allocation5] sm:$0xf] }
 0xb9a   :  { %v968_v39 = vpop.permute.xlu2 %967 }
 0xba4   :  { %v904_v62 = vpop.permute.xlu0 %903 }
 0xba5   :  { %906 = vst.msk [vmem:[#allocation4] sm:$0xf] %vm59_vm0, %v904_v62 }
 0xba6   :  { %1495 = vst.msk [vmem:[%s1997_s5 + $0xc] sm:$0xf] %vm59_vm0, %v904_v62 }
 0xbac   :  { %v1001_v63 = vld [vmem:[#allocation4] sm:$0xf] }
 0xbad   :  { %1501 = vmatmul.msk.f32.vlgmr.msra.gmra.mxu3 %vm71_vm1, %v1001_v63 }
 0xc10   :  { %v942_v1 = vpop.f32.mrf.mxu2 }
 0xc11   :  { %v945_v2 = vadd.f32 %v1496_v0, %v942_v1  ;;  %v1508_v1 = vld [vmem:[%s1995_s1 + $0x4] sm:$0xf] }
 0xc13   :  { %1602 = vtanh.f32 %v945_v2  ;;  %v1498_v9 = vmul.f32 -1.442695, %v945_v2 }
 0xc19   :  { %v1603_v3 = vpop.eup %1602 }
 0xc1a   :  { %972 = vrot.lane.b32.xlu0 %v1603_v3, %s1652_s14 }
 0xc22   :  { %1052 = vrot.lane.b32.xlu0 %v1002_v4, %s1651_s9 }
 0xc30   :  { %v1027_v6 = vpop.f32.mrf.mxu3 }
 0xc31   :  { %v1030_v7 = vadd.f32 %v1500_v5, %v1027_v6 }
 0xc33   :  { %1604 = vtanh.f32 %v1030_v7  ;;  %v1502_v15 = vmul.f32 -1.442695, %v1030_v7 }
 0xc34   :  { %1606 = vpow2.f32 %v1498_v9 }
 0xc39   :  { %v1605_v8 = vpop.eup %1604 }
 0xc3a   :  { %1057 = vrot.lane.b32.xlu1 %v1605_v8, %s1652_s14  ;;  %v1607_v10 = vpop.eup %1606 }
 0xc3b   :  { %v949_v11 = vadd.f32 1.0, %v1607_v10 }
 0xc3d   :  { %1608 = vrcp.f32 %v949_v11  ;;  %v961_v18 = vand.u32 2147483648, %v949_v11  ;;  %vm955_vm15 = vweird.f32 %v949_v11  ;;  %v959_v19 = vand.u32 2147483647, %v949_v11 }
 0xc3e   :  { %1610 = vpow2.f32 %v1502_v15 }
 0xc3f   :  { %v962_v22 = vor.u32 1.1754944e-38, %v961_v18  ;;  %vm960_vm3 = vcmp.eq.f32.partialorder %v959_v19, 8.507059e+37 }
 0xc43   :  { %v1609_v12 = vpop.eup %1608 }
 0xc44   :  { %v951_v13 = vmul.f32 %v1609_v12, %v949_v11  ;;  %vm956_vm14 = vweird.f32 %v1609_v12  ;;  %v1611_v20 = vpop.eup %1610 }
 0xc45   :  { %vm957_vm2 = vmor %vm955_vm15, %vm956_vm14  ;;  %v1034_v23 = vadd.f32 1.0, %v1611_v20 }
 0xc46   :  { %v952_v14 = vsub.f32 1.0, %v951_v13 }
 0xc47   :  { %1612 = vrcp.f32 %v1034_v23  ;;  %v1046_v32 = vand.u32 2147483648, %v1034_v23  ;;  %vm1040_vm5 = vweird.f32 %v1034_v23  ;;  %v1044_v33 = vand.u32 2147483647, %v1034_v23 }
 0xc48   :  { %v953_v16 = vmul.f32 %v1609_v12, %v952_v14 }
 0xc49   :  { %v1047_v35 = vor.u32 1.1754944e-38, %v1046_v32  ;;  %vm1045_vm7 = vcmp.eq.f32.partialorder %v1044_v33, 8.507059e+37 }
 0xc4a   :  { %v954_v17 = vadd.f32 %v1609_v12, %v953_v16 }
 0xc4c   :  { %v958_v21 = vsel %vm957_vm2, %v1609_v12, %v954_v17 }
 0xc4d   :  { %v963_v24 = vsel %vm960_vm3, %v962_v22, %v958_v21  ;;  %v1613_v27 = vpop.eup %1612 }
 0xc4e   :  { %v1036_v28 = vmul.f32 %v1613_v27, %v1034_v23  ;;  %vm1041_vm4 = vweird.f32 %v1613_v27  ;;  %v970_v40 = vmul.f32 %v968_v39, %v963_v24 }
 0xc4f   :  { %vm1042_vm6 = vmor %vm1040_vm5, %vm1041_vm4 }
 0xc50   :  { %v1037_v29 = vsub.f32 1.0, %v1036_v28 }
 0xc52   :  { %v1038_v30 = vmul.f32 %v1613_v27, %v1037_v29 }
 0xc54   :  { %v1039_v31 = vadd.f32 %v1613_v27, %v1038_v30 }
 0xc56   :  { %v1043_v34 = vsel %vm1042_vm6, %v1613_v27, %v1039_v31 }
 0xc57   :  { %v1048_v36 = vsel %vm1045_vm7, %v1047_v35, %v1043_v34 }
 0xc8c   :  { %v973_v25 = vpop.permute.xlu0 %972 }
 0xc8d   :  { %v975_v26 = vmul.f32 %v973_v25, %v963_v24 }
 0xc8f   :  { %977 = vrot.lane.b32.xlu1 %v975_v26, %s1651_s9 }
 0xc94   :  { %v1053_v43 = vpop.permute.xlu0 %1052 }
 0xc95   :  { %v1055_v44 = vmul.f32 %v1053_v43, %v1048_v36 }
 0xcac   :  { %v1058_v37 = vpop.permute.xlu1 %1057 }
 0xcad   :  { %v1060_v38 = vmul.f32 %v1058_v37, %v1048_v36 }
 0xcaf   :  { %1062 = vrot.lane.b32.xlu2 %v1060_v38, %s1651_s9 }
 0xd01   :  { %v978_v41 = vpop.permute.xlu1 %977 }
 0xd02   :  { %v980_v42 = vadd.f32 %v978_v41, %v970_v40 }
 0xd04   :  { %1614 = vtanh.f32 %v980_v42 }
 0xd09   :  { %v1063_v45 = vpop.permute.xlu2 %1062 }
 0xd0a   :  { %v1615_v46 = vpop.eup %1614  ;;  %v1065_v47 = vadd.f32 %v1063_v45, %v1055_v44 }
 0xd0b   :  { %983 = vrot.lane.b32.xlu0 %v1615_v46, %s1652_s14 }
 0xd0c   :  { %1616 = vtanh.f32 %v1065_v47 }
 0xd12   :  { %v1617_v48 = vpop.eup %1616 }
 0xd13   :  { %1068 = vrot.lane.b32.xlu1 %v1617_v48, %s1652_s14 }
 0xd1b   :  { %993 = vrot.lane.b32.xlu1 %v980_v42, %s1653_s15 }
 0xd7d   :  { %v984_v49 = vpop.permute.xlu0 %983 }
 0xd7e   :  { %v986_v50 = vmul.f32 %v984_v49, %v963_v24 }
 0xd80   :  { %988 = vrot.lane.b32.xlu2 %v986_v50, %s1651_s9 }
 0xd85   :  { %v1069_v51 = vpop.permute.xlu1 %1068 }
 0xd86   :  { %v1071_v52 = vmul.f32 %v1069_v51, %v1048_v36 }
 0xd88   :  { %1073 = vrot.lane.b32.xlu0 %v1071_v52, %s1651_s9  ;;  %1078 = vrot.lane.b32.xlu2 %v1065_v47, %s1653_s15 }
 0xd8d   :  { %v994_v53 = vpop.permute.xlu1 %993 }
 0xd8e   :  { %996 = vst.msk [vmem:[#allocation3] sm:$0xf] %vm59_vm0, %v994_v53 }
 0xd95   :  { %v1087_v54 = vld [vmem:[#allocation3] sm:$0xf] }
 0xd96   :  { %1137 = vrot.lane.b32.xlu2 %v1087_v54, %s1651_s9 }
 0xdda   :  { %v989_v55 = vpop.permute.xlu2 %988 }
 0xddb   :  { %991 = vst.msk [vmem:[#allocation2] sm:$0xf] %vm59_vm0, %v989_v55 }
 0xddc   :  { %1499 = vst.msk [vmem:[%s1996_s4 + $0x14] sm:$0xf] %vm59_vm0, %v989_v55 }
 0xde2   :  { %v1079_v56 = vpop.permute.xlu2 %1078  ;;  %v1086_v57 = vld [vmem:[#allocation2] sm:$0xf] }
 0xde3   :  { %1081 = vst.msk [vmem:[#allocation5] sm:$0xf] %vm59_vm0, %v1079_v56  ;;  %1505 = vmatmul.msk.f32.vlgmr.msrb.gmra.mxu0 %vm71_vm1, %v1086_v57  ;;  %v1512_v56 = vld [vmem:[%s1994_s0 + $0x1c] sm:$0xf] }
 0xdea   :  { %v1172_v0 = vld [vmem:[#allocation5] sm:$0xf] }
 0xdf0   :  { %v1138_v35 = vpop.permute.xlu2 %1137 }
 0xdfa   :  { %v1074_v58 = vpop.permute.xlu0 %1073 }
 0xdfb   :  { %1076 = vst.msk [vmem:[#allocation4] sm:$0xf] %vm59_vm0, %v1074_v58 }
 0xdfc   :  { %1503 = vst.msk [vmem:[%s1997_s5 + $0x8] sm:$0xf] %vm59_vm0, %v1074_v58 }
 0xe02   :  { %v1171_v59 = vld [vmem:[#allocation4] sm:$0xf] }
 0xe03   :  { %1509 = vmatmul.msk.f32.vlgmr.msrb.gmra.mxu1 %vm71_vm1, %v1171_v59 }
 0xe60   :  { %v1112_v61 = vpop.f32.mrf.mxu0 }
 0xe61   :  { %v1115_v62 = vadd.f32 %v1504_v60, %v1112_v61  ;;  %v1339_v61 = vld [vmem:[%s1995_s1] sm:$0xf] }
 0xe63   :  { %1618 = vtanh.f32 %v1115_v62  ;;  %v1506_v5 = vmul.f32 -1.442695, %v1115_v62 }
 0xe69   :  { %v1619_v63 = vpop.eup %1618 }
 0xe6a   :  { %1142 = vrot.lane.b32.xlu0 %v1619_v63, %s1652_s14 }
 0xe72   :  { %1222 = vrot.lane.b32.xlu0 %v1172_v0, %s1651_s9 }
 0xe80   :  { %v1197_v2 = vpop.f32.mrf.mxu1 }
 0xe81   :  { %v1200_v3 = vadd.f32 %v1508_v1, %v1197_v2 }
 0xe83   :  { %1620 = vtanh.f32 %v1200_v3  ;;  %v1510_v11 = vmul.f32 -1.442695, %v1200_v3 }
 0xe84   :  { %1622 = vpow2.f32 %v1506_v5 }
 0xe89   :  { %v1621_v4 = vpop.eup %1620 }
 0xe8a   :  { %1227 = vrot.lane.b32.xlu1 %v1621_v4, %s1652_s14  ;;  %v1623_v6 = vpop.eup %1622 }
 0xe8b   :  { %v1119_v7 = vadd.f32 1.0, %v1623_v6 }
 0xe8d   :  { %1624 = vrcp.f32 %v1119_v7  ;;  %v1131_v14 = vand.u32 2147483648, %v1119_v7  ;;  %vm1125_vm9 = vweird.f32 %v1119_v7  ;;  %v1129_v15 = vand.u32 2147483647, %v1119_v7 }
 0xe8e   :  { %1626 = vpow2.f32 %v1510_v11 }
 0xe8f   :  { %v1132_v18 = vor.u32 1.1754944e-38, %v1131_v14  ;;  %vm1130_vm11 = vcmp.eq.f32.partialorder %v1129_v15, 8.507059e+37 }
 0xe93   :  { %v1625_v8 = vpop.eup %1624 }
 0xe94   :  { %v1121_v9 = vmul.f32 %v1625_v8, %v1119_v7  ;;  %vm1126_vm8 = vweird.f32 %v1625_v8  ;;  %v1627_v16 = vpop.eup %1626 }
 0xe95   :  { %vm1127_vm10 = vmor %vm1125_vm9, %vm1126_vm8  ;;  %v1204_v19 = vadd.f32 1.0, %v1627_v16 }
 0xe96   :  { %v1122_v10 = vsub.f32 1.0, %v1121_v9 }
 0xe97   :  { %1628 = vrcp.f32 %v1204_v19  ;;  %v1216_v28 = vand.u32 2147483648, %v1204_v19  ;;  %vm1210_vm13 = vweird.f32 %v1204_v19  ;;  %v1214_v29 = vand.u32 2147483647, %v1204_v19 }
 0xe98   :  { %v1123_v12 = vmul.f32 %v1625_v8, %v1122_v10 }
 0xe99   :  { %v1217_v31 = vor.u32 1.1754944e-38, %v1216_v28  ;;  %vm1215_vm15 = vcmp.eq.f32.partialorder %v1214_v29, 8.507059e+37 }
 0xe9a   :  { %v1124_v13 = vadd.f32 %v1625_v8, %v1123_v12 }
 0xe9c   :  { %v1128_v17 = vsel %vm1127_vm10, %v1625_v8, %v1124_v13 }
 0xe9d   :  { %v1133_v20 = vsel %vm1130_vm11, %v1132_v18, %v1128_v17  ;;  %v1629_v23 = vpop.eup %1628 }
 0xe9e   :  { %v1206_v24 = vmul.f32 %v1629_v23, %v1204_v19  ;;  %vm1211_vm12 = vweird.f32 %v1629_v23  ;;  %v1140_v36 = vmul.f32 %v1138_v35, %v1133_v20 }
 0xe9f   :  { %vm1212_vm14 = vmor %vm1210_vm13, %vm1211_vm12 }
 0xea0   :  { %v1207_v25 = vsub.f32 1.0, %v1206_v24 }
 0xea2   :  { %v1208_v26 = vmul.f32 %v1629_v23, %v1207_v25 }
 0xea4   :  { %v1209_v27 = vadd.f32 %v1629_v23, %v1208_v26 }
 0xea6   :  { %v1213_v30 = vsel %vm1212_vm14, %v1629_v23, %v1209_v27 }
 0xea7   :  { %v1218_v32 = vsel %vm1215_vm15, %v1217_v31, %v1213_v30 }
 0xedc   :  { %v1143_v21 = vpop.permute.xlu0 %1142 }
 0xedd   :  { %v1145_v22 = vmul.f32 %v1143_v21, %v1133_v20 }
 0xedf   :  { %1147 = vrot.lane.b32.xlu1 %v1145_v22, %s1651_s9 }
 0xee4   :  { %v1223_v39 = vpop.permute.xlu0 %1222 }
 0xee5   :  { %v1225_v40 = vmul.f32 %v1223_v39, %v1218_v32 }
 0xefc   :  { %v1228_v33 = vpop.permute.xlu1 %1227 }
 0xefd   :  { %v1230_v34 = vmul.f32 %v1228_v33, %v1218_v32 }
 0xeff   :  { %1232 = vrot.lane.b32.xlu2 %v1230_v34, %s1651_s9 }
 0xf51   :  { %v1148_v37 = vpop.permute.xlu1 %1147 }
 0xf52   :  { %v1150_v38 = vadd.f32 %v1148_v37, %v1140_v36 }
 0xf54   :  { %1630 = vtanh.f32 %v1150_v38 }
 0xf59   :  { %v1233_v41 = vpop.permute.xlu2 %1232 }
 0xf5a   :  { %v1631_v42 = vpop.eup %1630  ;;  %v1235_v43 = vadd.f32 %v1233_v41, %v1225_v40 }
 0xf5b   :  { %1153 = vrot.lane.b32.xlu0 %v1631_v42, %s1652_s14 }
 0xf5c   :  { %1632 = vtanh.f32 %v1235_v43 }
 0xf62   :  { %v1633_v44 = vpop.eup %1632 }
 0xf63   :  { %1238 = vrot.lane.b32.xlu1 %v1633_v44, %s1652_s14 }
 0xf6b   :  { %1163 = vrot.lane.b32.xlu1 %v1150_v38, %s1653_s15 }
 0xfcd   :  { %v1154_v45 = vpop.permute.xlu0 %1153 }
 0xfce   :  { %v1156_v46 = vmul.f32 %v1154_v45, %v1133_v20 }
 0xfd0   :  { %1158 = vrot.lane.b32.xlu2 %v1156_v46, %s1651_s9 }
 0xfd5   :  { %v1239_v47 = vpop.permute.xlu1 %1238 }
 0xfd6   :  { %v1241_v48 = vmul.f32 %v1239_v47, %v1218_v32 }
 0xfd8   :  { %1243 = vrot.lane.b32.xlu0 %v1241_v48, %s1651_s9  ;;  %1248 = vrot.lane.b32.xlu2 %v1235_v43, %s1653_s15 }
 0xfdd   :  { %v1164_v49 = vpop.permute.xlu1 %1163 }
 0xfde   :  { %1166 = vst.msk [vmem:[#allocation3] sm:$0xf] %vm59_vm0, %v1164_v49 }
 0xfe5   :  { %v1257_v50 = vld [vmem:[#allocation3] sm:$0xf] }
 0xfe6   :  { %1307 = vrot.lane.b32.xlu2 %v1257_v50, %s1651_s9 }
0x102a   :  { %v1159_v51 = vpop.permute.xlu2 %1158 }
0x102b   :  { %1161 = vst.msk [vmem:[#allocation2] sm:$0xf] %vm59_vm0, %v1159_v51 }
0x102c   :  { %1507 = vst.msk [vmem:[%s1996_s4 + $0x18] sm:$0xf] %vm59_vm0, %v1159_v51 }
0x1032   :  { %v1249_v52 = vpop.permute.xlu2 %1248  ;;  %v1256_v53 = vld [vmem:[#allocation2] sm:$0xf] }
0x1033   :  { %1251 = vst.msk [vmem:[#allocation5] sm:$0xf] %vm59_vm0, %v1249_v52  ;;  %1513 = vmatmul.msk.f32.vlgmr.msrb.gmra.mxu2 %vm71_vm1, %v1256_v53 }
0x103a   :  { %v1341_v60 = vld [vmem:[#allocation5] sm:$0xf] }
0x1040   :  { %v1308_v31 = vpop.permute.xlu2 %1307 }
0x104a   :  { %v1244_v54 = vpop.permute.xlu0 %1243 }
0x104b   :  { %1246 = vst.msk [vmem:[#allocation4] sm:$0xf] %vm59_vm0, %v1244_v54 }
0x104c   :  { %1511 = vst.msk [vmem:[%s1997_s5 + $0x4] sm:$0xf] %vm59_vm0, %v1244_v54 }
0x1052   :  { %v1340_v55 = vld [vmem:[#allocation4] sm:$0xf] }
0x1053   :  { %1516 = vmatmul.msk.f32.vlgmr.msrb.gmra.mxu3 %vm71_vm1, %v1340_v55 }
0x10b6   :  { %v1282_v57 = vpop.f32.mrf.mxu2 }
0x10b7   :  { %v1285_v58 = vadd.f32 %v1512_v56, %v1282_v57 }
0x10b9   :  { %1634 = vtanh.f32 %v1285_v58  ;;  %v1514_v1 = vmul.f32 -1.442695, %v1285_v58 }
0x10bf   :  { %v1635_v59 = vpop.eup %1634 }
0x10c0   :  { %1312 = vrot.lane.b32.xlu0 %v1635_v59, %s1652_s14 }
0x10c8   :  { %1391 = vrot.lane.b32.xlu0 %v1341_v60, %s1651_s9 }
0x10d6   :  { %v1366_v62 = vpop.f32.mrf.mxu3 }
0x10d7   :  { %v1369_v63 = vadd.f32 %v1366_v62, %v1339_v61 }
0x10d9   :  { %1636 = vtanh.f32 %v1369_v63  ;;  %v1517_v7 = vmul.f32 -1.442695, %v1369_v63 }
0x10da   :  { %1638 = vpow2.f32 %v1514_v1 }
0x10df   :  { %v1637_v0 = vpop.eup %1636 }
0x10e0   :  { %1396 = vrot.lane.b32.xlu1 %v1637_v0, %s1652_s14  ;;  %v1639_v2 = vpop.eup %1638 }
0x10e1   :  { %v1289_v3 = vadd.f32 1.0, %v1639_v2 }
0x10e3   :  { %1640 = vrcp.f32 %v1289_v3  ;;  %v1301_v10 = vand.u32 2147483648, %v1289_v3  ;;  %vm1295_vm2 = vweird.f32 %v1289_v3  ;;  %v1299_v11 = vand.u32 2147483647, %v1289_v3 }
0x10e4   :  { %1642 = vpow2.f32 %v1517_v7 }
0x10e5   :  { %v1302_v14 = vor.u32 1.1754944e-38, %v1301_v10  ;;  %vm1300_vm4 = vcmp.eq.f32.partialorder %v1299_v11, 8.507059e+37 }
0x10e9   :  { %v1641_v4 = vpop.eup %1640 }
0x10ea   :  { %v1291_v5 = vmul.f32 %v1641_v4, %v1289_v3  ;;  %vm1296_vm1 = vweird.f32 %v1641_v4  ;;  %v1643_v12 = vpop.eup %1642 }
0x10eb   :  { %vm1297_vm3 = vmor %vm1295_vm2, %vm1296_vm1  ;;  %v1373_v15 = vadd.f32 1.0, %v1643_v12 }
0x10ec   :  { %v1292_v6 = vsub.f32 1.0, %v1291_v5 }
0x10ed   :  { %1644 = vrcp.f32 %v1373_v15  ;;  %v1385_v24 = vand.u32 2147483648, %v1373_v15  ;;  %vm1379_vm6 = vweird.f32 %v1373_v15  ;;  %v1383_v25 = vand.u32 2147483647, %v1373_v15 }
0x10ee   :  { %v1293_v8 = vmul.f32 %v1641_v4, %v1292_v6 }
0x10ef   :  { %v1386_v27 = vor.u32 1.1754944e-38, %v1385_v24  ;;  %vm1384_vm8 = vcmp.eq.f32.partialorder %v1383_v25, 8.507059e+37 }
0x10f0   :  { %v1294_v9 = vadd.f32 %v1641_v4, %v1293_v8 }
0x10f2   :  { %v1298_v13 = vsel %vm1297_vm3, %v1641_v4, %v1294_v9 }
0x10f3   :  { %v1303_v16 = vsel %vm1300_vm4, %v1302_v14, %v1298_v13  ;;  %v1645_v19 = vpop.eup %1644 }
0x10f4   :  { %v1375_v20 = vmul.f32 %v1645_v19, %v1373_v15  ;;  %vm1380_vm5 = vweird.f32 %v1645_v19  ;;  %v1310_v32 = vmul.f32 %v1308_v31, %v1303_v16 }
0x10f5   :  { %vm1381_vm7 = vmor %vm1379_vm6, %vm1380_vm5 }
0x10f6   :  { %v1376_v21 = vsub.f32 1.0, %v1375_v20 }
0x10f8   :  { %v1377_v22 = vmul.f32 %v1645_v19, %v1376_v21 }
0x10fa   :  { %v1378_v23 = vadd.f32 %v1645_v19, %v1377_v22 }
0x10fc   :  { %v1382_v26 = vsel %vm1381_vm7, %v1645_v19, %v1378_v23 }
0x10fd   :  { %v1387_v28 = vsel %vm1384_vm8, %v1386_v27, %v1382_v26 }
0x1132   :  { %v1313_v17 = vpop.permute.xlu0 %1312 }
0x1133   :  { %v1315_v18 = vmul.f32 %v1313_v17, %v1303_v16 }
0x1135   :  { %1317 = vrot.lane.b32.xlu1 %v1315_v18, %s1651_s9 }
0x113a   :  { %v1392_v35 = vpop.permute.xlu0 %1391 }
0x113b   :  { %v1394_v36 = vmul.f32 %v1392_v35, %v1387_v28 }
0x1152   :  { %v1397_v29 = vpop.permute.xlu1 %1396 }
0x1153   :  { %v1399_v30 = vmul.f32 %v1397_v29, %v1387_v28 }
0x1155   :  { %1401 = vrot.lane.b32.xlu2 %v1399_v30, %s1651_s9 }
0x11a7   :  { %v1318_v33 = vpop.permute.xlu1 %1317 }
0x11a8   :  { %v1320_v34 = vadd.f32 %v1318_v33, %v1310_v32 }
0x11aa   :  { %1646 = vtanh.f32 %v1320_v34 }
0x11af   :  { %v1402_v37 = vpop.permute.xlu2 %1401 }
0x11b0   :  { %v1647_v38 = vpop.eup %1646  ;;  %v1404_v39 = vadd.f32 %v1402_v37, %v1394_v36 }
0x11b1   :  { %1323 = vrot.lane.b32.xlu0 %v1647_v38, %s1652_s14 }
0x11b2   :  { %1648 = vtanh.f32 %v1404_v39 }
0x11b8   :  { %v1649_v40 = vpop.eup %1648 }
0x11b9   :  { %1333 = vrot.lane.b32.xlu0 %v1320_v34, %s1653_s15  ;;  %1407 = vrot.lane.b32.xlu1 %v1649_v40, %s1652_s14 }
0x1223   :  { %v1324_v41 = vpop.permute.xlu0 %1323 }
0x1224   :  { %v1326_v42 = vmul.f32 %v1324_v41, %v1303_v16 }
0x1226   :  { %1328 = vrot.lane.b32.xlu2 %v1326_v42, %s1651_s9 }
0x122b   :  { %v1408_v43 = vpop.permute.xlu1 %1407  ;;  %v1334_v44 = vpop.permute.xlu0 %1333 }
0x122c   :  { %v1410_v45 = vmul.f32 %v1408_v43, %v1387_v28  ;;  %1336 = vst.msk [vmem:[#allocation3] sm:$0xf] %vm59_vm0, %v1334_v44 }
0x122e   :  { %1412 = vrot.lane.b32.xlu1 %v1410_v45, %s1651_s9  ;;  %1417 = vrot.lane.b32.xlu2 %v1404_v39, %s1653_s15 }
0x1280   :  { %v1329_v46 = vpop.permute.xlu2 %1328 }
0x1281   :  { %1331 = vst.msk [vmem:[#allocation2] sm:$0xf] %vm59_vm0, %v1329_v46 }
0x1282   :  { %1515 = vst.msk [vmem:[%s1996_s4 + $0x1c] sm:$0xf] %vm59_vm0, %v1329_v46 }
0x1288   :  { %v1418_v47 = vpop.permute.xlu2 %1417 }
0x1289   :  { %1420 = vst.msk [vmem:[#allocation5] sm:$0xf] %vm59_vm0, %v1418_v47 }
0x12a0   :  { %v1413_v48 = vpop.permute.xlu1 %1412 }
0x12a1   :  { %1415 = vst.msk [vmem:[#allocation4] sm:$0xf] %vm59_vm0, %v1413_v48 }
0x12a2   :  { %1421 = vst.msk [vmem:[%s1997_s5] sm:$0xf] %vm59_vm0, %v1413_v48 }

</bundles_post_ra>
